<compile_context>
chip_gen: v7x
topology: tpu7x:2x2x1
jax: 0.10.0
libtpu: 0.0.40
codegen_flags: <defaults>
</compile_context>

<pallas_src>
import functools

import jax
import jax.numpy as jnp
from jax import lax
from jax.experimental import pallas as pl
from jax.experimental.pallas import tpu as pltpu

N_FILTERS = 512
HIDDEN = N_FILTERS // 4  # 128
BN_EPS = 1e-5


def _pad_to_lanes(n):
    return ((n + 127) // 128) * 128


def _batchnorm_train(h, gamma, beta):
    mu = jnp.mean(h, axis=0, keepdims=True)
    var = jnp.mean((h - mu) ** 2, axis=0, keepdims=True)  # biased variance
    return (h - mu) * lax.rsqrt(var + BN_EPS) * gamma + beta


# ----------------------------------------------------------------------------
# Fused kernel: MLP+BN -> hoisted LSTM input projection -> unrolled LSTM
#               recurrence -> adv linear + masked softmax.
# Input rows are presented in time-major order (row = t*B + b).
# ----------------------------------------------------------------------------
def imnet_fused_kernel(x_ref, w1_ref, b1_ref, g1_ref, be1_ref,
                       w2_ref, b2_ref, g2_ref, be2_ref,
                       wih_ref, whh_ref, lb_ref,
                       advw_ref, advb_ref,
                       h0_ref, c0_ref,
                       probs_ref, hn_ref, cn_ref,
                       xp_sc,
                       *, time_step, batch_size, out_dim):
    H = HIDDEN

    # ---- MLP + BatchNorm (row order is irrelevant for batch statistics) ----
    x = x_ref[...]                                                   # (T*B, in)
    h1 = jnp.dot(x, w1_ref[...], preferred_element_type=jnp.float32) + b1_ref[...]
    h1 = jnp.maximum(h1, 0.0)
    h1 = _batchnorm_train(h1, g1_ref[...], be1_ref[...])             # (T*B, 512)

    h2 = jnp.dot(h1, w2_ref[...], preferred_element_type=jnp.float32) + b2_ref[...]
    h2 = jnp.maximum(h2, 0.0)
    lin = _batchnorm_train(h2, g2_ref[...], be2_ref[...])            # (T*B, 128)

    # ---- Hoisted LSTM input projection for ALL timesteps at once ----
    xp_sc[...] = (jnp.dot(lin, wih_ref[...], preferred_element_type=jnp.float32)
                  + lb_ref[...])                                     # (T*B, 4H)

    # ---- LSTM recurrence, statically unrolled over time ----
    whh = whh_ref[...]
    h = h0_ref[...]
    c = c0_ref[...]
    for t in range(time_step):
        x_t = xp_sc[pl.ds(t * batch_size, batch_size), :]            # (B, 4H)
        gates = x_t + jnp.dot(h, whh, preferred_element_type=jnp.float32)
        i_g = jax.nn.sigmoid(gates[:, 0 * H:1 * H])
        f_g = jax.nn.sigmoid(gates[:, 1 * H:2 * H])
        g_g = jnp.tanh(gates[:, 2 * H:3 * H])
        o_g = jax.nn.sigmoid(gates[:, 3 * H:4 * H])
        c = f_g * c + i_g * g_g
        h = o_g * jnp.tanh(c)

    hn_ref[...] = h
    cn_ref[...] = c

    # ---- Head: adv linear + softmax over the real out_dim lanes ----
    logits = (jnp.dot(h, advw_ref[...], preferred_element_type=jnp.float32)
              + advb_ref[...])                                       # (B, pad)
    lane = lax.broadcasted_iota(jnp.int32, logits.shape, 1)
    logits = jnp.where(lane < out_dim, logits, jnp.finfo(jnp.float32).min)
    m = jnp.max(logits, axis=1, keepdims=True)
    e = jnp.exp(logits - m)
    probs_ref[...] = e / jnp.sum(e, axis=1, keepdims=True)           # exact div


# ----------------------------------------------------------------------------
# Forward wrapper (single pallas_call; only a 2 KiB input reorder outside)
# ----------------------------------------------------------------------------
def imnet_forward(params, x, batch_size, time_step, hidden_state, cell_state):
    in_dim = params["w1"].shape[0]
    out_dim = params["out_dim"]
    out_pad = params["adv_w_pad"].shape[1]

    # PyTorch does x.view(B*T, in_dim) with batch-major rows; reorder the raw
    # input to time-major rows (row = t*B + b) so per-step LSTM slices are
    # contiguous inside the kernel. This touches only the tiny raw input.
    x_tm = jnp.transpose(x.reshape(batch_size, time_step, in_dim), (1, 0, 2))
    x_tm = x_tm.reshape(batch_size * time_step, in_dim)

    h0 = hidden_state[0]  # (B, H)
    c0 = cell_state[0]

    full = lambda a: pl.BlockSpec(a.shape, lambda i: (0,) * a.ndim)
    kernel = functools.partial(imnet_fused_kernel,
                               time_step=time_step,
                               batch_size=batch_size,
                               out_dim=out_dim)

    probs_pad, h_n, c_n = pl.pallas_call(
        kernel,
        out_shape=(jax.ShapeDtypeStruct((batch_size, out_pad), jnp.float32),
                   jax.ShapeDtypeStruct((batch_size, HIDDEN), jnp.float32),
                   jax.ShapeDtypeStruct((batch_size, HIDDEN), jnp.float32)),
        grid=(1,),
        in_specs=[full(x_tm),
                  full(params["w1"]), full(params["b1"]),
                  full(params["g1"]), full(params["be1"]),
                  full(params["w2"]), full(params["b2"]),
                  full(params["g2"]), full(params["be2"]),
                  full(params["wih_t"]), full(params["whh_t"]),
                  full(params["lstm_b"]),
                  full(params["adv_w_pad"]), full(params["adv_b_pad"]),
                  full(h0), full(c0)],
        out_specs=(pl.BlockSpec((batch_size, out_pad), lambda i: (0, 0)),
                   pl.BlockSpec((batch_size, HIDDEN), lambda i: (0, 0)),
                   pl.BlockSpec((batch_size, HIDDEN), lambda i: (0, 0))),
        scratch_shapes=[pltpu.VMEM((batch_size * time_step, 4 * HIDDEN),
                                   jnp.float32)],
    )(x_tm,
      params["w1"], params["b1"], params["g1"], params["be1"],
      params["w2"], params["b2"], params["g2"], params["be2"],
      params["wih_t"], params["whh_t"], params["lstm_b"],
      params["adv_w_pad"], params["adv_b_pad"], h0, c0)

    probs = probs_pad[:, :out_dim]
    # PyTorch returns (h_n, c_n) with shape (num_layers=1, B, H)
    return probs, (h_n[None], c_n[None])


# ----------------------------------------------------------------------------
# Pure-JAX reference (same math) for a correctness cross-check
# ----------------------------------------------------------------------------
def imnet_reference(params, x, batch_size, time_step, hidden_state, cell_state):
    in_dim = params["w1"].shape[0]
    out_dim = params["out_dim"]
    x2d = x.reshape(batch_size * time_step, in_dim)
    h1 = jnp.maximum(x2d @ params["w1"] + params["b1"], 0.0)
    h1 = _batchnorm_train(h1, params["g1"], params["be1"])
    h2 = jnp.maximum(h1 @ params["w2"] + params["b2"], 0.0)
    lin = _batchnorm_train(h2, params["g2"], params["be2"])
    seq = lin.reshape(batch_size, time_step, HIDDEN)
    h, c = hidden_state[0], cell_state[0]
    for t in range(time_step):
        gates = (seq[:, t, :] @ params["wih_t"] + h @ params["whh_t"]
                 + params["lstm_b"])
        i = jax.nn.sigmoid(gates[:, :HIDDEN])
        f = jax.nn.sigmoid(gates[:, HIDDEN:2 * HIDDEN])
        g = jnp.tanh(gates[:, 2 * HIDDEN:3 * HIDDEN])
        o = jax.nn.sigmoid(gates[:, 3 * HIDDEN:])
        c = f * c + i * g
        h = o * jnp.tanh(c)
    logits = (h @ params["adv_w_pad"][:, :out_dim]
              + params["adv_b_pad"][:, :out_dim])
    return jax.nn.softmax(logits, axis=1), (h[None], c[None])


def init_params(key, in_dim, out_dim):
    ks = jax.random.split(key, 8)
    s = 0.05
    out_pad = _pad_to_lanes(out_dim)
    adv_w = jax.random.normal(ks[7], (HIDDEN, out_dim), jnp.float32) * s
    adv_b = jnp.zeros((1, out_dim), jnp.float32)
    params = {
        "w1": jax.random.normal(ks[0], (in_dim, N_FILTERS), jnp.float32) * s,
        "b1": jax.random.normal(ks[1], (1, N_FILTERS), jnp.float32) * s,
        "g1": jnp.ones((1, N_FILTERS), jnp.float32),    # BatchNorm1d default weight
        "be1": jnp.zeros((1, N_FILTERS), jnp.float32),  # BatchNorm1d default bias
        "w2": jax.random.normal(ks[2], (N_FILTERS, HIDDEN), jnp.float32) * s,
        "b2": jax.random.normal(ks[3], (1, HIDDEN), jnp.float32) * s,
        "g2": jnp.ones((1, HIDDEN), jnp.float32),
        "be2": jnp.zeros((1, HIDDEN), jnp.float32),
        # LSTM weights stored transposed: (input, 4H) / (hidden, 4H); gate order i,f,g,o
        "wih_t": jax.random.normal(ks[4], (HIDDEN, 4 * HIDDEN), jnp.float32) * s,
        "whh_t": jax.random.normal(ks[5], (HIDDEN, 4 * HIDDEN), jnp.float32) * s,
        # combined bias b_ih + b_hh
        "lstm_b": jax.random.normal(ks[6], (1, 4 * HIDDEN), jnp.float32) * s,
        # adv weights zero-padded to a lane-dense (128-multiple) output width
        "adv_w_pad": jnp.pad(adv_w, ((0, 0), (0, out_pad - out_dim))),
        "adv_b_pad": jnp.pad(adv_b, ((0, 0), (0, out_pad - out_dim))),
        "out_dim": out_dim,
    }
    return params


if __name__ == "__main__":
    key = jax.random.PRNGKey(0)
    batch_size, time_step = 2, 8
    in_dim, out_dim = 32, 10

    kp, kx = jax.random.split(key)
    params = init_params(kp, in_dim, out_dim)

    x = jax.random.normal(kx, (batch_size, time_step, in_dim), jnp.float32)
    hidden_state = jnp.zeros((1, batch_size, HIDDEN), jnp.float32)
    cell_state = jnp.zeros((1, batch_size, HIDDEN), jnp.float32)

    probs, (h_n, c_n) = imnet_forward(params, x, batch_size, time_step,
                                      hidden_state, cell_state)
    jax.block_until_ready((probs, h_n, c_n))

    assert probs.shape == (batch_size, out_dim)
    assert h_n.shape == (1, batch_size, HIDDEN)
    assert c_n.shape == (1, batch_size, HIDDEN)
    # softmax rows sum to 1 (exact division kept in the kernel)
    assert jnp.allclose(jnp.sum(probs, axis=1), 1.0, atol=1e-5)

    # cross-check against a pure-JAX reference of the same math
    probs_ref, (h_ref, c_ref) = imnet_reference(params, x, batch_size,
                                                time_step, hidden_state,
                                                cell_state)
    assert jnp.allclose(probs, probs_ref, atol=1e-3, rtol=1e-3)
    assert jnp.allclose(h_n, h_ref, atol=1e-3, rtol=1e-3)
    assert jnp.allclose(c_n, c_ref, atol=1e-3, rtol=1e-3)

    print("KERNEL_OK")
</pallas_src>

<mosaic_0001>
module attributes {stable_mosaic.version = 11 : i64} {
  func.func @imnet_fused_kernel(%arg0: i32, %arg1: memref<16x32xf32, #tpu.memory_space<vmem>>, %arg2: memref<32x512xf32, #tpu.memory_space<vmem>>, %arg3: memref<1x512xf32, #tpu.memory_space<vmem>>, %arg4: memref<1x512xf32, #tpu.memory_space<vmem>>, %arg5: memref<1x512xf32, #tpu.memory_space<vmem>>, %arg6: memref<512x128xf32, #tpu.memory_space<vmem>>, %arg7: memref<1x128xf32, #tpu.memory_space<vmem>>, %arg8: memref<1x128xf32, #tpu.memory_space<vmem>>, %arg9: memref<1x128xf32, #tpu.memory_space<vmem>>, %arg10: memref<128x512xf32, #tpu.memory_space<vmem>>, %arg11: memref<128x512xf32, #tpu.memory_space<vmem>>, %arg12: memref<1x512xf32, #tpu.memory_space<vmem>>, %arg13: memref<128x128xf32, #tpu.memory_space<vmem>>, %arg14: memref<1x128xf32, #tpu.memory_space<vmem>>, %arg15: memref<2x128xf32, #tpu.memory_space<vmem>>, %arg16: memref<2x128xf32, #tpu.memory_space<vmem>>, %arg17: memref<2x128xf32, #tpu.memory_space<vmem>>, %arg18: memref<2x128xf32, #tpu.memory_space<vmem>>, %arg19: memref<2x128xf32, #tpu.memory_space<vmem>>, %arg20: memref<16x512xf32, #tpu.memory_space<vmem>>) attributes {dimension_semantics = [#tpu.dimension_semantics<arbitrary>], iteration_bounds = array<i64: 1>, scalar_prefetch = 0 : i64, scratch_operands = 1 : i64, tpu.core_type = #tpu.core_type<tc>, window_params = [{pipeline_mode = #tpu.pipeline_mode<synchronous>, transform_indices = @transform_0, window_bounds = array<i64: 16, 32>}, {pipeline_mode = #tpu.pipeline_mode<synchronous>, transform_indices = @transform_1, window_bounds = array<i64: 32, 512>}, {pipeline_mode = #tpu.pipeline_mode<synchronous>, transform_indices = @transform_2, window_bounds = array<i64: 1, 512>}, {pipeline_mode = #tpu.pipeline_mode<synchronous>, transform_indices = @transform_3, window_bounds = array<i64: 1, 512>}, {pipeline_mode = #tpu.pipeline_mode<synchronous>, transform_indices = @transform_4, window_bounds = array<i64: 1, 512>}, {pipeline_mode = #tpu.pipeline_mode<synchronous>, transform_indices = @transform_5, window_bounds = array<i64: 512, 128>}, {pipeline_mode = #tpu.pipeline_mode<synchronous>, transform_indices = @transform_6, window_bounds = array<i64: 1, 128>}, {pipeline_mode = #tpu.pipeline_mode<synchronous>, transform_indices = @transform_7, window_bounds = array<i64: 1, 128>}, {pipeline_mode = #tpu.pipeline_mode<synchronous>, transform_indices = @transform_8, window_bounds = array<i64: 1, 128>}, {pipeline_mode = #tpu.pipeline_mode<synchronous>, transform_indices = @transform_9, window_bounds = array<i64: 128, 512>}, {pipeline_mode = #tpu.pipeline_mode<synchronous>, transform_indices = @transform_10, window_bounds = array<i64: 128, 512>}, {pipeline_mode = #tpu.pipeline_mode<synchronous>, transform_indices = @transform_11, window_bounds = array<i64: 1, 512>}, {pipeline_mode = #tpu.pipeline_mode<synchronous>, transform_indices = @transform_12, window_bounds = array<i64: 128, 128>}, {pipeline_mode = #tpu.pipeline_mode<synchronous>, transform_indices = @transform_13, window_bounds = array<i64: 1, 128>}, {pipeline_mode = #tpu.pipeline_mode<synchronous>, transform_indices = @transform_14, window_bounds = array<i64: 2, 128>}, {pipeline_mode = #tpu.pipeline_mode<synchronous>, transform_indices = @transform_15, window_bounds = array<i64: 2, 128>}, {pipeline_mode = #tpu.pipeline_mode<synchronous>, transform_indices = @transform_16, window_bounds = array<i64: 2, 128>}, {pipeline_mode = #tpu.pipeline_mode<synchronous>, transform_indices = @transform_17, window_bounds = array<i64: 2, 128>}, {pipeline_mode = #tpu.pipeline_mode<synchronous>, transform_indices = @transform_18, window_bounds = array<i64: 2, 128>}]} {
    %c0 = arith.constant 0 : index
    %c0_0 = arith.constant 0 : index
    %0 = vector.load %arg1[%c0, %c0_0] : memref<16x32xf32, #tpu.memory_space<vmem>>, vector<16x32xf32>
    %c0_1 = arith.constant 0 : index
    %c0_2 = arith.constant 0 : index
    %1 = vector.load %arg2[%c0_1, %c0_2] : memref<32x512xf32, #tpu.memory_space<vmem>>, vector<32x512xf32>
    %cst = arith.constant dense<0.000000e+00> : vector<16x512xf32>
    %2 = tpu.matmul %0, %1, %cst {dimension_numbers = #tpu.dot_dimension_numbers<[1], [0], [0], [1], [0, 0, 1, 1], [], []>} : vector<16x32xf32>, vector<32x512xf32>, vector<16x512xf32> -> vector<16x512xf32>
    %c0_3 = arith.constant 0 : index
    %c0_4 = arith.constant 0 : index
    %3 = vector.load %arg3[%c0_3, %c0_4] : memref<1x512xf32, #tpu.memory_space<vmem>>, vector<1x512xf32>
    %4 = vector.broadcast %3 : vector<1x512xf32> to vector<16x512xf32>
    %5 = arith.addf %2, %4 : vector<16x512xf32>
    %cst_5 = arith.constant 0.000000e+00 : f32
    %6 = vector.broadcast %cst_5 : f32 to vector<16x512xf32>
    %7 = arith.maximumf %5, %6 : vector<16x512xf32>
    %c0_6 = arith.constant 0 : index
    %c0_7 = arith.constant 0 : index
    %8 = vector.load %arg4[%c0_6, %c0_7] : memref<1x512xf32, #tpu.memory_space<vmem>>, vector<1x512xf32>
    %c0_8 = arith.constant 0 : index
    %c0_9 = arith.constant 0 : index
    %9 = vector.load %arg5[%c0_8, %c0_9] : memref<1x512xf32, #tpu.memory_space<vmem>>, vector<1x512xf32>
    %cst_10 = arith.constant dense<0.000000e+00> : vector<512xf32>
    %10 = vector.multi_reduction <add>, %7, %cst_10 [0] : vector<16x512xf32> to vector<512xf32>
    %11 = vector.shape_cast %10 : vector<512xf32> to vector<1x512xf32>
    %cst_11 = arith.constant 1.600000e+01 : f32
    %12 = vector.broadcast %cst_11 : f32 to vector<1x512xf32>
    %13 = arith.divf %11, %12 : vector<1x512xf32>
    %14 = vector.broadcast %13 : vector<1x512xf32> to vector<16x512xf32>
    %15 = arith.subf %7, %14 : vector<16x512xf32>
    %16 = arith.mulf %15, %15 : vector<16x512xf32>
    %cst_12 = arith.constant dense<0.000000e+00> : vector<512xf32>
    %17 = vector.multi_reduction <add>, %16, %cst_12 [0] : vector<16x512xf32> to vector<512xf32>
    %18 = vector.shape_cast %17 : vector<512xf32> to vector<1x512xf32>
    %cst_13 = arith.constant 1.600000e+01 : f32
    %19 = vector.broadcast %cst_13 : f32 to vector<1x512xf32>
    %20 = arith.divf %18, %19 : vector<1x512xf32>
    %21 = vector.broadcast %13 : vector<1x512xf32> to vector<16x512xf32>
    %22 = arith.subf %7, %21 : vector<16x512xf32>
    %cst_14 = arith.constant 9.99999974E-6 : f32
    %23 = vector.broadcast %cst_14 : f32 to vector<1x512xf32>
    %24 = arith.addf %20, %23 : vector<1x512xf32>
    %25 = math.rsqrt %24 : vector<1x512xf32>
    %26 = vector.broadcast %25 : vector<1x512xf32> to vector<16x512xf32>
    %27 = arith.mulf %22, %26 : vector<16x512xf32>
    %28 = vector.broadcast %8 : vector<1x512xf32> to vector<16x512xf32>
    %29 = arith.mulf %27, %28 : vector<16x512xf32>
    %30 = vector.broadcast %9 : vector<1x512xf32> to vector<16x512xf32>
    %31 = arith.addf %29, %30 : vector<16x512xf32>
    %c0_15 = arith.constant 0 : index
    %c0_16 = arith.constant 0 : index
    %32 = vector.load %arg6[%c0_15, %c0_16] : memref<512x128xf32, #tpu.memory_space<vmem>>, vector<512x128xf32>
    %cst_17 = arith.constant dense<0.000000e+00> : vector<16x128xf32>
    %33 = tpu.matmul %31, %32, %cst_17 {dimension_numbers = #tpu.dot_dimension_numbers<[1], [0], [0], [1], [0, 0, 1, 1], [], []>} : vector<16x512xf32>, vector<512x128xf32>, vector<16x128xf32> -> vector<16x128xf32>
    %c0_18 = arith.constant 0 : index
    %c0_19 = arith.constant 0 : index
    %34 = vector.load %arg7[%c0_18, %c0_19] : memref<1x128xf32, #tpu.memory_space<vmem>>, vector<1x128xf32>
    %35 = vector.broadcast %34 : vector<1x128xf32> to vector<16x128xf32>
    %36 = arith.addf %33, %35 : vector<16x128xf32>
    %cst_20 = arith.constant 0.000000e+00 : f32
    %37 = vector.broadcast %cst_20 : f32 to vector<16x128xf32>
    %38 = arith.maximumf %36, %37 : vector<16x128xf32>
    %c0_21 = arith.constant 0 : index
    %c0_22 = arith.constant 0 : index
    %39 = vector.load %arg8[%c0_21, %c0_22] : memref<1x128xf32, #tpu.memory_space<vmem>>, vector<1x128xf32>
    %c0_23 = arith.constant 0 : index
    %c0_24 = arith.constant 0 : index
    %40 = vector.load %arg9[%c0_23, %c0_24] : memref<1x128xf32, #tpu.memory_space<vmem>>, vector<1x128xf32>
    %cst_25 = arith.constant dense<0.000000e+00> : vector<128xf32>
    %41 = vector.multi_reduction <add>, %38, %cst_25 [0] : vector<16x128xf32> to vector<128xf32>
    %42 = vector.shape_cast %41 : vector<128xf32> to vector<1x128xf32>
    %cst_26 = arith.constant 1.600000e+01 : f32
    %43 = vector.broadcast %cst_26 : f32 to vector<1x128xf32>
    %44 = arith.divf %42, %43 : vector<1x128xf32>
    %45 = vector.broadcast %44 : vector<1x128xf32> to vector<16x128xf32>
    %46 = arith.subf %38, %45 : vector<16x128xf32>
    %47 = arith.mulf %46, %46 : vector<16x128xf32>
    %cst_27 = arith.constant dense<0.000000e+00> : vector<128xf32>
    %48 = vector.multi_reduction <add>, %47, %cst_27 [0] : vector<16x128xf32> to vector<128xf32>
    %49 = vector.shape_cast %48 : vector<128xf32> to vector<1x128xf32>
    %cst_28 = arith.constant 1.600000e+01 : f32
    %50 = vector.broadcast %cst_28 : f32 to vector<1x128xf32>
    %51 = arith.divf %49, %50 : vector<1x128xf32>
    %52 = vector.broadcast %44 : vector<1x128xf32> to vector<16x128xf32>
    %53 = arith.subf %38, %52 : vector<16x128xf32>
    %cst_29 = arith.constant 9.99999974E-6 : f32
    %54 = vector.broadcast %cst_29 : f32 to vector<1x128xf32>
    %55 = arith.addf %51, %54 : vector<1x128xf32>
    %56 = math.rsqrt %55 : vector<1x128xf32>
    %57 = vector.broadcast %56 : vector<1x128xf32> to vector<16x128xf32>
    %58 = arith.mulf %53, %57 : vector<16x128xf32>
    %59 = vector.broadcast %39 : vector<1x128xf32> to vector<16x128xf32>
    %60 = arith.mulf %58, %59 : vector<16x128xf32>
    %61 = vector.broadcast %40 : vector<1x128xf32> to vector<16x128xf32>
    %62 = arith.addf %60, %61 : vector<16x128xf32>
    %c0_30 = arith.constant 0 : index
    %c0_31 = arith.constant 0 : index
    %63 = vector.load %arg10[%c0_30, %c0_31] : memref<128x512xf32, #tpu.memory_space<vmem>>, vector<128x512xf32>
    %cst_32 = arith.constant dense<0.000000e+00> : vector<16x512xf32>
    %64 = tpu.matmul %62, %63, %cst_32 {dimension_numbers = #tpu.dot_dimension_numbers<[1], [0], [0], [1], [0, 0, 1, 1], [], []>} : vector<16x128xf32>, vector<128x512xf32>, vector<16x512xf32> -> vector<16x512xf32>
    %c0_33 = arith.constant 0 : index
    %c0_34 = arith.constant 0 : index
    %65 = vector.load %arg12[%c0_33, %c0_34] : memref<1x512xf32, #tpu.memory_space<vmem>>, vector<1x512xf32>
    %66 = vector.broadcast %65 : vector<1x512xf32> to vector<16x512xf32>
    %67 = arith.addf %64, %66 : vector<16x512xf32>
    %c0_35 = arith.constant 0 : index
    %c0_36 = arith.constant 0 : index
    %68 = vector.load %arg20[%c0_35, %c0_36] : memref<16x512xf32, #tpu.memory_space<vmem>>, vector<16x512xf32>
    tpu.vector_store %arg20[%c0_35, %c0_36], %67 {strides = array<i32>} : memref<16x512xf32, #tpu.memory_space<vmem>>, vector<16x512xf32>,
    %c0_37 = arith.constant 0 : index
    %c0_38 = arith.constant 0 : index
    %69 = vector.load %arg11[%c0_37, %c0_38] : memref<128x512xf32, #tpu.memory_space<vmem>>, vector<128x512xf32>
    %c0_39 = arith.constant 0 : index
    %c0_40 = arith.constant 0 : index
    %70 = vector.load %arg15[%c0_39, %c0_40] : memref<2x128xf32, #tpu.memory_space<vmem>>, vector<2x128xf32>
    %c0_41 = arith.constant 0 : index
    %c0_42 = arith.constant 0 : index
    %71 = vector.load %arg16[%c0_41, %c0_42] : memref<2x128xf32, #tpu.memory_space<vmem>>, vector<2x128xf32>
    %c0_43 = arith.constant 0 : index
    %c0_44 = arith.constant 0 : index
    %72 = vector.load %arg20[%c0_43, %c0_44] : memref<16x512xf32, #tpu.memory_space<vmem>>, vector<2x512xf32>
    %cst_45 = arith.constant dense<0.000000e+00> : vector<2x512xf32>
    %73 = tpu.matmul %70, %69, %cst_45 {dimension_numbers = #tpu.dot_dimension_numbers<[1], [0], [0], [1], [0, 0, 1, 1], [], []>} : vector<2x128xf32>, vector<128x512xf32>, vector<2x512xf32> -> vector<2x512xf32>
    %74 = arith.addf %72, %73 : vector<2x512xf32>
    %75 = vector.extract_strided_slice %74 {offsets = [0, 0], sizes = [2, 128], strides = [1, 1]} : vector<2x512xf32> to vector<2x128xf32>
    %76 = arith.negf %75 : vector<2x128xf32>
    %77 = math.exp %76 : vector<2x128xf32>
    %cst_46 = arith.constant 1.000000e+00 : f32
    %78 = vector.broadcast %cst_46 : f32 to vector<2x128xf32>
    %79 = arith.addf %78, %77 : vector<2x128xf32>
    %80 = arith.divf %78, %79 : vector<2x128xf32>
    %81 = vector.extract_strided_slice %74 {offsets = [0, 128], sizes = [2, 128], strides = [1, 1]} : vector<2x512xf32> to vector<2x128xf32>
    %82 = arith.negf %81 : vector<2x128xf32>
    %83 = math.exp %82 : vector<2x128xf32>
    %cst_47 = arith.constant 1.000000e+00 : f32
    %84 = vector.broadcast %cst_47 : f32 to vector<2x128xf32>
    %85 = arith.addf %84, %83 : vector<2x128xf32>
    %86 = arith.divf %84, %85 : vector<2x128xf32>
    %87 = vector.extract_strided_slice %74 {offsets = [0, 256], sizes = [2, 128], strides = [1, 1]} : vector<2x512xf32> to vector<2x128xf32>
    %88 = math.tanh %87 : vector<2x128xf32>
    %89 = vector.extract_strided_slice %74 {offsets = [0, 384], sizes = [2, 128], strides = [1, 1]} : vector<2x512xf32> to vector<2x128xf32>
    %90 = arith.negf %89 : vector<2x128xf32>
    %91 = math.exp %90 : vector<2x128xf32>
    %cst_48 = arith.constant 1.000000e+00 : f32
    %92 = vector.broadcast %cst_48 : f32 to vector<2x128xf32>
    %93 = arith.addf %92, %91 : vector<2x128xf32>
    %94 = arith.divf %92, %93 : vector<2x128xf32>
    %95 = arith.mulf %86, %71 : vector<2x128xf32>
    %96 = arith.mulf %80, %88 : vector<2x128xf32>
    %97 = arith.addf %95, %96 : vector<2x128xf32>
    %98 = math.tanh %97 : vector<2x128xf32>
    %99 = arith.mulf %94, %98 : vector<2x128xf32>
    %c2 = arith.constant 2 : index
    %c0_49 = arith.constant 0 : index
    %100 = vector.load %arg20[%c2, %c0_49] : memref<16x512xf32, #tpu.memory_space<vmem>>, vector<2x512xf32>
    %cst_50 = arith.constant dense<0.000000e+00> : vector<2x512xf32>
    %101 = tpu.matmul %99, %69, %cst_50 {dimension_numbers = #tpu.dot_dimension_numbers<[1], [0], [0], [1], [0, 0, 1, 1], [], []>} : vector<2x128xf32>, vector<128x512xf32>, vector<2x512xf32> -> vector<2x512xf32>
    %102 = arith.addf %100, %101 : vector<2x512xf32>
    %103 = vector.extract_strided_slice %102 {offsets = [0, 0], sizes = [2, 128], strides = [1, 1]} : vector<2x512xf32> to vector<2x128xf32>
    %104 = arith.negf %103 : vector<2x128xf32>
    %105 = math.exp %104 : vector<2x128xf32>
    %cst_51 = arith.constant 1.000000e+00 : f32
    %106 = vector.broadcast %cst_51 : f32 to vector<2x128xf32>
    %107 = arith.addf %106, %105 : vector<2x128xf32>
    %108 = arith.divf %106, %107 : vector<2x128xf32>
    %109 = vector.extract_strided_slice %102 {offsets = [0, 128], sizes = [2, 128], strides = [1, 1]} : vector<2x512xf32> to vector<2x128xf32>
    %110 = arith.negf %109 : vector<2x128xf32>
    %111 = math.exp %110 : vector<2x128xf32>
    %cst_52 = arith.constant 1.000000e+00 : f32
    %112 = vector.broadcast %cst_52 : f32 to vector<2x128xf32>
    %113 = arith.addf %112, %111 : vector<2x128xf32>
    %114 = arith.divf %112, %113 : vector<2x128xf32>
    %115 = vector.extract_strided_slice %102 {offsets = [0, 256], sizes = [2, 128], strides = [1, 1]} : vector<2x512xf32> to vector<2x128xf32>
    %116 = math.tanh %115 : vector<2x128xf32>
    %117 = vector.extract_strided_slice %102 {offsets = [0, 384], sizes = [2, 128], strides = [1, 1]} : vector<2x512xf32> to vector<2x128xf32>
    %118 = arith.negf %117 : vector<2x128xf32>
    %119 = math.exp %118 : vector<2x128xf32>
    %cst_53 = arith.constant 1.000000e+00 : f32
    %120 = vector.broadcast %cst_53 : f32 to vector<2x128xf32>
    %121 = arith.addf %120, %119 : vector<2x128xf32>
    %122 = arith.divf %120, %121 : vector<2x128xf32>
    %123 = arith.mulf %114, %97 : vector<2x128xf32>
    %124 = arith.mulf %108, %116 : vector<2x128xf32>
    %125 = arith.addf %123, %124 : vector<2x128xf32>
    %126 = math.tanh %125 : vector<2x128xf32>
    %127 = arith.mulf %122, %126 : vector<2x128xf32>
    %c4 = arith.constant 4 : index
    %c0_54 = arith.constant 0 : index
    %128 = vector.load %arg20[%c4, %c0_54] : memref<16x512xf32, #tpu.memory_space<vmem>>, vector<2x512xf32>
    %cst_55 = arith.constant dense<0.000000e+00> : vector<2x512xf32>
    %129 = tpu.matmul %127, %69, %cst_55 {dimension_numbers = #tpu.dot_dimension_numbers<[1], [0], [0], [1], [0, 0, 1, 1], [], []>} : vector<2x128xf32>, vector<128x512xf32>, vector<2x512xf32> -> vector<2x512xf32>
    %130 = arith.addf %128, %129 : vector<2x512xf32>
    %131 = vector.extract_strided_slice %130 {offsets = [0, 0], sizes = [2, 128], strides = [1, 1]} : vector<2x512xf32> to vector<2x128xf32>
    %132 = arith.negf %131 : vector<2x128xf32>
    %133 = math.exp %132 : vector<2x128xf32>
    %cst_56 = arith.constant 1.000000e+00 : f32
    %134 = vector.broadcast %cst_56 : f32 to vector<2x128xf32>
    %135 = arith.addf %134, %133 : vector<2x128xf32>
    %136 = arith.divf %134, %135 : vector<2x128xf32>
    %137 = vector.extract_strided_slice %130 {offsets = [0, 128], sizes = [2, 128], strides = [1, 1]} : vector<2x512xf32> to vector<2x128xf32>
    %138 = arith.negf %137 : vector<2x128xf32>
    %139 = math.exp %138 : vector<2x128xf32>
    %cst_57 = arith.constant 1.000000e+00 : f32
    %140 = vector.broadcast %cst_57 : f32 to vector<2x128xf32>
    %141 = arith.addf %140, %139 : vector<2x128xf32>
    %142 = arith.divf %140, %141 : vector<2x128xf32>
    %143 = vector.extract_strided_slice %130 {offsets = [0, 256], sizes = [2, 128], strides = [1, 1]} : vector<2x512xf32> to vector<2x128xf32>
    %144 = math.tanh %143 : vector<2x128xf32>
    %145 = vector.extract_strided_slice %130 {offsets = [0, 384], sizes = [2, 128], strides = [1, 1]} : vector<2x512xf32> to vector<2x128xf32>
    %146 = arith.negf %145 : vector<2x128xf32>
    %147 = math.exp %146 : vector<2x128xf32>
    %cst_58 = arith.constant 1.000000e+00 : f32
    %148 = vector.broadcast %cst_58 : f32 to vector<2x128xf32>
    %149 = arith.addf %148, %147 : vector<2x128xf32>
    %150 = arith.divf %148, %149 : vector<2x128xf32>
    %151 = arith.mulf %142, %125 : vector<2x128xf32>
    %152 = arith.mulf %136, %144 : vector<2x128xf32>
    %153 = arith.addf %151, %152 : vector<2x128xf32>
    %154 = math.tanh %153 : vector<2x128xf32>
    %155 = arith.mulf %150, %154 : vector<2x128xf32>
    %c6 = arith.constant 6 : index
    %c0_59 = arith.constant 0 : index
    %156 = vector.load %arg20[%c6, %c0_59] : memref<16x512xf32, #tpu.memory_space<vmem>>, vector<2x512xf32>
    %cst_60 = arith.constant dense<0.000000e+00> : vector<2x512xf32>
    %157 = tpu.matmul %155, %69, %cst_60 {dimension_numbers = #tpu.dot_dimension_numbers<[1], [0], [0], [1], [0, 0, 1, 1], [], []>} : vector<2x128xf32>, vector<128x512xf32>, vector<2x512xf32> -> vector<2x512xf32>
    %158 = arith.addf %156, %157 : vector<2x512xf32>
    %159 = vector.extract_strided_slice %158 {offsets = [0, 0], sizes = [2, 128], strides = [1, 1]} : vector<2x512xf32> to vector<2x128xf32>
    %160 = arith.negf %159 : vector<2x128xf32>
    %161 = math.exp %160 : vector<2x128xf32>
    %cst_61 = arith.constant 1.000000e+00 : f32
    %162 = vector.broadcast %cst_61 : f32 to vector<2x128xf32>
    %163 = arith.addf %162, %161 : vector<2x128xf32>
    %164 = arith.divf %162, %163 : vector<2x128xf32>
    %165 = vector.extract_strided_slice %158 {offsets = [0, 128], sizes = [2, 128], strides = [1, 1]} : vector<2x512xf32> to vector<2x128xf32>
    %166 = arith.negf %165 : vector<2x128xf32>
    %167 = math.exp %166 : vector<2x128xf32>
    %cst_62 = arith.constant 1.000000e+00 : f32
    %168 = vector.broadcast %cst_62 : f32 to vector<2x128xf32>
    %169 = arith.addf %168, %167 : vector<2x128xf32>
    %170 = arith.divf %168, %169 : vector<2x128xf32>
    %171 = vector.extract_strided_slice %158 {offsets = [0, 256], sizes = [2, 128], strides = [1, 1]} : vector<2x512xf32> to vector<2x128xf32>
    %172 = math.tanh %171 : vector<2x128xf32>
    %173 = vector.extract_strided_slice %158 {offsets = [0, 384], sizes = [2, 128], strides = [1, 1]} : vector<2x512xf32> to vector<2x128xf32>
    %174 = arith.negf %173 : vector<2x128xf32>
    %175 = math.exp %174 : vector<2x128xf32>
    %cst_63 = arith.constant 1.000000e+00 : f32
    %176 = vector.broadcast %cst_63 : f32 to vector<2x128xf32>
    %177 = arith.addf %176, %175 : vector<2x128xf32>
    %178 = arith.divf %176, %177 : vector<2x128xf32>
    %179 = arith.mulf %170, %153 : vector<2x128xf32>
    %180 = arith.mulf %164, %172 : vector<2x128xf32>
    %181 = arith.addf %179, %180 : vector<2x128xf32>
    %182 = math.tanh %181 : vector<2x128xf32>
    %183 = arith.mulf %178, %182 : vector<2x128xf32>
    %c8 = arith.constant 8 : index
    %c0_64 = arith.constant 0 : index
    %184 = vector.load %arg20[%c8, %c0_64] : memref<16x512xf32, #tpu.memory_space<vmem>>, vector<2x512xf32>
    %cst_65 = arith.constant dense<0.000000e+00> : vector<2x512xf32>
    %185 = tpu.matmul %183, %69, %cst_65 {dimension_numbers = #tpu.dot_dimension_numbers<[1], [0], [0], [1], [0, 0, 1, 1], [], []>} : vector<2x128xf32>, vector<128x512xf32>, vector<2x512xf32> -> vector<2x512xf32>
    %186 = arith.addf %184, %185 : vector<2x512xf32>
    %187 = vector.extract_strided_slice %186 {offsets = [0, 0], sizes = [2, 128], strides = [1, 1]} : vector<2x512xf32> to vector<2x128xf32>
    %188 = arith.negf %187 : vector<2x128xf32>
    %189 = math.exp %188 : vector<2x128xf32>
    %cst_66 = arith.constant 1.000000e+00 : f32
    %190 = vector.broadcast %cst_66 : f32 to vector<2x128xf32>
    %191 = arith.addf %190, %189 : vector<2x128xf32>
    %192 = arith.divf %190, %191 : vector<2x128xf32>
    %193 = vector.extract_strided_slice %186 {offsets = [0, 128], sizes = [2, 128], strides = [1, 1]} : vector<2x512xf32> to vector<2x128xf32>
    %194 = arith.negf %193 : vector<2x128xf32>
    %195 = math.exp %194 : vector<2x128xf32>
    %cst_67 = arith.constant 1.000000e+00 : f32
    %196 = vector.broadcast %cst_67 : f32 to vector<2x128xf32>
    %197 = arith.addf %196, %195 : vector<2x128xf32>
    %198 = arith.divf %196, %197 : vector<2x128xf32>
    %199 = vector.extract_strided_slice %186 {offsets = [0, 256], sizes = [2, 128], strides = [1, 1]} : vector<2x512xf32> to vector<2x128xf32>
    %200 = math.tanh %199 : vector<2x128xf32>
    %201 = vector.extract_strided_slice %186 {offsets = [0, 384], sizes = [2, 128], strides = [1, 1]} : vector<2x512xf32> to vector<2x128xf32>
    %202 = arith.negf %201 : vector<2x128xf32>
    %203 = math.exp %202 : vector<2x128xf32>
    %cst_68 = arith.constant 1.000000e+00 : f32
    %204 = vector.broadcast %cst_68 : f32 to vector<2x128xf32>
    %205 = arith.addf %204, %203 : vector<2x128xf32>
    %206 = arith.divf %204, %205 : vector<2x128xf32>
    %207 = arith.mulf %198, %181 : vector<2x128xf32>
    %208 = arith.mulf %192, %200 : vector<2x128xf32>
    %209 = arith.addf %207, %208 : vector<2x128xf32>
    %210 = math.tanh %209 : vector<2x128xf32>
    %211 = arith.mulf %206, %210 : vector<2x128xf32>
    %c10 = arith.constant 10 : index
    %c0_69 = arith.constant 0 : index
    %212 = vector.load %arg20[%c10, %c0_69] : memref<16x512xf32, #tpu.memory_space<vmem>>, vector<2x512xf32>
    %cst_70 = arith.constant dense<0.000000e+00> : vector<2x512xf32>
    %213 = tpu.matmul %211, %69, %cst_70 {dimension_numbers = #tpu.dot_dimension_numbers<[1], [0], [0], [1], [0, 0, 1, 1], [], []>} : vector<2x128xf32>, vector<128x512xf32>, vector<2x512xf32> -> vector<2x512xf32>
    %214 = arith.addf %212, %213 : vector<2x512xf32>
    %215 = vector.extract_strided_slice %214 {offsets = [0, 0], sizes = [2, 128], strides = [1, 1]} : vector<2x512xf32> to vector<2x128xf32>
    %216 = arith.negf %215 : vector<2x128xf32>
    %217 = math.exp %216 : vector<2x128xf32>
    %cst_71 = arith.constant 1.000000e+00 : f32
    %218 = vector.broadcast %cst_71 : f32 to vector<2x128xf32>
    %219 = arith.addf %218, %217 : vector<2x128xf32>
    %220 = arith.divf %218, %219 : vector<2x128xf32>
    %221 = vector.extract_strided_slice %214 {offsets = [0, 128], sizes = [2, 128], strides = [1, 1]} : vector<2x512xf32> to vector<2x128xf32>
    %222 = arith.negf %221 : vector<2x128xf32>
    %223 = math.exp %222 : vector<2x128xf32>
    %cst_72 = arith.constant 1.000000e+00 : f32
    %224 = vector.broadcast %cst_72 : f32 to vector<2x128xf32>
    %225 = arith.addf %224, %223 : vector<2x128xf32>
    %226 = arith.divf %224, %225 : vector<2x128xf32>
    %227 = vector.extract_strided_slice %214 {offsets = [0, 256], sizes = [2, 128], strides = [1, 1]} : vector<2x512xf32> to vector<2x128xf32>
    %228 = math.tanh %227 : vector<2x128xf32>
    %229 = vector.extract_strided_slice %214 {offsets = [0, 384], sizes = [2, 128], strides = [1, 1]} : vector<2x512xf32> to vector<2x128xf32>
    %230 = arith.negf %229 : vector<2x128xf32>
    %231 = math.exp %230 : vector<2x128xf32>
    %cst_73 = arith.constant 1.000000e+00 : f32
    %232 = vector.broadcast %cst_73 : f32 to vector<2x128xf32>
    %233 = arith.addf %232, %231 : vector<2x128xf32>
    %234 = arith.divf %232, %233 : vector<2x128xf32>
    %235 = arith.mulf %226, %209 : vector<2x128xf32>
    %236 = arith.mulf %220, %228 : vector<2x128xf32>
    %237 = arith.addf %235, %236 : vector<2x128xf32>
    %238 = math.tanh %237 : vector<2x128xf32>
    %239 = arith.mulf %234, %238 : vector<2x128xf32>
    %c12 = arith.constant 12 : index
    %c0_74 = arith.constant 0 : index
    %240 = vector.load %arg20[%c12, %c0_74] : memref<16x512xf32, #tpu.memory_space<vmem>>, vector<2x512xf32>
    %cst_75 = arith.constant dense<0.000000e+00> : vector<2x512xf32>
    %241 = tpu.matmul %239, %69, %cst_75 {dimension_numbers = #tpu.dot_dimension_numbers<[1], [0], [0], [1], [0, 0, 1, 1], [], []>} : vector<2x128xf32>, vector<128x512xf32>, vector<2x512xf32> -> vector<2x512xf32>
    %242 = arith.addf %240, %241 : vector<2x512xf32>
    %243 = vector.extract_strided_slice %242 {offsets = [0, 0], sizes = [2, 128], strides = [1, 1]} : vector<2x512xf32> to vector<2x128xf32>
    %244 = arith.negf %243 : vector<2x128xf32>
    %245 = math.exp %244 : vector<2x128xf32>
    %cst_76 = arith.constant 1.000000e+00 : f32
    %246 = vector.broadcast %cst_76 : f32 to vector<2x128xf32>
    %247 = arith.addf %246, %245 : vector<2x128xf32>
    %248 = arith.divf %246, %247 : vector<2x128xf32>
    %249 = vector.extract_strided_slice %242 {offsets = [0, 128], sizes = [2, 128], strides = [1, 1]} : vector<2x512xf32> to vector<2x128xf32>
    %250 = arith.negf %249 : vector<2x128xf32>
    %251 = math.exp %250 : vector<2x128xf32>
    %cst_77 = arith.constant 1.000000e+00 : f32
    %252 = vector.broadcast %cst_77 : f32 to vector<2x128xf32>
    %253 = arith.addf %252, %251 : vector<2x128xf32>
    %254 = arith.divf %252, %253 : vector<2x128xf32>
    %255 = vector.extract_strided_slice %242 {offsets = [0, 256], sizes = [2, 128], strides = [1, 1]} : vector<2x512xf32> to vector<2x128xf32>
    %256 = math.tanh %255 : vector<2x128xf32>
    %257 = vector.extract_strided_slice %242 {offsets = [0, 384], sizes = [2, 128], strides = [1, 1]} : vector<2x512xf32> to vector<2x128xf32>
    %258 = arith.negf %257 : vector<2x128xf32>
    %259 = math.exp %258 : vector<2x128xf32>
    %cst_78 = arith.constant 1.000000e+00 : f32
    %260 = vector.broadcast %cst_78 : f32 to vector<2x128xf32>
    %261 = arith.addf %260, %259 : vector<2x128xf32>
    %262 = arith.divf %260, %261 : vector<2x128xf32>
    %263 = arith.mulf %254, %237 : vector<2x128xf32>
    %264 = arith.mulf %248, %256 : vector<2x128xf32>
    %265 = arith.addf %263, %264 : vector<2x128xf32>
    %266 = math.tanh %265 : vector<2x128xf32>
    %267 = arith.mulf %262, %266 : vector<2x128xf32>
    %c14 = arith.constant 14 : index
    %c0_79 = arith.constant 0 : index
    %268 = vector.load %arg20[%c14, %c0_79] : memref<16x512xf32, #tpu.memory_space<vmem>>, vector<2x512xf32>
    %cst_80 = arith.constant dense<0.000000e+00> : vector<2x512xf32>
    %269 = tpu.matmul %267, %69, %cst_80 {dimension_numbers = #tpu.dot_dimension_numbers<[1], [0], [0], [1], [0, 0, 1, 1], [], []>} : vector<2x128xf32>, vector<128x512xf32>, vector<2x512xf32> -> vector<2x512xf32>
    %270 = arith.addf %268, %269 : vector<2x512xf32>
    %271 = vector.extract_strided_slice %270 {offsets = [0, 0], sizes = [2, 128], strides = [1, 1]} : vector<2x512xf32> to vector<2x128xf32>
    %272 = arith.negf %271 : vector<2x128xf32>
    %273 = math.exp %272 : vector<2x128xf32>
    %cst_81 = arith.constant 1.000000e+00 : f32
    %274 = vector.broadcast %cst_81 : f32 to vector<2x128xf32>
    %275 = arith.addf %274, %273 : vector<2x128xf32>
    %276 = arith.divf %274, %275 : vector<2x128xf32>
    %277 = vector.extract_strided_slice %270 {offsets = [0, 128], sizes = [2, 128], strides = [1, 1]} : vector<2x512xf32> to vector<2x128xf32>
    %278 = arith.negf %277 : vector<2x128xf32>
    %279 = math.exp %278 : vector<2x128xf32>
    %cst_82 = arith.constant 1.000000e+00 : f32
    %280 = vector.broadcast %cst_82 : f32 to vector<2x128xf32>
    %281 = arith.addf %280, %279 : vector<2x128xf32>
    %282 = arith.divf %280, %281 : vector<2x128xf32>
    %283 = vector.extract_strided_slice %270 {offsets = [0, 256], sizes = [2, 128], strides = [1, 1]} : vector<2x512xf32> to vector<2x128xf32>
    %284 = math.tanh %283 : vector<2x128xf32>
    %285 = vector.extract_strided_slice %270 {offsets = [0, 384], sizes = [2, 128], strides = [1, 1]} : vector<2x512xf32> to vector<2x128xf32>
    %286 = arith.negf %285 : vector<2x128xf32>
    %287 = math.exp %286 : vector<2x128xf32>
    %cst_83 = arith.constant 1.000000e+00 : f32
    %288 = vector.broadcast %cst_83 : f32 to vector<2x128xf32>
    %289 = arith.addf %288, %287 : vector<2x128xf32>
    %290 = arith.divf %288, %289 : vector<2x128xf32>
    %291 = arith.mulf %282, %265 : vector<2x128xf32>
    %292 = arith.mulf %276, %284 : vector<2x128xf32>
    %293 = arith.addf %291, %292 : vector<2x128xf32>
    %294 = math.tanh %293 : vector<2x128xf32>
    %295 = arith.mulf %290, %294 : vector<2x128xf32>
    %c0_84 = arith.constant 0 : index
    %c0_85 = arith.constant 0 : index
    %296 = vector.load %arg18[%c0_84, %c0_85] : memref<2x128xf32, #tpu.memory_space<vmem>>, vector<2x128xf32>
    tpu.vector_store %arg18[%c0_84, %c0_85], %295 {strides = array<i32>} : memref<2x128xf32, #tpu.memory_space<vmem>>, vector<2x128xf32>,
    %c0_86 = arith.constant 0 : index
    %c0_87 = arith.constant 0 : index
    %297 = vector.load %arg19[%c0_86, %c0_87] : memref<2x128xf32, #tpu.memory_space<vmem>>, vector<2x128xf32>
    tpu.vector_store %arg19[%c0_86, %c0_87], %293 {strides = array<i32>} : memref<2x128xf32, #tpu.memory_space<vmem>>, vector<2x128xf32>,
    %c0_88 = arith.constant 0 : index
    %c0_89 = arith.constant 0 : index
    %298 = vector.load %arg13[%c0_88, %c0_89] : memref<128x128xf32, #tpu.memory_space<vmem>>, vector<128x128xf32>
    %cst_90 = arith.constant dense<0.000000e+00> : vector<2x128xf32>
    %299 = tpu.matmul %295, %298, %cst_90 {dimension_numbers = #tpu.dot_dimension_numbers<[1], [0], [0], [1], [0, 0, 1, 1], [], []>} : vector<2x128xf32>, vector<128x128xf32>, vector<2x128xf32> -> vector<2x128xf32>
    %c0_91 = arith.constant 0 : index
    %c0_92 = arith.constant 0 : index
    %300 = vector.load %arg14[%c0_91, %c0_92] : memref<1x128xf32, #tpu.memory_space<vmem>>, vector<1x128xf32>
    %301 = vector.broadcast %300 : vector<1x128xf32> to vector<2x128xf32>
    %302 = arith.addf %299, %301 : vector<2x128xf32>
    %303 = tpu.iota {dimensions = array<i32: 1>} : vector<2x128xi32>
    %c10_i32 = arith.constant 10 : i32
    %304 = vector.broadcast %c10_i32 : i32 to vector<2x128xi32>
    %305 = arith.cmpi slt, %303, %304 : vector<2x128xi32>
    %cst_93 = arith.constant -3.40282347E+38 : f32
    %306 = vector.broadcast %cst_93 : f32 to vector<2x128xf32>
    %307 = arith.select %305, %302, %306 : vector<2x128xi1>, vector<2x128xf32>
    %cst_94 = arith.constant dense<0xFF800000> : vector<2xf32>
    %308 = vector.multi_reduction <maximumf>, %307, %cst_94 [1] : vector<2x128xf32> to vector<2xf32>
    %309 = vector.shape_cast %308 : vector<2xf32> to vector<2x1xf32>
    %310 = vector.broadcast %309 : vector<2x1xf32> to vector<2x128xf32>
    %311 = arith.subf %307, %310 : vector<2x128xf32>
    %312 = math.exp %311 : vector<2x128xf32>
    %cst_95 = arith.constant dense<0.000000e+00> : vector<2xf32>
    %313 = vector.multi_reduction <add>, %312, %cst_95 [1] : vector<2x128xf32> to vector<2xf32>
    %314 = vector.shape_cast %313 : vector<2xf32> to vector<2x1xf32>
    %315 = vector.broadcast %314 : vector<2x1xf32> to vector<2x128xf32>
    %316 = arith.divf %312, %315 : vector<2x128xf32>
    %c0_96 = arith.constant 0 : index
    %c0_97 = arith.constant 0 : index
    %317 = vector.load %arg17[%c0_96, %c0_97] : memref<2x128xf32, #tpu.memory_space<vmem>>, vector<2x128xf32>
    tpu.vector_store %arg17[%c0_96, %c0_97], %316 {strides = array<i32>} : memref<2x128xf32, #tpu.memory_space<vmem>>, vector<2x128xf32>,
    return
  }
  func.func @transform_0(%arg0: i32) -> (i32, i32) {
    %c0_i32 = arith.constant 0 : i32
    %c0_i32_0 = arith.constant 0 : i32
    %c0_i32_1 = arith.constant 0 : i32
    return %c0_i32, %c0_i32_0 : i32, i32
  }
  func.func @transform_1(%arg0: i32) -> (i32, i32) {
    %c0_i32 = arith.constant 0 : i32
    %c0_i32_0 = arith.constant 0 : i32
    %c0_i32_1 = arith.constant 0 : i32
    return %c0_i32, %c0_i32_0 : i32, i32
  }
  func.func @transform_2(%arg0: i32) -> (i32, i32) {
    %c0_i32 = arith.constant 0 : i32
    %c0_i32_0 = arith.constant 0 : i32
    %c0_i32_1 = arith.constant 0 : i32
    return %c0_i32, %c0_i32_0 : i32, i32
  }
  func.func @transform_3(%arg0: i32) -> (i32, i32) {
    %c0_i32 = arith.constant 0 : i32
    %c0_i32_0 = arith.constant 0 : i32
    %c0_i32_1 = arith.constant 0 : i32
    return %c0_i32, %c0_i32_0 : i32, i32
  }
  func.func @transform_4(%arg0: i32) -> (i32, i32) {
    %c0_i32 = arith.constant 0 : i32
    %c0_i32_0 = arith.constant 0 : i32
    %c0_i32_1 = arith.constant 0 : i32
    return %c0_i32, %c0_i32_0 : i32, i32
  }
  func.func @transform_5(%arg0: i32) -> (i32, i32) {
    %c0_i32 = arith.constant 0 : i32
    %c0_i32_0 = arith.constant 0 : i32
    %c0_i32_1 = arith.constant 0 : i32
    return %c0_i32, %c0_i32_0 : i32, i32
  }
  func.func @transform_6(%arg0: i32) -> (i32, i32) {
    %c0_i32 = arith.constant 0 : i32
    %c0_i32_0 = arith.constant 0 : i32
    %c0_i32_1 = arith.constant 0 : i32
    return %c0_i32, %c0_i32_0 : i32, i32
  }
  func.func @transform_7(%arg0: i32) -> (i32, i32) {
    %c0_i32 = arith.constant 0 : i32
    %c0_i32_0 = arith.constant 0 : i32
    %c0_i32_1 = arith.constant 0 : i32
    return %c0_i32, %c0_i32_0 : i32, i32
  }
  func.func @transform_8(%arg0: i32) -> (i32, i32) {
    %c0_i32 = arith.constant 0 : i32
    %c0_i32_0 = arith.constant 0 : i32
    %c0_i32_1 = arith.constant 0 : i32
    return %c0_i32, %c0_i32_0 : i32, i32
  }
  func.func @transform_9(%arg0: i32) -> (i32, i32) {
    %c0_i32 = arith.constant 0 : i32
    %c0_i32_0 = arith.constant 0 : i32
    %c0_i32_1 = arith.constant 0 : i32
    return %c0_i32, %c0_i32_0 : i32, i32
  }
  func.func @transform_10(%arg0: i32) -> (i32, i32) {
    %c0_i32 = arith.constant 0 : i32
    %c0_i32_0 = arith.constant 0 : i32
    %c0_i32_1 = arith.constant 0 : i32
    return %c0_i32, %c0_i32_0 : i32, i32
  }
  func.func @transform_11(%arg0: i32) -> (i32, i32) {
    %c0_i32 = arith.constant 0 : i32
    %c0_i32_0 = arith.constant 0 : i32
    %c0_i32_1 = arith.constant 0 : i32
    return %c0_i32, %c0_i32_0 : i32, i32
  }
  func.func @transform_12(%arg0: i32) -> (i32, i32) {
    %c0_i32 = arith.constant 0 : i32
    %c0_i32_0 = arith.constant 0 : i32
    %c0_i32_1 = arith.constant 0 : i32
    return %c0_i32, %c0_i32_0 : i32, i32
  }
  func.func @transform_13(%arg0: i32) -> (i32, i32) {
    %c0_i32 = arith.constant 0 : i32
    %c0_i32_0 = arith.constant 0 : i32
    %c0_i32_1 = arith.constant 0 : i32
    return %c0_i32, %c0_i32_0 : i32, i32
  }
  func.func @transform_14(%arg0: i32) -> (i32, i32) {
    %c0_i32 = arith.constant 0 : i32
    %c0_i32_0 = arith.constant 0 : i32
    %c0_i32_1 = arith.constant 0 : i32
    return %c0_i32, %c0_i32_0 : i32, i32
  }
  func.func @transform_15(%arg0: i32) -> (i32, i32) {
    %c0_i32 = arith.constant 0 : i32
    %c0_i32_0 = arith.constant 0 : i32
    %c0_i32_1 = arith.constant 0 : i32
    return %c0_i32, %c0_i32_0 : i32, i32
  }
  func.func @transform_16(%arg0: i32) -> (i32, i32) {
    %c0_i32 = arith.constant 0 : i32
    %c0_i32_0 = arith.constant 0 : i32
    %c0_i32_1 = arith.constant 0 : i32
    return %c0_i32, %c0_i32_0 : i32, i32
  }
  func.func @transform_17(%arg0: i32) -> (i32, i32) {
    %c0_i32 = arith.constant 0 : i32
    %c0_i32_0 = arith.constant 0 : i32
    %c0_i32_1 = arith.constant 0 : i32
    return %c0_i32, %c0_i32_0 : i32, i32
  }
  func.func @transform_18(%arg0: i32) -> (i32, i32) {
    %c0_i32 = arith.constant 0 : i32
    %c0_i32_0 = arith.constant 0 : i32
    %c0_i32_1 = arith.constant 0 : i32
    return %c0_i32, %c0_i32_0 : i32, i32
  }
}

</mosaic_0001>

<bundles_post_ra>
// kernel: tpu_custom_call.1
= control target key start
LH: loop header
LB: loop body
LE: loop exit
PB: predicated region body
PF: predicated region fallthrough
CT: control target
= control target key end

     0   :  { %s4663_s0 = inlined_call_operand.hbm [shape: f32[16,32], index: 0, kind: input, shape index: {}]   ;;  %s4664_s1 = inlined_call_operand.hbm [shape: f32[32,512], index: 1, kind: input, shape index: {}]   ;;  %s4665_s2 = inlined_call_operand.vmem [shape: f32[1,512], index: 2, kind: input, shape index: {}]   ;;  %s4666_s3 = inlined_call_operand.vmem [shape: f32[1,512], index: 3, kind: input, shape index: {}]   ;;  %s4667_s4 = inlined_call_operand.vmem [shape: f32[1,512], index: 4, kind: input, shape index: {}]   ;;  %s4668_s5 = inlined_call_operand.hbm [shape: f32[512,128], index: 5, kind: input, shape index: {}]   ;;  %s4669_s6 = inlined_call_operand.vmem [shape: f32[1,128], index: 6, kind: input, shape index: {}]   ;;  %s4670_s7 = inlined_call_operand.vmem [shape: f32[1,128], index: 7, kind: input, shape index: {}]   ;;  %s4671_s8 = inlined_call_operand.vmem [shape: f32[1,128], index: 8, kind: input, shape index: {}]   ;;  %s4672_s9 = inlined_call_operand.hbm [shape: f32[128,512], index: 9, kind: input, shape index: {}]   ;;  %s4673_s10 = inlined_call_operand.hbm [shape: f32[128,512], index: 10, kind: input, shape index: {}]   ;;  %s4674_s11 = inlined_call_operand.vmem [shape: f32[1,512], index: 11, kind: input, shape index: {}]   ;;  %s4675_s12 = inlined_call_operand.hbm [shape: f32[128,128], index: 12, kind: input, shape index: {}]   ;;  %s4676_s13 = inlined_call_operand.vmem [shape: f32[1,128], index: 13, kind: input, shape index: {}]   ;;  %s4677_s14 = inlined_call_operand.vmem [shape: f32[2,128], index: 14, kind: input, shape index: {}]   ;;  %s4678_s15 = inlined_call_operand.vmem [shape: f32[2,128], index: 15, kind: input, shape index: {}]   ;;  %s4679_s16 = inlined_call_operand.hbm [shape: f32[2,128], index: 16, kind: output, shape index: {0}]   ;;  %s4680_s17 = inlined_call_operand.hbm [shape: f32[2,128], index: 17, kind: output, shape index: {1}]   ;;  %s4681_s18 = inlined_call_operand.hbm [shape: f32[2,128], index: 18, kind: output, shape index: {2}]  }
   0x1   :  { %4687 = sst [smem:[#allocation24_spill]] %s4663_s0 }
   0x2   :  { %4688 = sst [smem:[#allocation25_spill]] %s4664_s1 }
   0x3   :  { %4689 = sst [smem:[#allocation26_spill]] %s4665_s2 }
   0x4   :  { %4690 = sst [smem:[#allocation27_spill]] %s4679_s16 }
   0x5   :  { %4691 = sst [smem:[#allocation28_spill]] %s4681_s18 }
   0x6   :  { %24 = vsyncpa [#allocation4], 0 }
   0x7   :  { %25 = vsyncpa [#allocation7], 0 }
   0x8   :  { %26 = vsyncpa [#allocation10], 0 }
   0x9   :  { %27 = vsyncpa [#allocation13], 0 }
   0xa   :  { %28 = vsyncpa [#allocation5], 0 }
   0xb   :  { %29 = vsyncpa [#allocation16], 0  ;;  %s3953_s27 = smov [#allocation6]   ;;  %s4692_s0 = sld [smem:[#allocation25_spill]] }
   0xc   :  { %s47_s28 = sshll.u32 %s3953_s27, 4  ;;  %s48_s28 = int_to_ptr.vmem [resolvable:$true] %s47_s28 }
  0x11   :  { %s3743_s19 = scalar_lea.hbm %s4692_s0, 2048 }
  0x12   :  { %p3744_p0 = scmp.ne.s32.totalorder %s4692_s0, %s3743_s19  ;;  %p3747_p1 = scmp.lt.u32.totalorder %s3743_s19, %s4692_s0 }
  0x14   :  { %p3749_p2 = pnand %p3747_p1, %p3744_p0 }
  0x16   :  { %3752 = shalt.err (!%p3749_p2)
}
  0x17   :  { %s3753_s2 = scalar_lea.vmem %s48_s28, 2048  ;;  %p3758_p4 = scmp.lt.s32.totalorder %s48_s28, %s48_s28 }
  0x18   :  { %p3754_p3 = scmp.ne.s32.totalorder %s48_s28, %s3753_s2  ;;  %p3759_p5 = scmp.lt.s32.totalorder %s3753_s2, %s3753_s2 }
  0x1a   :  { %p3760_p6 = por %p3759_p5, %p3758_p4 }
  0x1c   :  { %p3761_p7 = pnand %p3760_p6, %p3754_p3 }
  0x1e   :  { %3764 = shalt.err (!%p3761_p7)
}
  0x1f   :  { %s4686_s23 = smov 512   ;;  %s3955_s24 = smov 32  }
  0x20   :  { %53 = dma.hbm_to_vmem [thread:$0]  %s4692_s0, 2048, %s48_s28, [#allocation7], %s4686_s23, %s4686_s23, %s3955_s24  }
  0x21   :  { %s3956_s27 = smov [#allocation9]   ;;  %s3957_s30 = smov [#allocation3]  }
  0x22   :  { %s83_s29 = sshll.u32 %s3956_s27, 4  ;;  %s35_s19 = sshll.u32 %s3957_s30, 4  ;;  %s84_s29 = int_to_ptr.vmem [resolvable:$true] %s83_s29  ;;  %s36_s19 = int_to_ptr.vmem [resolvable:$true] %s35_s19 }
  0x23   :  { %s3765_s21 = scalar_lea.hbm %s4672_s9, 8192 }
  0x24   :  { %p3766_p8 = scmp.ne.s32.totalorder %s4672_s9, %s3765_s21  ;;  %p3769_p9 = scmp.lt.u32.totalorder %s3765_s21, %s4672_s9 }
  0x26   :  { %p3771_p10 = pnand %p3769_p9, %p3766_p8 }
  0x28   :  { %3774 = shalt.err (!%p3771_p10)
}
  0x29   :  { %s3775_s28 = scalar_lea.vmem %s84_s29, 8192  ;;  %p3780_p12 = scmp.lt.s32.totalorder %s84_s29, %s84_s29 }
  0x2a   :  { %p3776_p11 = scmp.ne.s32.totalorder %s84_s29, %s3775_s28  ;;  %p3781_p13 = scmp.lt.s32.totalorder %s3775_s28, %s3775_s28 }
  0x2c   :  { %p3782_p0 = por %p3781_p13, %p3780_p12 }
  0x2e   :  { %p3783_p1 = pnand %p3782_p0, %p3776_p11 }
  0x30   :  { %3786 = shalt.err (!%p3783_p1)
}
  0x31   :  { %89 = dma.hbm_to_vmem [thread:$0]  %s4672_s9, 8192, %s84_s29, [#allocation10], %s4686_s23, %s4686_s23, %s3955_s24  }
  0x32   :  { %s4693_s18 = sld [smem:[#allocation24_spill]] }
  0x38   :  { %s3787_s27 = scalar_lea.hbm %s4693_s18, 256 }
  0x39   :  { %p3788_p2 = scmp.ne.s32.totalorder %s4693_s18, %s3787_s27  ;;  %p3791_p3 = scmp.lt.u32.totalorder %s3787_s27, %s4693_s18 }
  0x3b   :  { %p3793_p4 = pnand %p3791_p3, %p3788_p2 }
  0x3d   :  { %3796 = shalt.err (!%p3793_p4)
}
  0x3e   :  { %s3797_s22 = scalar_lea.vmem %s36_s19, 256  ;;  %p3802_p6 = scmp.lt.s32.totalorder %s36_s19, %s36_s19 }
  0x3f   :  { %p3798_p5 = scmp.ne.s32.totalorder %s36_s19, %s3797_s22  ;;  %p3803_p7 = scmp.lt.s32.totalorder %s3797_s22, %s3797_s22 }
  0x41   :  { %p3804_p8 = por %p3803_p7, %p3802_p6 }
  0x43   :  { %p3805_p9 = pnand %p3804_p8, %p3798_p5 }
  0x45   :  { %3808 = shalt.err (!%p3805_p9)
}
  0x46   :  { %s3958_s9 = smov 128   ;;  %s3959_s29 = smov 8  }
  0x47   :  { %41 = dma.hbm_to_vmem [thread:$0]  %s4693_s18, 256, %s36_s19, [#allocation4], %s3958_s9, %s3958_s9, %s3959_s29  }
  0x48   :  { %s3960_s0 = smov [#allocation8]   ;;  %s3961_s26 = smov [#allocation11]  }
  0x49   :  { %s65_s25 = sshll.u32 %s3960_s0, 4  ;;  %s95_s16 = sshll.u32 %s3961_s26, 4  ;;  %s66_s25 = int_to_ptr.vmem [resolvable:$true] %s65_s25  ;;  %s96_s16 = int_to_ptr.vmem [resolvable:$true] %s95_s16 }
  0x4a   :  { %s3809_s1 = scalar_lea.hbm %s4668_s5, 8192 }
  0x4b   :  { %p3810_p10 = scmp.ne.s32.totalorder %s4668_s5, %s3809_s1  ;;  %p3813_p11 = scmp.lt.u32.totalorder %s3809_s1, %s4668_s5 }
  0x4d   :  { %p3815_p12 = pnand %p3813_p11, %p3810_p10 }
  0x4f   :  { %3818 = shalt.err (!%p3815_p12)
}
  0x50   :  { %s3819_s19 = scalar_lea.vmem %s66_s25, 8192  ;;  %p3824_p0 = scmp.lt.s32.totalorder %s66_s25, %s66_s25 }
  0x51   :  { %p3820_p13 = scmp.ne.s32.totalorder %s66_s25, %s3819_s19  ;;  %p3825_p1 = scmp.lt.s32.totalorder %s3819_s19, %s3819_s19 }
  0x53   :  { %p3826_p2 = por %p3825_p1, %p3824_p0 }
  0x55   :  { %p3827_p3 = pnand %p3826_p2, %p3820_p13 }
  0x57   :  { %3830 = shalt.err (!%p3827_p3)
}
  0x58   :  { %71 = dma.hbm_to_vmem [thread:$0]  %s4668_s5, 8192, %s66_s25, [#allocation7], %s3958_s9, %s3958_s9, %s3959_s29  }
  0x59   :  { %s3831_s0 = scalar_lea.hbm %s4673_s10, 8192 }
  0x5a   :  { %p3832_p4 = scmp.ne.s32.totalorder %s4673_s10, %s3831_s0  ;;  %p3835_p5 = scmp.lt.u32.totalorder %s3831_s0, %s4673_s10 }
  0x5c   :  { %p3837_p6 = pnand %p3835_p5, %p3832_p4 }
  0x5e   :  { %3840 = shalt.err (!%p3837_p6)
}
  0x5f   :  { %s3841_s20 = scalar_lea.vmem %s96_s16, 8192  ;;  %p3846_p8 = scmp.lt.s32.totalorder %s96_s16, %s96_s16 }
  0x60   :  { %p3842_p7 = scmp.ne.s32.totalorder %s96_s16, %s3841_s20  ;;  %p3847_p9 = scmp.lt.s32.totalorder %s3841_s20, %s3841_s20 }
  0x62   :  { %p3848_p10 = por %p3847_p9, %p3846_p8 }
  0x64   :  { %p3849_p11 = pnand %p3848_p10, %p3842_p7 }
  0x66   :  { %3852 = shalt.err (!%p3849_p11)
}
  0x67   :  { %s4694_s5 = smov 512   ;;  %s3962_s22 = smov [#allocation12]  }
  0x68   :  { %101 = dma.hbm_to_vmem [thread:$0]  %s4673_s10, 8192, %s96_s16, [#allocation10], %s4694_s5, %s4694_s5, %s3955_s24  }
  0x69   :  { %s109_s19 = sshll.u32 %s3962_s22, 4  ;;  %s3853_s28 = scalar_lea.hbm %s4675_s12, 2048  ;;  %s110_s19 = int_to_ptr.vmem [resolvable:$true] %s109_s19 }
  0x6a   :  { %p3854_p12 = scmp.ne.s32.totalorder %s4675_s12, %s3853_s28  ;;  %p3857_p13 = scmp.lt.u32.totalorder %s3853_s28, %s4675_s12 }
  0x6c   :  { %p3859_p0 = pnand %p3857_p13, %p3854_p12 }
  0x6e   :  { %3862 = shalt.err (!%p3859_p0)
}
  0x6f   :  { %s3863_s30 = scalar_lea.vmem %s110_s19, 2048  ;;  %p3868_p2 = scmp.lt.s32.totalorder %s110_s19, %s110_s19 }
  0x70   :  { %p3864_p1 = scmp.ne.s32.totalorder %s110_s19, %s3863_s30  ;;  %p3869_p3 = scmp.lt.s32.totalorder %s3863_s30, %s3863_s30 }
  0x72   :  { %p3870_p4 = por %p3869_p3, %p3868_p2 }
  0x74   :  { %p3871_p5 = pnand %p3870_p4, %p3864_p1 }
  0x76   :  { %3874 = shalt.err (!%p3871_p5)
}
  0x77   :  { %115 = dma.hbm_to_vmem [thread:$0]  %s4675_s12, 2048, %s110_s19, [#allocation13], %s3958_s9, %s3958_s9, %s3959_s29  }
  0x78   :  { %3941 = dma.done.wait [#allocation4], 256  }
  0x79   :  { %3942 = vsyncadd [#allocation4], 4294967040 }
  0x7a   :  { %3943 = dma.done.wait [#allocation7], 10240  }
  0x7b   :  { %3944 = vsyncadd [#allocation7], 4294957056 }
  0x7c   :  { %3945 = dma.done.wait [#allocation10], 16384  }
  0x7d   :  { %3946 = vsyncadd [#allocation10], 4294950912 }
  0x7e   :  { %3947 = dma.done.wait [#allocation13], 2048  }
  0x7f   :  { %3948 = vsyncadd [#allocation13], 4294965248  ;;  %v3963_v0 = vmov 0.0   ;;  %v143_v1 = vld [vmem:[#allocation6 + $0x8] sm:$0xff]  ;;  %v142_v3 = vld [vmem:[#allocation6] sm:$0xff]  ;;  %vm180_vm0 = vcmask 261120  }
  0x80   :  { %251 = vmatprep.mubr.f32.mxu1 %v3963_v0  ;;  %v147_v2 = vld [vmem:[#allocation6 + $0x28] sm:$0xff]  ;;  %v146_v5 = vld [vmem:[#allocation6 + $0x20] sm:$0xff]  ;;  %v145_v12 = vld [vmem:[#allocation6 + $0x18] sm:$0xff]  ;;  %s4695_s29 = sld [smem:[#allocation26_spill]]  ;;  %vm3965_vm1 = vmmov 0   ;;  %vm2687_vm3 = vcmask 1041408  }
  0x81   :  { %v2905_v4 = vpack.c.bf16 %v147_v2, %v143_v1  ;;  %v151_v6 = vld [vmem:[#allocation6 + $0x48] sm:$0xff]  ;;  %v2907_v8 = vpack.c.bf16 %v146_v5, %v142_v3  ;;  %v150_v10 = vld [vmem:[#allocation6 + $0x40] sm:$0xff]  ;;  %v149_v13 = vld [vmem:[#allocation6 + $0x38] sm:$0xff]  ;;  %s3966_s28 = smov [#allocation15]  }
  0x82   :  { %v155_v7 = vld [vmem:[#allocation6 + $0x68] sm:$0xff]  ;;  %v154_v11 = vld [vmem:[#allocation6 + $0x60] sm:$0xff]  ;;  %v2913_v15 = vpack.c.bf16 %v149_v13, %v145_v12  ;;  %v144_v16 = vld [vmem:[#allocation6 + $0x10] sm:$0xff]  ;;  %s2716_s23 = sshll.u32 %s3966_s28, 4  ;;  %s2717_s23 = int_to_ptr.vmem [resolvable:$true] %s2716_s23 }
  0x83   :  { %v2909_v9 = vpack.c.bf16 %v155_v7, %v151_v6  ;;  %2906 = vmatprep.subr.bf16.mxu1 %v2905_v4  ;;  %v2911_v14 = vpack.c.bf16 %v154_v11, %v150_v10  ;;  %v148_v17 = vld [vmem:[#allocation6 + $0x30] sm:$0xff]  ;;  %v153_v18 = vld [vmem:[#allocation6 + $0x58] sm:$0xff]  ;;  %v522_v27 = vld [vmem:[#allocation8 + $0x80] sm:$0xff]  ;;  %s3875_s0 = scalar_lea.vmem %s2717_s23, 32  ;;  %p3880_p7 = scmp.lt.s32.totalorder %s2717_s23, %s2717_s23 }
  0x84   :  { %2908 = vmatpush1.bf16.msra.mxu1 %v2907_v8  ;;  %v157_v19 = vld [vmem:[#allocation6 + $0x78] sm:$0xff]  ;;  %v140_v20 = vld [vmem:[#allocation3] sm:$0xff]  ;;  %v2915_v21 = vpack.c.bf16 %v148_v17, %v144_v16  ;;  %v523_v28 = vld [vmem:[#allocation8 + $0x88] sm:$0xff]  ;;  %p3876_p6 = scmp.ne.s32.totalorder %s2717_s23, %s3875_s0  ;;  %p3881_p8 = scmp.lt.s32.totalorder %s3875_s0, %s3875_s0 }
  0x85   :  { %2910 = vmatprep.subr.bf16.mxu1 %v2909_v9  ;;  %v2917_v22 = vpack.c.bf16 %v157_v19, %v153_v18  ;;  %v152_v23 = vld [vmem:[#allocation6 + $0x50] sm:$0xff]  ;;  %v141_v25 = vld [vmem:[#allocation3 + $0x8] sm:$0xff]  ;;  %v2921_v29 = vpack.c.bf16 %v523_v28, %v522_v27  ;;  %v506_v30 = vld [vmem:[#allocation8] sm:$0xff] }
  0x86   :  { %v156_v24 = vld [vmem:[#allocation6 + $0x70] sm:$0xff]  ;;  %v507_v31 = vld [vmem:[#allocation8 + $0x8] sm:$0xff]  ;;  %v525_v34 = vld [vmem:[#allocation8 + $0x98] sm:$0xff]  ;;  %p3882_p9 = por %p3881_p8, %p3880_p7 }
  0x87   :  { %v2919_v26 = vpack.c.bf16 %v156_v24, %v152_v23  ;;  %v2923_v32 = vpack.c.bf16 %v507_v31, %v506_v30  ;;  %2922 = vmatprep.subr.bf16.mxu0 %v2921_v29  ;;  %v524_v33 = vld [vmem:[#allocation8 + $0x90] sm:$0xff]  ;;  %v509_v37 = vld [vmem:[#allocation8 + $0x18] sm:$0xff]  ;;  %v526_v39 = vld [vmem:[#allocation8 + $0xa0] sm:$0xff] }
  0x88   :  { %2912 = vmatpush1.bf16.msra.mxu1 %v2911_v14  ;;  %v2925_v35 = vpack.c.bf16 %v525_v34, %v524_v33  ;;  %v508_v36 = vld [vmem:[#allocation8 + $0x10] sm:$0xff]  ;;  %v527_v40 = vld [vmem:[#allocation8 + $0xa8] sm:$0xff]  ;;  %v554_v41 = vld [vmem:[#allocation8 + $0x180] sm:$0xff]  ;;  %p3883_p10 = pnand %p3882_p9, %p3876_p6 }
  0x89   :  { %2914 = vmatprep.subr.bf16.mxu1 %v2913_v15  ;;  %2924 = vmatpush3.bf16.msra.mxu0 %v2923_v32  ;;  %v2927_v38 = vpack.c.bf16 %v509_v37, %v508_v36  ;;  %v2929_v42 = vpack.c.bf16 %v527_v40, %v526_v39  ;;  %v555_v43 = vld [vmem:[#allocation8 + $0x188] sm:$0xff]  ;;  %v510_v44 = vld [vmem:[#allocation8 + $0x20] sm:$0xff]  ;;  %v528_v51 = vld [vmem:[#allocation8 + $0xb0] sm:$0xff] }
  0x8a   :  { %2926 = vmatprep.subr.bf16.mxu0 %v2925_v35  ;;  %v511_v45 = vld [vmem:[#allocation8 + $0x28] sm:$0xff]  ;;  %v2953_v46 = vpack.c.bf16 %v555_v43, %v554_v41  ;;  %v538_v48 = vld [vmem:[#allocation8 + $0x100] sm:$0xff]  ;;  %v529_v52 = vld [vmem:[#allocation8 + $0xb8] sm:$0xff] }
  0x8b   :  { %2745 = vmatmul.mubr.msk.f32.vlgmr.msra.gmra.mrb[0].mxu1 %vm180_vm0, %v140_v20  ;;  %v2931_v47 = vpack.c.bf16 %v511_v45, %v510_v44  ;;  %v539_v49 = vld [vmem:[#allocation8 + $0x108] sm:$0xff]  ;;  %v556_v53 = vld [vmem:[#allocation8 + $0x190] sm:$0xff]  ;;  %v2933_v54 = vpack.c.bf16 %v529_v52, %v528_v51  ;;  %v557_v55 = vld [vmem:[#allocation8 + $0x198] sm:$0xff] }
  0x8c   :  { %2916 = vmatpush1.bf16.msra.mxu1 %v2915_v21  ;;  %257 = vmatprep.mubr.f32.mxu1 %v3963_v0  ;;  %v2955_v50 = vpack.c.bf16 %v539_v49, %v538_v48  ;;  %v512_v56 = vld [vmem:[#allocation8 + $0x30] sm:$0xff]  ;;  %v513_v57 = vld [vmem:[#allocation8 + $0x38] sm:$0xff]  ;;  %v2957_v58 = vpack.c.bf16 %v557_v55, %v556_v53  ;;  %v530_v63 = vld [vmem:[#allocation8 + $0xc0] sm:$0xff] }
  0x8d   :  { %2918 = vmatprep.subr.bf16.mxu1 %v2917_v22  ;;  %2928 = vmatpush3.bf16.msra.mxu0 %v2927_v38  ;;  %v2935_v59 = vpack.c.bf16 %v513_v57, %v512_v56  ;;  %v540_v60 = vld [vmem:[#allocation8 + $0x110] sm:$0xff]  ;;  %v541_v61 = vld [vmem:[#allocation8 + $0x118] sm:$0xff]  ;;  %v531_v1 = vld [vmem:[#allocation8 + $0xc8] sm:$0xff] }
  0x8e   :  { %2930 = vmatprep.subr.bf16.mxu0 %v2929_v42  ;;  %v2959_v62 = vpack.c.bf16 %v541_v61, %v540_v60  ;;  %v558_v2 = vld [vmem:[#allocation8 + $0x1a0] sm:$0xff]  ;;  %v2937_v3 = vpack.c.bf16 %v531_v1, %v530_v63  ;;  %v559_v4 = vld [vmem:[#allocation8 + $0x1a8] sm:$0xff]  ;;  %v532_v12 = vld [vmem:[#allocation8 + $0xd0] sm:$0xff]  ;;  %v160_v60 = vlaneseq }
  0x8f   :  { %2746 = vmatmul.mubr.msk.f32.gmra.mrb[2].mxu1 %vm180_vm0, %v141_v25  ;;  %v514_v5 = vld [vmem:[#allocation8 + $0x40] sm:$0xff]  ;;  %v515_v6 = vld [vmem:[#allocation8 + $0x48] sm:$0xff]  ;;  %v2961_v7 = vpack.c.bf16 %v559_v4, %v558_v2  ;;  %v533_v13 = vld [vmem:[#allocation8 + $0xd8] sm:$0xff] }
  0x90   :  { %2920 = vmatpush1.bf16.msra.mxu1 %v2919_v26  ;;  %328 = vmatprep.mubr.f32.mxu1 %v3963_v0  ;;  %v2939_v8 = vpack.c.bf16 %v515_v6, %v514_v5  ;;  %v542_v9 = vld [vmem:[#allocation8 + $0x120] sm:$0xff]  ;;  %v543_v10 = vld [vmem:[#allocation8 + $0x128] sm:$0xff]  ;;  %v560_v14 = vld [vmem:[#allocation8 + $0x1b0] sm:$0xff]  ;;  %v2941_v15 = vpack.c.bf16 %v533_v13, %v532_v12  ;;  %v161_v61 = vshrl.u32 %v160_v60, 7 }
  0x91   :  { %2954 = vmatprep.subr.bf16.mxu1 %v2953_v46  ;;  %2932 = vmatpush3.bf16.msra.mxu0 %v2931_v47  ;;  %v2963_v11 = vpack.c.bf16 %v543_v10, %v542_v9  ;;  %v561_v16 = vld [vmem:[#allocation8 + $0x1b8] sm:$0xff]  ;;  %v516_v17 = vld [vmem:[#allocation8 + $0x50] sm:$0xff]  ;;  %v534_v24 = vld [vmem:[#allocation8 + $0xe0] sm:$0xff] }
  0x92   :  { %2934 = vmatprep.subr.bf16.mxu0 %v2933_v54  ;;  %v517_v18 = vld [vmem:[#allocation8 + $0x58] sm:$0xff]  ;;  %v2965_v19 = vpack.c.bf16 %v561_v16, %v560_v14  ;;  %v544_v21 = vld [vmem:[#allocation8 + $0x130] sm:$0xff]  ;;  %v562_v26 = vld [vmem:[#allocation8 + $0x1c0] sm:$0xff]  ;;  %v4168_v1 = vsub.s32 1, %v161_v61  ;;  %v4174_v10 = vsub.s32 3, %v161_v61 }
  0x93   :  { %2747 = vmatmul.mubr.msk.f32.vlgmr.msra.gmra.mrb[4].mxu1 %vm180_vm0, %v140_v20  ;;  %v2943_v20 = vpack.c.bf16 %v517_v18, %v516_v17  ;;  %v545_v22 = vld [vmem:[#allocation8 + $0x138] sm:$0xff]  ;;  %v563_v28 = vld [vmem:[#allocation8 + $0x1c8] sm:$0xff]  ;;  %v518_v29 = vld [vmem:[#allocation8 + $0x60] sm:$0xff] }
  0x94   :  { %334 = vmatprep.mubr.f32.mxu1 %v3963_v0  ;;  %2956 = vmatpush3.bf16.msra.mxu1 %v2955_v50  ;;  %v2967_v23 = vpack.c.bf16 %v545_v22, %v544_v21  ;;  %v519_v30 = vld [vmem:[#allocation8 + $0x68] sm:$0xff]  ;;  %v2969_v31 = vpack.c.bf16 %v563_v28, %v562_v26  ;;  %v546_v33 = vld [vmem:[#allocation8 + $0x140] sm:$0xff]  ;;  %v536_v36 = vld [vmem:[#allocation8 + $0xf0] sm:$0xff] }
  0x95   :  { %2958 = vmatprep.subr.bf16.mxu1 %v2957_v58  ;;  %2936 = vmatpush3.bf16.msra.mxu0 %v2935_v59  ;;  %v2947_v32 = vpack.c.bf16 %v519_v30, %v518_v29  ;;  %v547_v34 = vld [vmem:[#allocation8 + $0x148] sm:$0xff]  ;;  %v537_v37 = vld [vmem:[#allocation8 + $0xf8] sm:$0xff]  ;;  %v564_v38 = vld [vmem:[#allocation8 + $0x1d0] sm:$0xff] }
  0x96   :  { %2938 = vmatprep.subr.bf16.mxu0 %v2937_v3  ;;  %v2971_v35 = vpack.c.bf16 %v547_v34, %v546_v33  ;;  %v2949_v39 = vpack.c.bf16 %v537_v37, %v536_v36  ;;  %v565_v40 = vld [vmem:[#allocation8 + $0x1d8] sm:$0xff]  ;;  %v520_v41 = vld [vmem:[#allocation8 + $0x70] sm:$0xff]  ;;  %v566_v48 = vld [vmem:[#allocation8 + $0x1e0] sm:$0xff] }
  0x97   :  { %2748 = vmatmul.mubr.msk.f32.gmra.mrb[6].mxu1 %vm180_vm0, %v141_v25  ;;  %v535_v25 = vld [vmem:[#allocation8 + $0xe8] sm:$0xff]  ;;  %v521_v42 = vld [vmem:[#allocation8 + $0x78] sm:$0xff]  ;;  %v2973_v43 = vpack.c.bf16 %v565_v40, %v564_v38  ;;  %v548_v45 = vld [vmem:[#allocation8 + $0x150] sm:$0xff] }
  0x98   :  { %2960 = vmatpush3.bf16.msra.mxu1 %v2959_v62  ;;  %v2945_v27 = vpack.c.bf16 %v535_v25, %v534_v24  ;;  %v2951_v44 = vpack.c.bf16 %v521_v42, %v520_v41  ;;  %v549_v46 = vld [vmem:[#allocation8 + $0x158] sm:$0xff]  ;;  %v567_v49 = vld [vmem:[#allocation8 + $0x1e8] sm:$0xff]  ;;  %v550_v51 = vld [vmem:[#allocation8 + $0x160] sm:$0xff]  ;;  %v4163_v62 = vsub.s32 0, %v161_v61 }
  0x99   :  { %2962 = vmatprep.subr.bf16.mxu1 %v2961_v7  ;;  %2940 = vmatpush3.bf16.msra.mxu0 %v2939_v8  ;;  %v2975_v47 = vpack.c.bf16 %v549_v46, %v548_v45  ;;  %v2977_v50 = vpack.c.bf16 %v567_v49, %v566_v48  ;;  %v551_v52 = vld [vmem:[#allocation8 + $0x168] sm:$0xff]  ;;  %v568_v54 = vld [vmem:[#allocation8 + $0x1f0] sm:$0xff]  ;;  %v569_v55 = vld [vmem:[#allocation8 + $0x1f8] sm:$0xff]  ;;  %v4172_v7 = vsub.s32 2, %v161_v61 }
  0x9a   :  { %2942 = vmatprep.subr.bf16.mxu0 %v2941_v15  ;;  %v2979_v53 = vpack.c.bf16 %v551_v52, %v550_v51  ;;  %v2981_v56 = vpack.c.bf16 %v569_v55, %v568_v54  ;;  %v552_v57 = vld [vmem:[#allocation8 + $0x170] sm:$0xff]  ;;  %v553_v58 = vld [vmem:[#allocation8 + $0x178] sm:$0xff] }
  0x9b   :  { %v2983_v59 = vpack.c.bf16 %v553_v58, %v552_v57  ;;  %v158_v63 = vld [vmem:[%s4695_s29] sm:$0xf] }
  0x9c   :  { %2964 = vmatpush3.bf16.msra.mxu1 %v2963_v11  ;;  %v163_v2 = vrot.slane %v158_v63, %v4163_v62  ;;  %v167_v4 = vrot.slane %v158_v63, %v4168_v1  ;;  %v171_v16 = vrot.slane %v158_v63, %v4172_v7 }
  0x9d   :  { %2966 = vmatprep.subr.bf16.mxu1 %v2965_v19  ;;  %2944 = vmatpush3.bf16.msra.mxu0 %v2943_v20  ;;  %v175_v20 = vrot.slane %v158_v63, %v4174_v10 }
  0x9e   :  { %2946 = vmatprep.subr.bf16.mxu0 %v2945_v27 }
  0xa0   :  { %2968 = vmatpush3.bf16.msra.mxu1 %v2967_v23 }
  0xa1   :  { %2970 = vmatprep.subr.bf16.mxu1 %v2969_v31  ;;  %2948 = vmatpush3.bf16.msra.mxu0 %v2947_v32 }
  0xa2   :  { %2950 = vmatprep.subr.bf16.mxu0 %v2949_v39 }
  0xa4   :  { %2972 = vmatpush3.bf16.msra.mxu1 %v2971_v35 }
  0xa5   :  { %2974 = vmatprep.subr.bf16.mxu1 %v2973_v43  ;;  %2952 = vmatpush3.bf16.msra.mxu0 %v2951_v44 }
  0xa8   :  { %2976 = vmatpush3.bf16.msra.mxu1 %v2975_v47 }
  0xa9   :  { %2978 = vmatprep.subr.bf16.mxu1 %v2977_v50 }
  0xac   :  { %2980 = vmatpush3.bf16.msra.mxu1 %v2979_v53 }
  0xad   :  { %2982 = vmatprep.subr.bf16.mxu1 %v2981_v56 }
  0xb0   :  { %2984 = vmatpush3.bf16.msra.mxu1 %v2983_v59 }
 0x15e   :  { %v253_v3 = vpop.f32.mrb[0].mxu1 }
 0x15f   :  { %v255_v5 = vpop.f32.mrb[1].mxu1  ;;  %v254_v6 = vadd.f32 %v253_v3, %v163_v2 }
 0x160   :  { %v256_v8 = vadd.f32 %v255_v5, %v167_v4 }
 0x161   :  { %v341_v14 = vmax.f32 %v254_v6, 0.0 }
 0x162   :  { %v259_v9 = vpop.f32.mrb[2].mxu1  ;;  %v342_v17 = vmax.f32 %v256_v8, 0.0 }
 0x163   :  { %v260_v11 = vadd.f32 %v259_v9, %v163_v2  ;;  %v261_v12 = vpop.f32.mrb[3].mxu1 }
 0x164   :  { %v262_v13 = vadd.f32 %v261_v12, %v167_v4 }
 0x165   :  { %v345_v15 = vmax.f32 %v260_v11, 0.0 }
 0x166   :  { %v346_v18 = vmax.f32 %v262_v13, 0.0  ;;  %v330_v19 = vpop.f32.mrb[4].mxu1 }
 0x167   :  { %v351_v21 = vadd.f32 %v345_v15, %v341_v14  ;;  %v332_v22 = vpop.f32.mrb[5].mxu1  ;;  %v331_v25 = vadd.f32 %v330_v19, %v171_v16 }
 0x168   :  { %v358_v23 = vadd.f32 %v346_v18, %v342_v17  ;;  %v333_v27 = vadd.f32 %v332_v22, %v175_v20 }
 0x169   :  { %v352_v24 = vrot.slane %v351_v21, 4  ;;  %v343_v35 = vmax.f32 %v331_v25, 0.0 }
 0x16a   :  { %v359_v26 = vrot.slane %v358_v23, 4  ;;  %v336_v28 = vpop.f32.mrb[6].mxu1  ;;  %v344_v38 = vmax.f32 %v333_v27, 0.0 }
 0x16b   :  { %v353_v29 = vadd.f32 %v352_v24, %v351_v21  ;;  %v337_v30 = vadd.f32 %v336_v28, %v171_v16  ;;  %v338_v31 = vpop.f32.mrb[7].mxu1 }
 0x16c   :  { %v360_v32 = vadd.f32 %v359_v26, %v358_v23  ;;  %v339_v33 = vadd.f32 %v338_v31, %v175_v20 }
 0x16d   :  { %v354_v34 = vrot.slane %v353_v29, 2  ;;  %v347_v36 = vmax.f32 %v337_v30, 0.0 }
 0x16e   :  { %v361_v37 = vrot.slane %v360_v32, 2  ;;  %v348_v39 = vmax.f32 %v339_v33, 0.0 }
 0x16f   :  { %v355_v40 = vadd.f32 %v354_v34, %v353_v29  ;;  %v365_v41 = vadd.f32 %v347_v36, %v343_v35 }
 0x170   :  { %v362_v42 = vadd.f32 %v361_v37, %v360_v32  ;;  %v372_v43 = vadd.f32 %v348_v39, %v344_v38 }
 0x171   :  { %v356_v44 = vrot.slane %v355_v40, 1  ;;  %v366_v45 = vrot.slane %v365_v41, 4 }
 0x172   :  { %v363_v46 = vrot.slane %v362_v42, 1  ;;  %v373_v47 = vrot.slane %v372_v43, 4 }
 0x173   :  { %v357_v48 = vadd.f32 %v356_v44, %v355_v40  ;;  %v367_v49 = vadd.f32 %v366_v45, %v365_v41 }
 0x174   :  { %v364_v50 = vadd.f32 %v363_v46, %v362_v42  ;;  %v374_v51 = vadd.f32 %v373_v47, %v372_v43 }
 0x175   :  { %v380_v52 = vmul.f32 0.0625, %v357_v48  ;;  %v368_v53 = vrot.slane %v367_v49, 2 }
 0x176   :  { %v381_v54 = vmul.f32 0.0625, %v364_v50  ;;  %v375_v55 = vrot.slane %v374_v51, 2 }
 0x177   :  { %v4178_v56 = vsub.f32 %v341_v14, %v380_v52  ;;  %v4180_v57 = vsub.f32 %v345_v15, %v380_v52  ;;  %v369_v58 = vadd.f32 %v368_v53, %v367_v49 }
 0x178   :  { %v4182_v59 = vsub.f32 %v342_v17, %v381_v54  ;;  %v4184_v61 = vsub.f32 %v346_v18, %v381_v54  ;;  %v376_v63 = vadd.f32 %v375_v55, %v374_v51 }
 0x179   :  { %v392_v2 = vmul.f32 %v4178_v56, %v4178_v56  ;;  %v396_v3 = vmul.f32 %v4180_v57, %v4180_v57  ;;  %v370_v4 = vrot.slane %v369_v58, 1 }
 0x17a   :  { %v393_v5 = vmul.f32 %v4182_v59, %v4182_v59  ;;  %v397_v6 = vmul.f32 %v4184_v61, %v4184_v61  ;;  %v377_v8 = vrot.slane %v376_v63, 1 }
 0x17b   :  { %v400_v9 = vadd.f32 %v396_v3, %v392_v2  ;;  %v371_v11 = vadd.f32 %v370_v4, %v369_v58  ;;  %v350_v3 = vld [vmem:[%s4667_s4] sm:$0xf] }
 0x17c   :  { %v407_v12 = vadd.f32 %v397_v6, %v393_v5  ;;  %v378_v13 = vadd.f32 %v377_v8, %v376_v63  ;;  %v349_v63 = vld [vmem:[%s4666_s3] sm:$0xf] }
 0x17d   :  { %v401_v14 = vrot.slane %v400_v9, 4  ;;  %v382_v15 = vmul.f32 0.0625, %v371_v11  ;;  %v452_v4 = vrot.slane %v349_v63, %v4163_v62  ;;  %v456_v6 = vrot.slane %v349_v63, %v4168_v1 }
 0x17e   :  { %v408_v16 = vrot.slane %v407_v12, 4  ;;  %v383_v17 = vmul.f32 0.0625, %v378_v13 }
 0x17f   :  { %v402_v18 = vadd.f32 %v401_v14, %v400_v9  ;;  %v4194_v19 = vsub.f32 %v343_v35, %v382_v15  ;;  %v4196_v20 = vsub.f32 %v347_v36, %v382_v15  ;;  %v485_v14 = vrot.slane %v350_v3, %v4168_v1 }
 0x180   :  { %v409_v21 = vadd.f32 %v408_v16, %v407_v12  ;;  %v4198_v22 = vsub.f32 %v344_v38, %v383_v17  ;;  %v4200_v23 = vsub.f32 %v348_v39, %v383_v17  ;;  %v481_v16 = vrot.slane %v350_v3, %v4163_v62 }
 0x181   :  { %v403_v24 = vrot.slane %v402_v18, 2  ;;  %v394_v25 = vmul.f32 %v4194_v19, %v4194_v19  ;;  %v398_v26 = vmul.f32 %v4196_v20, %v4196_v20 }
 0x182   :  { %v410_v27 = vrot.slane %v409_v21, 2  ;;  %v395_v28 = vmul.f32 %v4198_v22, %v4198_v22  ;;  %v399_v29 = vmul.f32 %v4200_v23, %v4200_v23 }
 0x183   :  { %v404_v30 = vadd.f32 %v403_v24, %v402_v18  ;;  %v414_v31 = vadd.f32 %v398_v26, %v394_v25  ;;  %v460_v24 = vrot.slane %v349_v63, %v4172_v7 }
 0x184   :  { %v411_v32 = vadd.f32 %v410_v27, %v409_v21  ;;  %v421_v33 = vadd.f32 %v399_v29, %v395_v28 }
 0x185   :  { %v405_v34 = vrot.slane %v404_v30, 1  ;;  %v415_v35 = vrot.slane %v414_v31, 4 }
 0x186   :  { %v412_v36 = vrot.slane %v411_v32, 1  ;;  %v422_v37 = vrot.slane %v421_v33, 4 }
 0x187   :  { %v406_v38 = vadd.f32 %v405_v34, %v404_v30  ;;  %v416_v39 = vadd.f32 %v415_v35, %v414_v31  ;;  %v493_v31 = vrot.slane %v350_v3, %v4174_v10 }
 0x188   :  { %v413_v40 = vadd.f32 %v412_v36, %v411_v32  ;;  %v423_v41 = vadd.f32 %v422_v37, %v421_v33  ;;  %v489_v32 = vrot.slane %v350_v3, %v4172_v7  ;;  %v781_v3 = vld [vmem:[#allocation9 + $0x50] sm:$0xff] }
 0x189   :  { %v428_v42 = vmul.f32 0.0625, %v406_v38  ;;  %v417_v43 = vrot.slane %v416_v39, 2 }
 0x18a   :  { %v429_v44 = vmul.f32 0.0625, %v413_v40  ;;  %v424_v45 = vrot.slane %v423_v41, 2  ;;  %v774_v40 = vld [vmem:[#allocation9 + $0x18] sm:$0xff] }
 0x18b   :  { %v432_v46 = vadd.f32 1e-05, %v428_v42  ;;  %v418_v47 = vadd.f32 %v417_v43, %v416_v39  ;;  %v776_v39 = vld [vmem:[#allocation9 + $0x28] sm:$0xff]  ;;  %v778_v42 = vld [vmem:[#allocation9 + $0x38] sm:$0xff]  ;;  %v771_v43 = vld [vmem:[#allocation9] sm:$0xff] }
 0x18c   :  { %v433_v48 = vadd.f32 1e-05, %v429_v44  ;;  %v425_v49 = vadd.f32 %v424_v45, %v423_v41  ;;  %v775_v44 = vld [vmem:[#allocation9 + $0x20] sm:$0xff]  ;;  %v3017_v45 = vpack.c.bf16 %v778_v42, %v774_v40  ;;  %v812_v40 = vld [vmem:[#allocation9 + $0x148] sm:$0xff]  ;;  %v814_v42 = vld [vmem:[#allocation9 + $0x158] sm:$0xff] }
 0x18d   :  { %3601 = vrsqrt.f32 %v432_v46  ;;  %v419_v50 = vrot.slane %v418_v47, 1  ;;  %v2987_v46 = vpack.c.bf16 %v775_v44, %v771_v43  ;;  %v818_v44 = vld [vmem:[#allocation9 + $0x178] sm:$0xff] }
 0x18e   :  { %3603 = vrsqrt.f32 %v433_v48  ;;  %v426_v51 = vrot.slane %v425_v49, 1  ;;  %v777_v48 = vld [vmem:[#allocation9 + $0x30] sm:$0xff]  ;;  %3018 = vmatprep.subr.bf16.mxu1 %v3017_v45  ;;  %v811_v45 = vld [vmem:[#allocation9 + $0x140] sm:$0xff] }
 0x18f   :  { %v420_v52 = vadd.f32 %v419_v50, %v418_v47  ;;  %v773_v47 = vld [vmem:[#allocation9 + $0x10] sm:$0xff]  ;;  %v780_v50 = vld [vmem:[#allocation9 + $0x48] sm:$0xff] }
 0x190   :  { %v427_v53 = vadd.f32 %v426_v51, %v425_v49  ;;  %v3019_v49 = vpack.c.bf16 %v777_v48, %v773_v47  ;;  %v784_v51 = vld [vmem:[#allocation9 + $0x68] sm:$0xff]  ;;  %v3037_v47 = vpack.c.bf16 %v818_v44, %v814_v42 }
 0x191   :  { %v430_v54 = vmul.f32 0.0625, %v420_v52  ;;  %v782_v52 = vld [vmem:[#allocation9 + $0x58] sm:$0xff] }
 0x192   :  { %v431_v55 = vmul.f32 0.0625, %v427_v53  ;;  %v2989_v53 = vpack.c.bf16 %v784_v51, %v780_v50  ;;  %v817_v50 = vld [vmem:[#allocation9 + $0x170] sm:$0xff] }
 0x193   :  { %v434_v58 = vadd.f32 1e-05, %v430_v54  ;;  %v786_v54 = vld [vmem:[#allocation9 + $0x78] sm:$0xff] }
 0x194   :  { %v435_v2 = vadd.f32 1e-05, %v431_v55  ;;  %v779_v55 = vld [vmem:[#allocation9 + $0x40] sm:$0xff] }
 0x195   :  { %3605 = vrsqrt.f32 %v434_v58  ;;  %v783_v58 = vld [vmem:[#allocation9 + $0x60] sm:$0xff] }
 0x196   :  { %3607 = vrsqrt.f32 %v435_v2  ;;  %v2991_v2 = vpack.c.bf16 %v783_v58, %v779_v55  ;;  %v826_v58 = vld [vmem:[#allocation9 + $0x1b8] sm:$0xff] }
 0x197   :  { %v3602_v5 = vpop.eup %3601 }
 0x198   :  { %v3604_v8 = vpop.eup %3603  ;;  %v444_v9 = vmul.f32 %v3602_v5, %v4180_v57  ;;  %v440_v11 = vmul.f32 %v3602_v5, %v4178_v56  ;;  %v464_v56 = vrot.slane %v349_v63, %v4174_v10  ;;  %v3021_v63 = vpack.c.bf16 %v786_v54, %v782_v52  ;;  %v820_v52 = vld [vmem:[#allocation9 + $0x188] sm:$0xff]  ;;  %v822_v54 = vld [vmem:[#allocation9 + $0x198] sm:$0xff] }
 0x199   :  { %v445_v12 = vmul.f32 %v3604_v8, %v4184_v61  ;;  %v441_v13 = vmul.f32 %v3604_v8, %v4182_v59  ;;  %v792_v8 = vld [vmem:[#allocation9 + $0xa8] sm:$0xff] }
 0x19a   :  { %v469_v15 = vmul.f32 %v452_v4, %v440_v11  ;;  %v473_v26 = vmul.f32 %v452_v4, %v444_v9  ;;  %v785_v4 = vld [vmem:[#allocation9 + $0x70] sm:$0xff]  ;;  %v790_v9 = vld [vmem:[#allocation9 + $0x98] sm:$0xff] }
 0x19b   :  { %v470_v17 = vmul.f32 %v456_v6, %v441_v13  ;;  %v474_v18 = vmul.f32 %v456_v6, %v445_v12  ;;  %v3023_v5 = vpack.c.bf16 %v785_v4, %v781_v3  ;;  %v788_v6 = vld [vmem:[#allocation9 + $0x88] sm:$0xff]  ;;  %v794_v12 = vld [vmem:[#allocation9 + $0xb8] sm:$0xff]  ;;  %v787_v13 = vld [vmem:[#allocation9 + $0x80] sm:$0xff]  ;;  %v3041_v3 = vpack.c.bf16 %v826_v58, %v822_v54 }
 0x19c   :  { %v498_v25 = vadd.f32 %v481_v16, %v469_v15  ;;  %v502_v33 = vadd.f32 %v481_v16, %v473_v26  ;;  %v2993_v11 = vpack.c.bf16 %v792_v8, %v788_v6  ;;  %v3025_v15 = vpack.c.bf16 %v794_v12, %v790_v9  ;;  %v798_v26 = vld [vmem:[#allocation9 + $0xd8] sm:$0xff]  ;;  %v825_v6 = vld [vmem:[#allocation9 + $0x1b0] sm:$0xff]  ;;  %v828_v9 = vld [vmem:[#allocation9 + $0x1c8] sm:$0xff] }
 0x19d   :  { %v499_v21 = vadd.f32 %v485_v14, %v470_v17  ;;  %v503_v57 = vadd.f32 %v485_v14, %v474_v18  ;;  %v791_v14 = vld [vmem:[#allocation9 + $0xa0] sm:$0xff]  ;;  %v789_v17 = vld [vmem:[#allocation9 + $0x90] sm:$0xff]  ;;  %v830_v12 = vld [vmem:[#allocation9 + $0x1d8] sm:$0xff] }
 0x19e   :  { %v2995_v16 = vpack.c.bf16 %v791_v14, %v787_v13  ;;  %v793_v18 = vld [vmem:[#allocation9 + $0xb0] sm:$0xff]  ;;  %v834_v14 = vld [vmem:[#allocation9 + $0x1f8] sm:$0xff] }
 0x19f   :  { %v3606_v27 = vpop.eup %3605  ;;  %641 = vmatprep.mubr.f32.mxu0 %v499_v21  ;;  %v3027_v21 = vpack.c.bf16 %v793_v18, %v789_v17  ;;  %v3045_v17 = vpack.c.bf16 %v834_v14, %v830_v12  ;;  %v1019_v12 = vld [vmem:[#allocation11] sm:$0xff] }
 0x1a0   :  { %v3608_v61 = vpop.eup %3607  ;;  %v442_v59 = vmul.f32 %v3606_v27, %v4194_v19  ;;  %v446_v28 = vmul.f32 %v3606_v27, %v4196_v20  ;;  %642 = vmatmul.mubr.f32.vlgmr.msra.gmra.mrb[0].mxu0 %v498_v25  ;;  %v800_v25 = vld [vmem:[#allocation9 + $0xe8] sm:$0xff] }
 0x1a1   :  { %v447_v29 = vmul.f32 %v3608_v61, %v4200_v23  ;;  %646 = vmatprep.mubr.f32.mxu0 %v503_v57  ;;  %v443_v30 = vmul.f32 %v3608_v61, %v4198_v22  ;;  %v772_v22 = vld [vmem:[#allocation9 + $0x8] sm:$0xff]  ;;  %v802_v57 = vld [vmem:[#allocation9 + $0xf8] sm:$0xff]  ;;  %v799_v61 = vld [vmem:[#allocation9 + $0xe0] sm:$0xff] }
 0x1a2   :  { %v471_v34 = vmul.f32 %v460_v24, %v442_v59  ;;  %v475_v20 = vmul.f32 %v460_v24, %v446_v28  ;;  %v2985_v41 = vpack.c.bf16 %v776_v39, %v772_v22  ;;  %v796_v24 = vld [vmem:[#allocation9 + $0xc8] sm:$0xff]  ;;  %v3029_v59 = vpack.c.bf16 %v802_v57, %v798_v26  ;;  %v809_v22 = vld [vmem:[#allocation9 + $0x130] sm:$0xff]  ;;  %v1022_v57 = vld [vmem:[#allocation11 + $0x18] sm:$0xff] }
 0x1a3   :  { %v472_v35 = vmul.f32 %v464_v56, %v443_v30  ;;  %v476_v36 = vmul.f32 %v464_v56, %v447_v29  ;;  %v2997_v27 = vpack.c.bf16 %v800_v25, %v796_v24  ;;  %v795_v56 = vld [vmem:[#allocation9 + $0xc0] sm:$0xff]  ;;  %v797_v29 = vld [vmem:[#allocation9 + $0xd0] sm:$0xff]  ;;  %v1020_v26 = vld [vmem:[#allocation11 + $0x8] sm:$0xff] }
 0x1a4   :  { %647 = vmatmul.mubr.f32.gmra.mrb[2].mxu0 %v502_v33  ;;  %v500_v19 = vadd.f32 %v489_v32, %v471_v34  ;;  %v504_v23 = vadd.f32 %v489_v32, %v475_v20  ;;  %2986 = vmatprep.subr.bf16.mxu0 %v2985_v41  ;;  %v2999_v28 = vpack.c.bf16 %v799_v61, %v795_v56  ;;  %v801_v30 = vld [vmem:[#allocation9 + $0xf0] sm:$0xff]  ;;  %v804_v32 = vld [vmem:[#allocation9 + $0x108] sm:$0xff]  ;;  %v806_v34 = vld [vmem:[#allocation9 + $0x118] sm:$0xff] }
 0x1a5   :  { %v501_v37 = vadd.f32 %v493_v31, %v472_v35  ;;  %921 = vmatprep.mubr.f32.mxu0 %v3963_v0  ;;  %v505_v38 = vadd.f32 %v493_v31, %v476_v36  ;;  %2988 = vmatpush1.bf16.msra.mxu0 %v2987_v46  ;;  %v3031_v31 = vpack.c.bf16 %v801_v30, %v797_v29  ;;  %v808_v33 = vld [vmem:[#allocation9 + $0x128] sm:$0xff]  ;;  %v810_v36 = vld [vmem:[#allocation9 + $0x138] sm:$0xff]  ;;  %v815_v46 = vld [vmem:[#allocation9 + $0x160] sm:$0xff] }
 0x1a6   :  { %2990 = vmatprep.subr.bf16.mxu0 %v2989_v53  ;;  %v3001_v35 = vpack.c.bf16 %v808_v33, %v804_v32  ;;  %v3033_v20 = vpack.c.bf16 %v810_v36, %v806_v34  ;;  %v816_v41 = vld [vmem:[#allocation9 + $0x168] sm:$0xff]  ;;  %v3007_v48 = vpack.c.bf16 %v815_v46, %v811_v45  ;;  %v833_v24 = vld [vmem:[#allocation9 + $0x1f0] sm:$0xff]  ;;  %v1026_v61 = vld [vmem:[#allocation11 + $0x38] sm:$0xff] }
 0x1a7   :  { %716 = vmatprep.mubr.f32.mxu1 %v501_v37  ;;  %v803_v37 = vld [vmem:[#allocation9 + $0x100] sm:$0xff]  ;;  %v3005_v43 = vpack.c.bf16 %v816_v41, %v812_v40  ;;  %v824_v53 = vld [vmem:[#allocation9 + $0x1a8] sm:$0xff]  ;;  %v2749_v34 = vld [vmem:[%s4669_s6] ss:$0 sm:$0xff] }
 0x1a8   :  { %717 = vmatmul.mubr.f32.vlgmr.msra.gmra.mrb[8].mxu1 %v500_v19  ;;  %v807_v19 = vld [vmem:[#allocation9 + $0x120] sm:$0xff]  ;;  %v3009_v55 = vpack.c.bf16 %v824_v53, %v820_v52 }
 0x1a9   :  { %721 = vmatprep.mubr.f32.mxu1 %v505_v38  ;;  %3020 = vmatpush1.bf16.msra.mxu1 %v3019_v49  ;;  %v3003_v38 = vpack.c.bf16 %v807_v19, %v803_v37  ;;  %v813_v49 = vld [vmem:[#allocation9 + $0x150] sm:$0xff] }
 0x1aa   :  { %3022 = vmatprep.subr.bf16.mxu1 %v3021_v63  ;;  %2992 = vmatpush1.bf16.msra.mxu0 %v2991_v2  ;;  %v3039_v51 = vpack.c.bf16 %v817_v50, %v813_v49  ;;  %v819_v63 = vld [vmem:[#allocation9 + $0x180] sm:$0xff] }
 0x1ab   :  { %2994 = vmatprep.subr.bf16.mxu0 %v2993_v11  ;;  %v823_v2 = vld [vmem:[#allocation9 + $0x1a0] sm:$0xff]  ;;  %v832_v11 = vld [vmem:[#allocation9 + $0x1e8] sm:$0xff] }
 0x1ac   :  { %722 = vmatmul.mubr.f32.gmra.mrb[10].mxu1 %v504_v23  ;;  %v805_v23 = vld [vmem:[#allocation9 + $0x110] sm:$0xff]  ;;  %v3011_v4 = vpack.c.bf16 %v823_v2, %v819_v63  ;;  %v3013_v13 = vpack.c.bf16 %v832_v11, %v828_v9 }
 0x1ad   :  { %998 = vmatprep.mubr.f32.mxu1 %v3963_v0  ;;  %3024 = vmatpush1.bf16.msra.mxu1 %v3023_v5  ;;  %v3035_v39 = vpack.c.bf16 %v809_v22, %v805_v23  ;;  %v821_v5 = vld [vmem:[#allocation9 + $0x190] sm:$0xff] }
 0x1ae   :  { %3026 = vmatprep.subr.bf16.mxu1 %v3025_v15  ;;  %2996 = vmatpush1.bf16.msra.mxu0 %v2995_v16  ;;  %v3043_v8 = vpack.c.bf16 %v825_v6, %v821_v5  ;;  %v827_v15 = vld [vmem:[#allocation9 + $0x1c0] sm:$0xff]  ;;  %v2750_v11 = vld [vmem:[%s4670_s7] ss:$0 sm:$0xff] }
 0x1af   :  { %2998 = vmatprep.subr.bf16.mxu0 %v2997_v27  ;;  %v831_v16 = vld [vmem:[#allocation9 + $0x1e0] sm:$0xff]  ;;  %v1024_v27 = vld [vmem:[#allocation11 + $0x28] sm:$0xff] }
 0x1b0   :  { %v3015_v18 = vpack.c.bf16 %v831_v16, %v827_v15  ;;  %v4234_v56 = vpack.c.bf16 %v1024_v27, %v1020_v26  ;;  %v1023_v15 = vld [vmem:[#allocation11 + $0x20] sm:$0xff]  ;;  %v1021_v16 = vld [vmem:[#allocation11 + $0x10] sm:$0xff]  ;;  %v1030_v26 = vld [vmem:[#allocation11 + $0x58] sm:$0xff] }
 0x1b1   :  { %3028 = vmatpush1.bf16.msra.mxu1 %v3027_v21  ;;  %v829_v21 = vld [vmem:[#allocation9 + $0x1d0] sm:$0xff]  ;;  %v1034_v27 = vld [vmem:[#allocation11 + $0x78] sm:$0xff] }
 0x1b2   :  { %3030 = vmatprep.subr.bf16.mxu1 %v3029_v59  ;;  %3000 = vmatpush1.bf16.msra.mxu0 %v2999_v28  ;;  %v3047_v25 = vpack.c.bf16 %v833_v24, %v829_v21  ;;  %v4236_v59 = vpack.c.bf16 %v1026_v61, %v1022_v57  ;;  %v1028_v21 = vld [vmem:[#allocation11 + $0x48] sm:$0xff]  ;;  %v4249_v57 = vpack.c.bf16 %v1023_v15, %v1019_v12 }
 0x1b3   :  { %3002 = vmatprep.subr.bf16.mxu0 %v3001_v35  ;;  %v1060_v15 = vld [vmem:[#allocation11 + $0x148] sm:$0xff] }
 0x1b5   :  { %3032 = vmatpush1.bf16.msra.mxu1 %v3031_v31 }
 0x1b6   :  { %3034 = vmatprep.subr.bf16.mxu1 %v3033_v20  ;;  %3004 = vmatpush1.bf16.msra.mxu0 %v3003_v38 }
 0x1b7   :  { %3006 = vmatprep.subr.bf16.mxu0 %v3005_v43 }
 0x1b9   :  { %3036 = vmatpush1.bf16.msra.mxu1 %v3035_v39 }
 0x1ba   :  { %3038 = vmatprep.subr.bf16.mxu1 %v3037_v47  ;;  %3008 = vmatpush1.bf16.msra.mxu0 %v3007_v48 }
 0x1bb   :  { %3010 = vmatprep.subr.bf16.mxu0 %v3009_v55 }
 0x1bd   :  { %3040 = vmatpush1.bf16.msra.mxu1 %v3039_v51 }
 0x1be   :  { %3042 = vmatprep.subr.bf16.mxu1 %v3041_v3  ;;  %3012 = vmatpush1.bf16.msra.mxu0 %v3011_v4 }
 0x1bf   :  { %3014 = vmatprep.subr.bf16.mxu0 %v3013_v13 }
 0x1c1   :  { %3044 = vmatpush1.bf16.msra.mxu1 %v3043_v8 }
 0x1c2   :  { %3046 = vmatprep.subr.bf16.mxu1 %v3045_v17  ;;  %3016 = vmatpush1.bf16.msra.mxu0 %v3015_v18  ;;  %v1025_v17 = vld [vmem:[#allocation11 + $0x30] sm:$0xff] }
 0x1c3   :  { %3050 = vmatprep.subr.bf16.mxu0 %v4234_v56  ;;  %v2751_v18 = vld [vmem:[%s4671_s8] ss:$0 sm:$0xff]  ;;  %v4251_v61 = vpack.c.bf16 %v1025_v17, %v1021_v16  ;;  %v1064_v16 = vld [vmem:[#allocation11 + $0x168] sm:$0xff]  ;;  %v1062_v17 = vld [vmem:[#allocation11 + $0x158] sm:$0xff] }
 0x1c5   :  { %3048 = vmatpush1.bf16.msra.mxu1 %v3047_v25  ;;  %v1032_v25 = vld [vmem:[#allocation11 + $0x68] sm:$0xff] }
 0x1c6   :  { %3082 = vmatprep.subr.bf16.mxu1 %v4236_v59 }
 0x273   :  { %v2809_v28 = vpop.f32.mrb[0].mxu0 }
 0x274   :  { %v2810_v29 = vpop.f32.mrb[1].mxu0 }
 0x275   :  { %v2811_v30 = vadd.f32 %v2810_v29, %v2809_v28  ;;  %v1027_v28 = vld [vmem:[#allocation11 + $0x40] sm:$0xff] }
 0x276   :  { %v1031_v29 = vld [vmem:[#allocation11 + $0x60] sm:$0xff] }
 0x277   :  { %v2812_v31 = vpop.f32.mrb[2].mxu0  ;;  %v644_v37 = vadd.f32 %v2811_v30, %v2749_v34 }
 0x278   :  { %v2813_v32 = vpop.f32.mrb[3].mxu0 }
 0x279   :  { %v2814_v33 = vadd.f32 %v2813_v32, %v2812_v31  ;;  %v1029_v32 = vld [vmem:[#allocation11 + $0x50] sm:$0xff] }
 0x27b   :  { %v2847_v35 = vpop.f32.mrb[8].mxu1  ;;  %v649_v22 = vadd.f32 %v2814_v33, %v2749_v34  ;;  %v1033_v33 = vld [vmem:[#allocation11 + $0x70] sm:$0xff]  ;;  %v1036_v34 = vld [vmem:[#allocation11 + $0x88] sm:$0xff] }
 0x27c   :  { %v2848_v36 = vpop.f32.mrb[9].mxu1 }
 0x27d   :  { %v2849_v19 = vadd.f32 %v2848_v36, %v2847_v35  ;;  %v4253_v35 = vpack.c.bf16 %v1032_v25, %v1028_v21  ;;  %v4255_v36 = vpack.c.bf16 %v1034_v27, %v1030_v26  ;;  %v1059_v25 = vld [vmem:[#allocation11 + $0x140] sm:$0xff]  ;;  %v4305_v27 = vpack.c.bf16 %v1064_v16, %v1060_v15 }
 0x27e   :  { %v1063_v26 = vld [vmem:[#allocation11 + $0x160] sm:$0xff] }
 0x27f   :  { %v719_v20 = vadd.f32 %v2849_v19, %v644_v37  ;;  %v2850_v38 = vpop.f32.mrb[10].mxu1  ;;  %v1040_v37 = vld [vmem:[#allocation11 + $0xa8] sm:$0xff]  ;;  %v1038_v19 = vld [vmem:[#allocation11 + $0x98] sm:$0xff] }
 0x280   :  { %v2851_v23 = vpop.f32.mrb[11].mxu1 }
 0x281   :  { %v2852_v39 = vadd.f32 %v2851_v23, %v2850_v38  ;;  %v727_v41 = vmax.f32 %v719_v20, 0.0  ;;  %v1042_v20 = vld [vmem:[#allocation11 + $0xb8] sm:$0xff]  ;;  %v4259_v38 = vpack.c.bf16 %v1031_v29, %v1027_v28  ;;  %v4261_v23 = vpack.c.bf16 %v1033_v33, %v1029_v32  ;;  %v1061_v29 = vld [vmem:[#allocation11 + $0x150] sm:$0xff]  ;;  %v1072_v32 = vld [vmem:[#allocation11 + $0x1a8] sm:$0xff] }
 0x282   :  { %v1070_v33 = vld [vmem:[#allocation11 + $0x198] sm:$0xff] }
 0x283   :  { %v724_v40 = vadd.f32 %v2852_v39, %v649_v22  ;;  %v1035_v22 = vld [vmem:[#allocation11 + $0x80] sm:$0xff] }
 0x284   :  { %v1039_v39 = vld [vmem:[#allocation11 + $0xa0] sm:$0xff] }
 0x285   :  { %v728_v42 = vmax.f32 %v724_v40, 0.0 }
 0x287   :  { %v731_v43 = vadd.f32 %v728_v42, %v727_v41 }
 0x289   :  { %v732_v44 = vrot.slane %v731_v43, 4 }
 0x28b   :  { %v733_v45 = vadd.f32 %v732_v44, %v731_v43  ;;  %v1037_v43 = vld [vmem:[#allocation11 + $0x90] sm:$0xff] }
 0x28c   :  { %v1041_v44 = vld [vmem:[#allocation11 + $0xb0] sm:$0xff] }
 0x28d   :  { %v734_v46 = vrot.slane %v733_v45, 2 }
 0x28f   :  { %v735_v47 = vadd.f32 %v734_v46, %v733_v45  ;;  %v1044_v45 = vld [vmem:[#allocation11 + $0xc8] sm:$0xff] }
 0x290   :  { %v1048_v46 = vld [vmem:[#allocation11 + $0xe8] sm:$0xff] }
 0x291   :  { %v736_v48 = vrot.slane %v735_v47, 1 }
 0x293   :  { %v737_v49 = vadd.f32 %v736_v48, %v735_v47  ;;  %v1046_v47 = vld [vmem:[#allocation11 + $0xd8] sm:$0xff] }
 0x294   :  { %v1050_v48 = vld [vmem:[#allocation11 + $0xf8] sm:$0xff] }
 0x295   :  { %v738_v50 = vmul.f32 0.0625, %v737_v49  ;;  %v4273_v49 = vpack.c.bf16 %v1039_v39, %v1035_v22  ;;  %v1071_v22 = vld [vmem:[#allocation11 + $0x1a0] sm:$0xff] }
 0x297   :  { %v739_v51 = vsub.f32 %v727_v41, %v738_v50  ;;  %v740_v52 = vsub.f32 %v728_v42, %v738_v50  ;;  %v4265_v41 = vpack.c.bf16 %v1040_v37, %v1036_v34  ;;  %v4267_v42 = vpack.c.bf16 %v1042_v20, %v1038_v19  ;;  %v1074_v34 = vld [vmem:[#allocation11 + $0x1b8] sm:$0xff]  ;;  %v1067_v20 = vld [vmem:[#allocation11 + $0x180] sm:$0xff] }
 0x298   :  { %v4275_v50 = vpack.c.bf16 %v1041_v44, %v1037_v43  ;;  %v4311_v37 = vpack.c.bf16 %v1063_v26, %v1059_v25  ;;  %v1069_v43 = vld [vmem:[#allocation11 + $0x190] sm:$0xff] }
 0x299   :  { %v741_v53 = vmul.f32 %v739_v51, %v739_v51  ;;  %v742_v54 = vmul.f32 %v740_v52, %v740_v52  ;;  %v1073_v44 = vld [vmem:[#allocation11 + $0x1b0] sm:$0xff] }
 0x29b   :  { %v743_v55 = vadd.f32 %v742_v54, %v741_v53  ;;  %v4279_v53 = vpack.c.bf16 %v1048_v46, %v1044_v45  ;;  %v4281_v54 = vpack.c.bf16 %v1050_v48, %v1046_v47  ;;  %v1076_v45 = vld [vmem:[#allocation11 + $0x1c8] sm:$0xff]  ;;  %v1078_v47 = vld [vmem:[#allocation11 + $0x1d8] sm:$0xff] }
 0x29c   :  { %v1080_v46 = vld [vmem:[#allocation11 + $0x1e8] sm:$0xff]  ;;  %v1082_v48 = vld [vmem:[#allocation11 + $0x1f8] sm:$0xff] }
 0x29d   :  { %v744_v58 = vrot.slane %v743_v55, 4 }
 0x29f   :  { %v745_v63 = vadd.f32 %v744_v58, %v743_v55  ;;  %v1045_v55 = vld [vmem:[#allocation11 + $0xd0] sm:$0xff] }
 0x2a0   :  { %v1049_v58 = vld [vmem:[#allocation11 + $0xf0] sm:$0xff] }
 0x2a1   :  { %v746_v2 = vrot.slane %v745_v63, 2 }
 0x2a3   :  { %v747_v3 = vadd.f32 %v746_v2, %v745_v63  ;;  %v1052_v63 = vld [vmem:[#allocation11 + $0x108] sm:$0xff] }
 0x2a4   :  { %v1056_v2 = vld [vmem:[#allocation11 + $0x128] sm:$0xff] }
 0x2a5   :  { %v748_v4 = vrot.slane %v747_v3, 1 }
 0x2a7   :  { %v749_v5 = vadd.f32 %v748_v4, %v747_v3  ;;  %v1054_v3 = vld [vmem:[#allocation11 + $0x118] sm:$0xff] }
 0x2a8   :  { %v1058_v4 = vld [vmem:[#allocation11 + $0x138] sm:$0xff] }
 0x2a9   :  { %v750_v6 = vmul.f32 0.0625, %v749_v5  ;;  %v4295_v12 = vpack.c.bf16 %v1058_v4, %v1054_v3  ;;  %v1077_v3 = vld [vmem:[#allocation11 + $0x1d0] sm:$0xff] }
 0x2aa   :  { %v1081_v4 = vld [vmem:[#allocation11 + $0x1f0] sm:$0xff] }
 0x2ab   :  { %v751_v8 = vadd.f32 1e-05, %v750_v6  ;;  %v4289_v6 = vpack.c.bf16 %v1049_v58, %v1045_v55  ;;  %v1075_v55 = vld [vmem:[#allocation11 + $0x1c0] sm:$0xff]  ;;  %v4329_v58 = vpack.c.bf16 %v1080_v46, %v1076_v45 }
 0x2ad   :  { %3609 = vrsqrt.f32 %v751_v8  ;;  %v1051_v8 = vld [vmem:[#allocation11 + $0x100] sm:$0xff] }
 0x2b7   :  { %v3610_v9 = vpop.eup %3609 }
 0x2b8   :  { %v753_v13 = vmul.f32 %v3610_v9, %v739_v51  ;;  %v754_v14 = vmul.f32 %v3610_v9, %v740_v52  ;;  %v1043_v51 = vld [vmem:[#allocation11 + $0xc0] sm:$0xff] }
 0x2b9   :  { %v1047_v52 = vld [vmem:[#allocation11 + $0xe0] sm:$0xff] }
 0x2ba   :  { %v761_v24 = vmul.f32 %v2750_v11, %v753_v13  ;;  %v762_v31 = vmul.f32 %v2750_v11, %v754_v14  ;;  %v4287_v5 = vpack.c.bf16 %v1047_v52, %v1043_v51  ;;  %v1055_v9 = vld [vmem:[#allocation11 + $0x120] sm:$0xff]  ;;  %v4293_v11 = vpack.c.bf16 %v1056_v2, %v1052_v63  ;;  %v1053_v13 = vld [vmem:[#allocation11 + $0x110] sm:$0xff] }
 0x2bb   :  { %v1057_v14 = vld [vmem:[#allocation11 + $0x130] sm:$0xff]  ;;  %v4299_v21 = vpack.c.bf16 %v1055_v9, %v1051_v8  ;;  %v4323_v51 = vpack.c.bf16 %v1071_v22, %v1067_v20  ;;  %v4325_v52 = vpack.c.bf16 %v1073_v44, %v1069_v43  ;;  %v4331_v63 = vpack.c.bf16 %v1082_v48, %v1078_v47  ;;  %v1079_v2 = vld [vmem:[#allocation11 + $0x1e0] sm:$0xff] }
 0x2bc   :  { %v769_v30 = vadd.f32 %v2751_v18, %v761_v24  ;;  %v770_v40 = vadd.f32 %v2751_v18, %v762_v31  ;;  %v1066_v18 = vld [vmem:[#allocation11 + $0x178] sm:$0xff]  ;;  %v4301_v24 = vpack.c.bf16 %v1057_v14, %v1053_v13  ;;  %v1068_v31 = vld [vmem:[#allocation11 + $0x188] sm:$0xff]  ;;  %v4335_v8 = vpack.c.bf16 %v1079_v2, %v1075_v55  ;;  %v1083_v13 = vld [vmem:[%s4677_s14] sm:$0x3] }
 0x2bd   :  { %v4307_v28 = vpack.c.bf16 %v1066_v18, %v1062_v17  ;;  %v4317_v39 = vpack.c.bf16 %v1072_v32, %v1068_v31  ;;  %v4337_v9 = vpack.c.bf16 %v1081_v4, %v1077_v3  ;;  %v835_v14 = vld [vmem:[%s4674_s11] sm:$0xf] }
 0x2be   :  { %922 = vmatmul.mubr.f32.vlgmr.msra.gmra.mrb[4].mxu0 %v769_v30  ;;  %999 = vmatmul.mubr.f32.vlgmr.msra.gmra.mrb[12].mxu1 %v769_v30  ;;  %v1065_v30 = vld [vmem:[#allocation11 + $0x170] sm:$0xff]  ;;  %v840_v15 = vrot.slane %v835_v14, %v4163_v62  ;;  %v848_v16 = vrot.slane %v835_v14, %v4172_v7  ;;  %v844_v17 = vrot.slane %v835_v14, %v4168_v1 }
 0x2bf   :  { %3052 = vmatpush1.bf16.msra.mxu0 %v4249_v57  ;;  %3084 = vmatpush1.bf16.msra.mxu1 %v4251_v61  ;;  %v4313_v19 = vpack.c.bf16 %v1065_v30, %v1061_v29  ;;  %v852_v18 = vrot.slane %v835_v14, %v4174_v10 }
 0x2c0   :  { %927 = vmatprep.mubr.f32.mxu0 %v3963_v0  ;;  %1004 = vmatprep.mubr.f32.mxu1 %v3963_v0 }
 0x2c1   :  { %3054 = vmatprep.subr.bf16.mxu0 %v4253_v35  ;;  %3086 = vmatprep.subr.bf16.mxu1 %v4255_v36 }
 0x2c2   :  { %928 = vmatmul.mubr.f32.gmra.mrb[6].mxu0 %v770_v40  ;;  %1005 = vmatmul.mubr.f32.gmra.mrb[14].mxu1 %v770_v40  ;;  %v4319_v40 = vpack.c.bf16 %v1074_v34, %v1070_v33 }
 0x2c3   :  { %3056 = vmatpush1.bf16.msra.mxu0 %v4259_v38  ;;  %3088 = vmatpush1.bf16.msra.mxu1 %v4261_v23 }
 0x2c4   :  { %3058 = vmatprep.subr.bf16.mxu0 %v4265_v41  ;;  %3090 = vmatprep.subr.bf16.mxu1 %v4267_v42 }
 0x2c5   :  { %1153 = vmatprep.mubr.f32.mxu0 %v3963_v0  ;;  %1224 = vmatprep.mubr.f32.mxu1 %v3963_v0 }
 0x2c7   :  { %3060 = vmatpush1.bf16.msra.mxu0 %v4273_v49  ;;  %3092 = vmatpush1.bf16.msra.mxu1 %v4275_v50 }
 0x2c8   :  { %3062 = vmatprep.subr.bf16.mxu0 %v4279_v53  ;;  %3094 = vmatprep.subr.bf16.mxu1 %v4281_v54 }
 0x2cb   :  { %3064 = vmatpush1.bf16.msra.mxu0 %v4287_v5  ;;  %3096 = vmatpush1.bf16.msra.mxu1 %v4289_v6 }
 0x2cc   :  { %3066 = vmatprep.subr.bf16.mxu0 %v4293_v11  ;;  %3098 = vmatprep.subr.bf16.mxu1 %v4295_v12 }
 0x2cf   :  { %3068 = vmatpush1.bf16.msra.mxu0 %v4299_v21  ;;  %3100 = vmatpush1.bf16.msra.mxu1 %v4301_v24 }
 0x2d0   :  { %3070 = vmatprep.subr.bf16.mxu0 %v4305_v27  ;;  %3102 = vmatprep.subr.bf16.mxu1 %v4307_v28 }
 0x2d3   :  { %3072 = vmatpush1.bf16.msra.mxu0 %v4311_v37  ;;  %3104 = vmatpush1.bf16.msra.mxu1 %v4313_v19 }
 0x2d4   :  { %3074 = vmatprep.subr.bf16.mxu0 %v4317_v39  ;;  %3106 = vmatprep.subr.bf16.mxu1 %v4319_v40 }
 0x2d7   :  { %3076 = vmatpush1.bf16.msra.mxu0 %v4323_v51  ;;  %3108 = vmatpush1.bf16.msra.mxu1 %v4325_v52 }
 0x2d8   :  { %3078 = vmatprep.subr.bf16.mxu0 %v4329_v58  ;;  %3110 = vmatprep.subr.bf16.mxu1 %v4331_v63 }
 0x2db   :  { %3080 = vmatpush1.bf16.msra.mxu0 %v4335_v8  ;;  %3112 = vmatpush1.bf16.msra.mxu1 %v4337_v9 }
 0x2dc   :  { %3114 = vmatprep.subr.bf16.mxu0 %v4234_v56  ;;  %3146 = vmatprep.subr.bf16.mxu1 %v4236_v59 }
 0x2de   :  { %1154 = vmatmul.mubr.f32.vlgmr.msra.gmra.mrb[8].mxu0 %v1083_v13  ;;  %1225 = vmatmul.mubr.f32.vlgmr.msra.gmra.mrb[16].mxu1 %v1083_v13 }
 0x2df   :  { %3116 = vmatpush1.bf16.msra.mxu0 %v4249_v57  ;;  %3148 = vmatpush1.bf16.msra.mxu1 %v4251_v61 }
 0x2e0   :  { %3118 = vmatprep.subr.bf16.mxu0 %v4253_v35  ;;  %3150 = vmatprep.subr.bf16.mxu1 %v4255_v36 }
 0x2e1   :  { %1327 = vmatprep.mubr.f32.mxu0 %v3963_v0  ;;  %1398 = vmatprep.mubr.f32.mxu1 %v3963_v0 }
 0x2e3   :  { %3120 = vmatpush1.bf16.msra.mxu0 %v4259_v38  ;;  %3152 = vmatpush1.bf16.msra.mxu1 %v4261_v23 }
 0x2e4   :  { %3122 = vmatprep.subr.bf16.mxu0 %v4265_v41  ;;  %3154 = vmatprep.subr.bf16.mxu1 %v4267_v42 }
 0x2e7   :  { %3124 = vmatpush1.bf16.msra.mxu0 %v4273_v49  ;;  %3156 = vmatpush1.bf16.msra.mxu1 %v4275_v50 }
 0x2e8   :  { %3126 = vmatprep.subr.bf16.mxu0 %v4279_v53  ;;  %3158 = vmatprep.subr.bf16.mxu1 %v4281_v54 }
 0x2eb   :  { %3128 = vmatpush1.bf16.msra.mxu0 %v4287_v5  ;;  %3160 = vmatpush1.bf16.msra.mxu1 %v4289_v6 }
 0x2ec   :  { %3130 = vmatprep.subr.bf16.mxu0 %v4293_v11  ;;  %3162 = vmatprep.subr.bf16.mxu1 %v4295_v12 }
 0x2ef   :  { %3132 = vmatpush1.bf16.msra.mxu0 %v4299_v21  ;;  %3164 = vmatpush1.bf16.msra.mxu1 %v4301_v24 }
 0x2f0   :  { %3134 = vmatprep.subr.bf16.mxu0 %v4305_v27  ;;  %3166 = vmatprep.subr.bf16.mxu1 %v4307_v28 }
 0x2f3   :  { %3136 = vmatpush1.bf16.msra.mxu0 %v4311_v37  ;;  %3168 = vmatpush1.bf16.msra.mxu1 %v4313_v19 }
 0x2f4   :  { %3138 = vmatprep.subr.bf16.mxu0 %v4317_v39  ;;  %3170 = vmatprep.subr.bf16.mxu1 %v4319_v40 }
 0x2f7   :  { %3140 = vmatpush1.bf16.msra.mxu0 %v4323_v51  ;;  %3172 = vmatpush1.bf16.msra.mxu1 %v4325_v52 }
 0x2f8   :  { %3142 = vmatprep.subr.bf16.mxu0 %v4329_v58  ;;  %3174 = vmatprep.subr.bf16.mxu1 %v4331_v63 }
 0x2fb   :  { %3144 = vmatpush1.bf16.msra.mxu0 %v4335_v8  ;;  %3176 = vmatpush1.bf16.msra.mxu1 %v4337_v9 }
 0x2fc   :  { %3178 = vmatprep.subr.bf16.mxu0 %v4234_v56  ;;  %3210 = vmatprep.subr.bf16.mxu1 %v4236_v59 }
 0x391   :  { %v923_v25 = vpop.f32.mrb[4].mxu0  ;;  %v1000_v26 = vpop.f32.mrb[12].mxu1 }
 0x392   :  { %v924_v29 = vadd.f32 %v923_v25, %v840_v15  ;;  %v1001_v30 = vadd.f32 %v1000_v26, %v848_v16  ;;  %v925_v31 = vpop.f32.mrb[5].mxu0  ;;  %v1002_v32 = vpop.f32.mrb[13].mxu1 }
 0x393   :  { %v926_v33 = vadd.f32 %v925_v31, %v844_v17  ;;  %v1003_v34 = vadd.f32 %v1002_v32, %v852_v18 }
 0x394   :  { %1011 = vst [vmem:[#allocation2] sm:$0xff] %v924_v29  ;;  %1013 = vst [vmem:[#allocation2 + $0x10] sm:$0xff] %v1001_v30 }
 0x395   :  { %1012 = vst [vmem:[#allocation2 + $0x8] sm:$0xff] %v926_v33  ;;  %1014 = vst [vmem:[#allocation2 + $0x18] sm:$0xff] %v1003_v34  ;;  %v929_v20 = vpop.f32.mrb[6].mxu0  ;;  %v1006_v62 = vpop.f32.mrb[14].mxu1  ;;  %v1084_v34 = vld [vmem:[%s4678_s15] sm:$0x3] }
 0x396   :  { %v930_v22 = vadd.f32 %v929_v20, %v840_v15  ;;  %v1007_v7 = vadd.f32 %v1006_v62, %v848_v16  ;;  %v931_v43 = vpop.f32.mrb[7].mxu0  ;;  %v1008_v1 = vpop.f32.mrb[15].mxu1 }
 0x397   :  { %v932_v44 = vadd.f32 %v931_v43, %v844_v17  ;;  %v1009_v10 = vadd.f32 %v1008_v1, %v852_v18 }
 0x398   :  { %1015 = vst [vmem:[#allocation2 + $0x20] sm:$0xff] %v930_v22  ;;  %1017 = vst [vmem:[#allocation2 + $0x30] sm:$0xff] %v1007_v7 }
 0x399   :  { %1016 = vst [vmem:[#allocation2 + $0x28] sm:$0xff] %v932_v44  ;;  %1018 = vst [vmem:[#allocation2 + $0x38] sm:$0xff] %v1009_v10 }
 0x39b   :  { %v1085_v45 = vld [vmem:[#allocation2] sm:$0x3]  ;;  %v1087_v17 = vld [vmem:[#allocation2 + $0x10] sm:$0x3] }
 0x39c   :  { %v1086_v55 = vld [vmem:[#allocation2 + $0x8] sm:$0x3]  ;;  %v1088_v15 = vld [vmem:[#allocation2 + $0x18] sm:$0x3] }
 0x3b1   :  { %v1155_v46 = vpop.f32.mrb[8].mxu0  ;;  %v1226_v47 = vpop.f32.mrb[16].mxu1 }
 0x3b2   :  { %v1231_v48 = vadd.f32 %v1155_v46, %v1085_v45  ;;  %v1157_v2 = vpop.f32.mrb[9].mxu0  ;;  %v1228_v3 = vpop.f32.mrb[17].mxu1  ;;  %v1233_v25 = vadd.f32 %v1226_v47, %v1087_v17 }
 0x3b3   :  { %v1232_v4 = vadd.f32 %v1157_v2, %v1086_v55  ;;  %v1234_v16 = vadd.f32 %v1228_v3, %v1088_v15  ;;  %v1259_v3 = vld [vmem:[#allocation2] sm:$0xc] }
 0x3b4   :  { %v2752_v13 = vmul.f32 -1.442695, %v1231_v48 }
 0x3b5   :  { %v2753_v14 = vmul.f32 -1.442695, %v1232_v4  ;;  %v2754_v18 = vmul.f32 -1.442695, %v1234_v16 }
 0x3b6   :  { %3611 = vpow2.f32 %v2752_v13 }
 0x3b7   :  { %3613 = vpow2.f32 %v2753_v14  ;;  %v1260_v14 = vld [vmem:[#allocation2 + $0x8] sm:$0xc] }
 0x3b8   :  { %3615 = vpow2.f32 %v2754_v18 }
 0x3b9   :  { %3617 = vtanh.f32 %v1233_v25  ;;  %v1262_v25 = vld [vmem:[#allocation2 + $0x18] sm:$0xc] }
 0x3c0   :  { %v3612_v26 = vpop.eup %3611 }
 0x3c1   :  { %v3614_v29 = vpop.eup %3613  ;;  %v1238_v30 = vadd.f32 1.0, %v3612_v26 }
 0x3c2   :  { %v1244_v31 = vadd.f32 1.0, %v3614_v29  ;;  %v3616_v32 = vpop.eup %3615 }
 0x3c3   :  { %3619 = vrcp.f32 %v1238_v30  ;;  %v3618_v33 = vpop.eup %3617  ;;  %v1251_v7 = vadd.f32 1.0, %v3616_v32  ;;  %v1261_v30 = vld [vmem:[#allocation2 + $0x10] sm:$0xc] }
 0x3c4   :  { %3621 = vrcp.f32 %v1244_v31 }
 0x3c5   :  { %3623 = vrcp.f32 %v1251_v7 }
 0x3cd   :  { %v3620_v20 = vpop.eup %3619 }
 0x3ce   :  { %v3622_v62 = vpop.eup %3621  ;;  %v1255_v22 = vmul.f32 %v3620_v20, %v3618_v33 }
 0x3cf   :  { %v1254_v43 = vmul.f32 %v3622_v62, %v1084_v34  ;;  %v3624_v44 = vpop.eup %3623 }
 0x3d1   :  { %v4392_v1 = vadd.f32 %v1255_v22, %v1254_v43 }
 0x3d3   :  { %3625 = vtanh.f32 %v4392_v1 }
 0x3dd   :  { %v3626_v10 = vpop.eup %3625 }
 0x3de   :  { %v1258_v45 = vmul.f32 %v3626_v10, %v3624_v44  ;;  %v1441_v44 = vrot.slane %v4392_v1, 6 }
 0x3e0   :  { %1328 = vmatmul.mubr.f32.vlgmr.msra.gmra.mrb[10].mxu0 %v1258_v45  ;;  %1399 = vmatmul.mubr.f32.vlgmr.msra.gmra.mrb[18].mxu1 %v1258_v45 }
 0x3e1   :  { %3180 = vmatpush1.bf16.msra.mxu0 %v4249_v57  ;;  %3212 = vmatpush1.bf16.msra.mxu1 %v4251_v61 }
 0x3e2   :  { %3182 = vmatprep.subr.bf16.mxu0 %v4253_v35  ;;  %3214 = vmatprep.subr.bf16.mxu1 %v4255_v36 }
 0x3e3   :  { %1519 = vmatprep.mubr.f32.mxu0 %v3963_v0  ;;  %1590 = vmatprep.mubr.f32.mxu1 %v3963_v0 }
 0x3e5   :  { %3184 = vmatpush1.bf16.msra.mxu0 %v4259_v38  ;;  %3216 = vmatpush1.bf16.msra.mxu1 %v4261_v23 }
 0x3e6   :  { %3186 = vmatprep.subr.bf16.mxu0 %v4265_v41  ;;  %3218 = vmatprep.subr.bf16.mxu1 %v4267_v42 }
 0x3e9   :  { %3188 = vmatpush1.bf16.msra.mxu0 %v4273_v49  ;;  %3220 = vmatpush1.bf16.msra.mxu1 %v4275_v50 }
 0x3ea   :  { %3190 = vmatprep.subr.bf16.mxu0 %v4279_v53  ;;  %3222 = vmatprep.subr.bf16.mxu1 %v4281_v54 }
 0x3ed   :  { %3192 = vmatpush1.bf16.msra.mxu0 %v4287_v5  ;;  %3224 = vmatpush1.bf16.msra.mxu1 %v4289_v6 }
 0x3ee   :  { %3194 = vmatprep.subr.bf16.mxu0 %v4293_v11  ;;  %3226 = vmatprep.subr.bf16.mxu1 %v4295_v12 }
 0x3f1   :  { %3196 = vmatpush1.bf16.msra.mxu0 %v4299_v21  ;;  %3228 = vmatpush1.bf16.msra.mxu1 %v4301_v24 }
 0x3f2   :  { %3198 = vmatprep.subr.bf16.mxu0 %v4305_v27  ;;  %3230 = vmatprep.subr.bf16.mxu1 %v4307_v28 }
 0x3f5   :  { %3200 = vmatpush1.bf16.msra.mxu0 %v4311_v37  ;;  %3232 = vmatpush1.bf16.msra.mxu1 %v4313_v19 }
 0x3f6   :  { %3202 = vmatprep.subr.bf16.mxu0 %v4317_v39  ;;  %3234 = vmatprep.subr.bf16.mxu1 %v4319_v40 }
 0x3f9   :  { %3204 = vmatpush1.bf16.msra.mxu0 %v4323_v51  ;;  %3236 = vmatpush1.bf16.msra.mxu1 %v4325_v52 }
 0x3fa   :  { %3206 = vmatprep.subr.bf16.mxu0 %v4329_v58  ;;  %3238 = vmatprep.subr.bf16.mxu1 %v4331_v63 }
 0x3fd   :  { %3208 = vmatpush1.bf16.msra.mxu0 %v4335_v8  ;;  %3240 = vmatpush1.bf16.msra.mxu1 %v4337_v9 }
 0x3fe   :  { %3242 = vmatprep.subr.bf16.mxu0 %v4234_v56  ;;  %3274 = vmatprep.subr.bf16.mxu1 %v4236_v59 }
 0x4b3   :  { %v1329_v46 = vpop.f32.mrb[10].mxu0  ;;  %v1400_v47 = vpop.f32.mrb[18].mxu1 }
 0x4b4   :  { %v1409_v48 = vrot.slane %v1329_v46, 6  ;;  %v1331_v55 = vpop.f32.mrb[11].mxu0  ;;  %v1402_v2 = vpop.f32.mrb[19].mxu1  ;;  %v1411_v29 = vrot.slane %v1400_v47, 6 }
 0x4b5   :  { %v1410_v4 = vrot.slane %v1331_v55, 6  ;;  %v1412_v18 = vrot.slane %v1402_v2, 6 }
 0x4b6   :  { %v1417_v13 = vadd.f32 %v1409_v48, %v1259_v3  ;;  %v1419_v32 = vadd.f32 %v1411_v29, %v1261_v30 }
 0x4b7   :  { %v1418_v15 = vadd.f32 %v1410_v4, %v1260_v14  ;;  %v1420_v26 = vadd.f32 %v1412_v18, %v1262_v25 }
 0x4b8   :  { %v2755_v16 = vmul.f32 -1.442695, %v1417_v13 }
 0x4b9   :  { %v2756_v17 = vmul.f32 -1.442695, %v1418_v15  ;;  %v2757_v31 = vmul.f32 -1.442695, %v1420_v26  ;;  %v1449_v26 = vld [vmem:[#allocation2 + $0x8] sm:$0x30] }
 0x4ba   :  { %3627 = vpow2.f32 %v2755_v16 }
 0x4bb   :  { %3629 = vpow2.f32 %v2756_v17  ;;  %v1448_v17 = vld [vmem:[#allocation2] sm:$0x30] }
 0x4bc   :  { %3631 = vpow2.f32 %v2757_v31 }
 0x4bd   :  { %3633 = vtanh.f32 %v1419_v32 }
 0x4c4   :  { %v3628_v33 = vpop.eup %3627 }
 0x4c5   :  { %v3630_v34 = vpop.eup %3629  ;;  %v1424_v20 = vadd.f32 1.0, %v3628_v33  ;;  %v1451_v33 = vld [vmem:[#allocation2 + $0x18] sm:$0x30] }
 0x4c6   :  { %v1430_v62 = vadd.f32 1.0, %v3630_v34  ;;  %v3632_v22 = vpop.eup %3631 }
 0x4c7   :  { %3635 = vrcp.f32 %v1424_v20  ;;  %v3634_v7 = vpop.eup %3633  ;;  %v1437_v46 = vadd.f32 1.0, %v3632_v22 }
 0x4c8   :  { %3637 = vrcp.f32 %v1430_v62  ;;  %v1450_v62 = vld [vmem:[#allocation2 + $0x10] sm:$0x30] }
 0x4c9   :  { %3639 = vrcp.f32 %v1437_v46 }
 0x4d1   :  { %v3636_v43 = vpop.eup %3635 }
 0x4d2   :  { %v3638_v10 = vpop.eup %3637  ;;  %v1444_v45 = vmul.f32 %v3636_v43, %v3634_v7 }
 0x4d3   :  { %v1443_v47 = vmul.f32 %v3638_v10, %v1441_v44  ;;  %v3640_v55 = vpop.eup %3639 }
 0x4d5   :  { %v4430_v48 = vadd.f32 %v1444_v45, %v1443_v47 }
 0x4d7   :  { %3641 = vtanh.f32 %v4430_v48 }
 0x4e1   :  { %v3642_v2 = vpop.eup %3641 }
 0x4e2   :  { %v1447_v3 = vmul.f32 %v3642_v2, %v3640_v55  ;;  %v1633_v2 = vrot.slane %v4430_v48, 6 }
 0x4e4   :  { %v1453_v4 = vrot.slane %v1447_v3, 2 }
 0x4e6   :  { %1520 = vmatmul.mubr.f32.vlgmr.msra.gmra.mrb[12].mxu0 %v1453_v4  ;;  %1591 = vmatmul.mubr.f32.vlgmr.msra.gmra.mrb[20].mxu1 %v1453_v4 }
 0x4e7   :  { %3244 = vmatpush1.bf16.msra.mxu0 %v4249_v57  ;;  %3276 = vmatpush1.bf16.msra.mxu1 %v4251_v61 }
 0x4e8   :  { %3246 = vmatprep.subr.bf16.mxu0 %v4253_v35  ;;  %3278 = vmatprep.subr.bf16.mxu1 %v4255_v36 }
 0x4e9   :  { %1711 = vmatprep.mubr.f32.mxu0 %v3963_v0  ;;  %1782 = vmatprep.mubr.f32.mxu1 %v3963_v0 }
 0x4eb   :  { %3248 = vmatpush1.bf16.msra.mxu0 %v4259_v38  ;;  %3280 = vmatpush1.bf16.msra.mxu1 %v4261_v23 }
 0x4ec   :  { %3250 = vmatprep.subr.bf16.mxu0 %v4265_v41  ;;  %3282 = vmatprep.subr.bf16.mxu1 %v4267_v42 }
 0x4ef   :  { %3252 = vmatpush1.bf16.msra.mxu0 %v4273_v49  ;;  %3284 = vmatpush1.bf16.msra.mxu1 %v4275_v50 }
 0x4f0   :  { %3254 = vmatprep.subr.bf16.mxu0 %v4279_v53  ;;  %3286 = vmatprep.subr.bf16.mxu1 %v4281_v54 }
 0x4f3   :  { %3256 = vmatpush1.bf16.msra.mxu0 %v4287_v5  ;;  %3288 = vmatpush1.bf16.msra.mxu1 %v4289_v6 }
 0x4f4   :  { %3258 = vmatprep.subr.bf16.mxu0 %v4293_v11  ;;  %3290 = vmatprep.subr.bf16.mxu1 %v4295_v12 }
 0x4f7   :  { %3260 = vmatpush1.bf16.msra.mxu0 %v4299_v21  ;;  %3292 = vmatpush1.bf16.msra.mxu1 %v4301_v24 }
 0x4f8   :  { %3262 = vmatprep.subr.bf16.mxu0 %v4305_v27  ;;  %3294 = vmatprep.subr.bf16.mxu1 %v4307_v28 }
 0x4fb   :  { %3264 = vmatpush1.bf16.msra.mxu0 %v4311_v37  ;;  %3296 = vmatpush1.bf16.msra.mxu1 %v4313_v19 }
 0x4fc   :  { %3266 = vmatprep.subr.bf16.mxu0 %v4317_v39  ;;  %3298 = vmatprep.subr.bf16.mxu1 %v4319_v40 }
 0x4ff   :  { %3268 = vmatpush1.bf16.msra.mxu0 %v4323_v51  ;;  %3300 = vmatpush1.bf16.msra.mxu1 %v4325_v52 }
 0x500   :  { %3270 = vmatprep.subr.bf16.mxu0 %v4329_v58  ;;  %3302 = vmatprep.subr.bf16.mxu1 %v4331_v63 }
 0x503   :  { %3272 = vmatpush1.bf16.msra.mxu0 %v4335_v8  ;;  %3304 = vmatpush1.bf16.msra.mxu1 %v4337_v9 }
 0x504   :  { %3306 = vmatprep.subr.bf16.mxu0 %v4234_v56  ;;  %3338 = vmatprep.subr.bf16.mxu1 %v4236_v59 }
 0x5b9   :  { %v1521_v1 = vpop.f32.mrb[12].mxu0  ;;  %v1592_v13 = vpop.f32.mrb[20].mxu1 }
 0x5ba   :  { %v1601_v14 = vrot.slane %v1521_v1, 4  ;;  %v1523_v15 = vpop.f32.mrb[13].mxu0  ;;  %v1594_v16 = vpop.f32.mrb[21].mxu1  ;;  %v1603_v20 = vrot.slane %v1592_v13, 4 }
 0x5bb   :  { %v1602_v18 = vrot.slane %v1523_v15, 4  ;;  %v1604_v32 = vrot.slane %v1594_v16, 4 }
 0x5bc   :  { %v1609_v25 = vadd.f32 %v1601_v14, %v1448_v17  ;;  %v1611_v7 = vadd.f32 %v1603_v20, %v1450_v62 }
 0x5bd   :  { %v1610_v29 = vadd.f32 %v1602_v18, %v1449_v26  ;;  %v1612_v34 = vadd.f32 %v1604_v32, %v1451_v33 }
 0x5be   :  { %v2758_v30 = vmul.f32 -1.442695, %v1609_v25 }
 0x5bf   :  { %v2759_v31 = vmul.f32 -1.442695, %v1610_v29  ;;  %v2760_v22 = vmul.f32 -1.442695, %v1612_v34  ;;  %v1641_v34 = vld [vmem:[#allocation2 + $0x8] sm:$0xc0] }
 0x5c0   :  { %3643 = vpow2.f32 %v2758_v30 }
 0x5c1   :  { %3645 = vpow2.f32 %v2759_v31  ;;  %v1640_v31 = vld [vmem:[#allocation2] sm:$0xc0] }
 0x5c2   :  { %3647 = vpow2.f32 %v2760_v22 }
 0x5c3   :  { %3649 = vtanh.f32 %v1611_v7 }
 0x5ca   :  { %v3644_v43 = vpop.eup %3643 }
 0x5cb   :  { %v3646_v44 = vpop.eup %3645  ;;  %v1616_v10 = vadd.f32 1.0, %v3644_v43  ;;  %v1643_v43 = vld [vmem:[#allocation2 + $0x18] sm:$0xc0] }
 0x5cc   :  { %v1622_v45 = vadd.f32 1.0, %v3646_v44  ;;  %v3648_v46 = vpop.eup %3647 }
 0x5cd   :  { %3651 = vrcp.f32 %v1616_v10  ;;  %v3650_v47 = vpop.eup %3649  ;;  %v1629_v1 = vadd.f32 1.0, %v3648_v46 }
 0x5ce   :  { %3653 = vrcp.f32 %v1622_v45  ;;  %v1642_v45 = vld [vmem:[#allocation2 + $0x10] sm:$0xc0] }
 0x5cf   :  { %3655 = vrcp.f32 %v1629_v1 }
 0x5d7   :  { %v3652_v55 = vpop.eup %3651 }
 0x5d8   :  { %v3654_v3 = vpop.eup %3653  ;;  %v1636_v4 = vmul.f32 %v3652_v55, %v3650_v47 }
 0x5d9   :  { %v1635_v13 = vmul.f32 %v3654_v3, %v1633_v2  ;;  %v3656_v15 = vpop.eup %3655 }
 0x5db   :  { %v4468_v14 = vadd.f32 %v1636_v4, %v1635_v13 }
 0x5dd   :  { %3657 = vtanh.f32 %v4468_v14 }
 0x5e7   :  { %v3658_v16 = vpop.eup %3657 }
 0x5e8   :  { %v1639_v17 = vmul.f32 %v3658_v16, %v3656_v15  ;;  %v1825_v16 = vrot.slane %v4468_v14, 6  ;;  %v1832_v14 = vld [vmem:[#allocation2 + $0x20] sm:$0x3] }
 0x5ea   :  { %v1645_v18 = vrot.slane %v1639_v17, 4 }
 0x5ec   :  { %1712 = vmatmul.mubr.f32.vlgmr.msra.gmra.mrb[14].mxu0 %v1645_v18  ;;  %1783 = vmatmul.mubr.f32.vlgmr.msra.gmra.mrb[22].mxu1 %v1645_v18 }
 0x5ed   :  { %3308 = vmatpush1.bf16.msra.mxu0 %v4249_v57  ;;  %3340 = vmatpush1.bf16.msra.mxu1 %v4251_v61 }
 0x5ee   :  { %3310 = vmatprep.subr.bf16.mxu0 %v4253_v35  ;;  %3342 = vmatprep.subr.bf16.mxu1 %v4255_v36 }
 0x5ef   :  { %1903 = vmatprep.mubr.f32.mxu0 %v3963_v0  ;;  %1974 = vmatprep.mubr.f32.mxu1 %v3963_v0 }
 0x5f1   :  { %3312 = vmatpush1.bf16.msra.mxu0 %v4259_v38  ;;  %3344 = vmatpush1.bf16.msra.mxu1 %v4261_v23 }
 0x5f2   :  { %3314 = vmatprep.subr.bf16.mxu0 %v4265_v41  ;;  %3346 = vmatprep.subr.bf16.mxu1 %v4267_v42 }
 0x5f5   :  { %3316 = vmatpush1.bf16.msra.mxu0 %v4273_v49  ;;  %3348 = vmatpush1.bf16.msra.mxu1 %v4275_v50 }
 0x5f6   :  { %3318 = vmatprep.subr.bf16.mxu0 %v4279_v53  ;;  %3350 = vmatprep.subr.bf16.mxu1 %v4281_v54 }
 0x5f9   :  { %3320 = vmatpush1.bf16.msra.mxu0 %v4287_v5  ;;  %3352 = vmatpush1.bf16.msra.mxu1 %v4289_v6 }
 0x5fa   :  { %3322 = vmatprep.subr.bf16.mxu0 %v4293_v11  ;;  %3354 = vmatprep.subr.bf16.mxu1 %v4295_v12 }
 0x5fd   :  { %3324 = vmatpush1.bf16.msra.mxu0 %v4299_v21  ;;  %3356 = vmatpush1.bf16.msra.mxu1 %v4301_v24 }
 0x5fe   :  { %3326 = vmatprep.subr.bf16.mxu0 %v4305_v27  ;;  %3358 = vmatprep.subr.bf16.mxu1 %v4307_v28 }
 0x601   :  { %3328 = vmatpush1.bf16.msra.mxu0 %v4311_v37  ;;  %3360 = vmatpush1.bf16.msra.mxu1 %v4313_v19 }
 0x602   :  { %3330 = vmatprep.subr.bf16.mxu0 %v4317_v39  ;;  %3362 = vmatprep.subr.bf16.mxu1 %v4319_v40 }
 0x605   :  { %3332 = vmatpush1.bf16.msra.mxu0 %v4323_v51  ;;  %3364 = vmatpush1.bf16.msra.mxu1 %v4325_v52 }
 0x606   :  { %3334 = vmatprep.subr.bf16.mxu0 %v4329_v58  ;;  %3366 = vmatprep.subr.bf16.mxu1 %v4331_v63 }
 0x609   :  { %3336 = vmatpush1.bf16.msra.mxu0 %v4335_v8  ;;  %3368 = vmatpush1.bf16.msra.mxu1 %v4337_v9 }
 0x60a   :  { %3370 = vmatprep.subr.bf16.mxu0 %v4234_v56  ;;  %3402 = vmatprep.subr.bf16.mxu1 %v4236_v59 }
 0x6bf   :  { %v1713_v48 = vpop.f32.mrb[14].mxu0  ;;  %v1784_v25 = vpop.f32.mrb[22].mxu1 }
 0x6c0   :  { %v1793_v26 = vrot.slane %v1713_v48, 2  ;;  %v1715_v29 = vpop.f32.mrb[15].mxu0  ;;  %v1786_v30 = vpop.f32.mrb[23].mxu1  ;;  %v1795_v10 = vrot.slane %v1784_v25, 2 }
 0x6c1   :  { %v1794_v32 = vrot.slane %v1715_v29, 2  ;;  %v1796_v7 = vrot.slane %v1786_v30, 2 }
 0x6c2   :  { %v1801_v33 = vadd.f32 %v1793_v26, %v1640_v31  ;;  %v1803_v47 = vadd.f32 %v1795_v10, %v1642_v45  ;;  %v1835_v45 = vld [vmem:[#allocation2 + $0x38] sm:$0x3] }
 0x6c3   :  { %v1802_v20 = vadd.f32 %v1794_v32, %v1641_v34  ;;  %v1804_v44 = vadd.f32 %v1796_v7, %v1643_v43 }
 0x6c4   :  { %v2761_v62 = vmul.f32 -1.442695, %v1801_v33 }
 0x6c5   :  { %v2762_v22 = vmul.f32 -1.442695, %v1802_v20  ;;  %v2763_v46 = vmul.f32 -1.442695, %v1804_v44 }
 0x6c6   :  { %3659 = vpow2.f32 %v2761_v62  ;;  %v1833_v62 = vld [vmem:[#allocation2 + $0x28] sm:$0x3] }
 0x6c7   :  { %3661 = vpow2.f32 %v2762_v22 }
 0x6c8   :  { %3663 = vpow2.f32 %v2763_v46 }
 0x6c9   :  { %3665 = vtanh.f32 %v1803_v47  ;;  %v1834_v47 = vld [vmem:[#allocation2 + $0x30] sm:$0x3] }
 0x6d0   :  { %v3660_v55 = vpop.eup %3659 }
 0x6d1   :  { %v3662_v2 = vpop.eup %3661  ;;  %v1808_v3 = vadd.f32 1.0, %v3660_v55 }
 0x6d2   :  { %v1814_v4 = vadd.f32 1.0, %v3662_v2  ;;  %v3664_v1 = vpop.eup %3663 }
 0x6d3   :  { %3667 = vrcp.f32 %v1808_v3  ;;  %v3666_v13 = vpop.eup %3665  ;;  %v1821_v48 = vadd.f32 1.0, %v3664_v1 }
 0x6d4   :  { %3669 = vrcp.f32 %v1814_v4 }
 0x6d5   :  { %3671 = vrcp.f32 %v1821_v48 }
 0x6dd   :  { %v3668_v15 = vpop.eup %3667 }
 0x6de   :  { %v3670_v17 = vpop.eup %3669  ;;  %v1828_v18 = vmul.f32 %v3668_v15, %v3666_v13 }
 0x6df   :  { %v1827_v25 = vmul.f32 %v3670_v17, %v1825_v16  ;;  %v3672_v29 = vpop.eup %3671 }
 0x6e1   :  { %v4506_v26 = vadd.f32 %v1828_v18, %v1827_v25 }
 0x6e3   :  { %3673 = vtanh.f32 %v4506_v26  ;;  %v2005_v18 = vrot.slane %v4506_v26, 6 }
 0x6ed   :  { %v3674_v30 = vpop.eup %3673 }
 0x6ee   :  { %v1831_v31 = vmul.f32 %v3674_v30, %v3672_v29 }
 0x6f0   :  { %v1837_v32 = vrot.slane %v1831_v31, 6 }
 0x6f2   :  { %1904 = vmatmul.mubr.f32.vlgmr.msra.gmra.mrb[16].mxu0 %v1837_v32  ;;  %1975 = vmatmul.mubr.f32.vlgmr.msra.gmra.mrb[24].mxu1 %v1837_v32 }
 0x6f3   :  { %3372 = vmatpush1.bf16.msra.mxu0 %v4249_v57  ;;  %3404 = vmatpush1.bf16.msra.mxu1 %v4251_v61 }
 0x6f4   :  { %3374 = vmatprep.subr.bf16.mxu0 %v4253_v35  ;;  %3406 = vmatprep.subr.bf16.mxu1 %v4255_v36 }
 0x6f5   :  { %2080 = vmatprep.mubr.f32.mxu0 %v3963_v0  ;;  %2151 = vmatprep.mubr.f32.mxu1 %v3963_v0 }
 0x6f7   :  { %3376 = vmatpush1.bf16.msra.mxu0 %v4259_v38  ;;  %3408 = vmatpush1.bf16.msra.mxu1 %v4261_v23 }
 0x6f8   :  { %3378 = vmatprep.subr.bf16.mxu0 %v4265_v41  ;;  %3410 = vmatprep.subr.bf16.mxu1 %v4267_v42 }
 0x6fb   :  { %3380 = vmatpush1.bf16.msra.mxu0 %v4273_v49  ;;  %3412 = vmatpush1.bf16.msra.mxu1 %v4275_v50 }
 0x6fc   :  { %3382 = vmatprep.subr.bf16.mxu0 %v4279_v53  ;;  %3414 = vmatprep.subr.bf16.mxu1 %v4281_v54 }
 0x6ff   :  { %3384 = vmatpush1.bf16.msra.mxu0 %v4287_v5  ;;  %3416 = vmatpush1.bf16.msra.mxu1 %v4289_v6 }
 0x700   :  { %3386 = vmatprep.subr.bf16.mxu0 %v4293_v11  ;;  %3418 = vmatprep.subr.bf16.mxu1 %v4295_v12 }
 0x703   :  { %3388 = vmatpush1.bf16.msra.mxu0 %v4299_v21  ;;  %3420 = vmatpush1.bf16.msra.mxu1 %v4301_v24 }
 0x704   :  { %3390 = vmatprep.subr.bf16.mxu0 %v4305_v27  ;;  %3422 = vmatprep.subr.bf16.mxu1 %v4307_v28 }
 0x707   :  { %3392 = vmatpush1.bf16.msra.mxu0 %v4311_v37  ;;  %3424 = vmatpush1.bf16.msra.mxu1 %v4313_v19 }
 0x708   :  { %3394 = vmatprep.subr.bf16.mxu0 %v4317_v39  ;;  %3426 = vmatprep.subr.bf16.mxu1 %v4319_v40 }
 0x70b   :  { %3396 = vmatpush1.bf16.msra.mxu0 %v4323_v51  ;;  %3428 = vmatpush1.bf16.msra.mxu1 %v4325_v52 }
 0x70c   :  { %3398 = vmatprep.subr.bf16.mxu0 %v4329_v58  ;;  %3430 = vmatprep.subr.bf16.mxu1 %v4331_v63 }
 0x70f   :  { %3400 = vmatpush1.bf16.msra.mxu0 %v4335_v8  ;;  %3432 = vmatpush1.bf16.msra.mxu1 %v4337_v9 }
 0x710   :  { %3434 = vmatprep.subr.bf16.mxu0 %v4234_v56  ;;  %3466 = vmatprep.subr.bf16.mxu1 %v4236_v59 }
 0x7c5   :  { %v1905_v33 = vpop.f32.mrb[16].mxu0  ;;  %v1976_v34 = vpop.f32.mrb[24].mxu1 }
 0x7c6   :  { %v1981_v20 = vadd.f32 %v1905_v33, %v1832_v14  ;;  %v1907_v22 = vpop.f32.mrb[17].mxu0  ;;  %v1978_v7 = vpop.f32.mrb[25].mxu1  ;;  %v1983_v2 = vadd.f32 %v1976_v34, %v1834_v47 }
 0x7c7   :  { %v1982_v43 = vadd.f32 %v1907_v22, %v1833_v62  ;;  %v1984_v46 = vadd.f32 %v1978_v7, %v1835_v45  ;;  %v2012_v7 = vld [vmem:[#allocation2 + $0x20] sm:$0xc] }
 0x7c8   :  { %v2764_v44 = vmul.f32 -1.442695, %v1981_v20 }
 0x7c9   :  { %v2765_v10 = vmul.f32 -1.442695, %v1982_v43  ;;  %v2766_v55 = vmul.f32 -1.442695, %v1984_v46 }
 0x7ca   :  { %3675 = vpow2.f32 %v2764_v44 }
 0x7cb   :  { %3677 = vpow2.f32 %v2765_v10  ;;  %v2013_v10 = vld [vmem:[#allocation2 + $0x28] sm:$0xc] }
 0x7cc   :  { %3679 = vpow2.f32 %v2766_v55 }
 0x7cd   :  { %3681 = vtanh.f32 %v1983_v2  ;;  %v2015_v2 = vld [vmem:[#allocation2 + $0x38] sm:$0xc] }
 0x7d4   :  { %v3676_v3 = vpop.eup %3675 }
 0x7d5   :  { %v3678_v4 = vpop.eup %3677  ;;  %v1988_v1 = vadd.f32 1.0, %v3676_v3 }
 0x7d6   :  { %v1994_v13 = vadd.f32 1.0, %v3678_v4  ;;  %v3680_v15 = vpop.eup %3679  ;;  %v2014_v4 = vld [vmem:[#allocation2 + $0x30] sm:$0xc] }
 0x7d7   :  { %3683 = vrcp.f32 %v1988_v1  ;;  %v3682_v16 = vpop.eup %3681  ;;  %v2001_v29 = vadd.f32 1.0, %v3680_v15 }
 0x7d8   :  { %3685 = vrcp.f32 %v1994_v13 }
 0x7d9   :  { %3687 = vrcp.f32 %v2001_v29 }
 0x7e1   :  { %v3684_v17 = vpop.eup %3683 }
 0x7e2   :  { %v3686_v48 = vpop.eup %3685  ;;  %v2008_v25 = vmul.f32 %v3684_v17, %v3682_v16 }
 0x7e3   :  { %v2007_v30 = vmul.f32 %v3686_v48, %v2005_v18  ;;  %v3688_v32 = vpop.eup %3687 }
 0x7e5   :  { %v4544_v31 = vadd.f32 %v2008_v25, %v2007_v30 }
 0x7e7   :  { %3689 = vtanh.f32 %v4544_v31  ;;  %v2194_v29 = vrot.slane %v4544_v31, 6 }
 0x7f1   :  { %v3690_v14 = vpop.eup %3689 }
 0x7f2   :  { %v2011_v33 = vmul.f32 %v3690_v14, %v3688_v32 }
 0x7f4   :  { %2081 = vmatmul.mubr.f32.vlgmr.msra.gmra.mrb[18].mxu0 %v2011_v33  ;;  %2152 = vmatmul.mubr.f32.vlgmr.msra.gmra.mrb[26].mxu1 %v2011_v33 }
 0x7f5   :  { %3436 = vmatpush1.bf16.msra.mxu0 %v4249_v57  ;;  %3468 = vmatpush1.bf16.msra.mxu1 %v4251_v61 }
 0x7f6   :  { %3438 = vmatprep.subr.bf16.mxu0 %v4253_v35  ;;  %3470 = vmatprep.subr.bf16.mxu1 %v4255_v36 }
 0x7f7   :  { %2272 = vmatprep.mubr.f32.mxu0 %v3963_v0  ;;  %2343 = vmatprep.mubr.f32.mxu1 %v3963_v0 }
 0x7f9   :  { %3440 = vmatpush1.bf16.msra.mxu0 %v4259_v38  ;;  %3472 = vmatpush1.bf16.msra.mxu1 %v4261_v23 }
 0x7fa   :  { %3442 = vmatprep.subr.bf16.mxu0 %v4265_v41  ;;  %3474 = vmatprep.subr.bf16.mxu1 %v4267_v42 }
 0x7fd   :  { %3444 = vmatpush1.bf16.msra.mxu0 %v4273_v49  ;;  %3476 = vmatpush1.bf16.msra.mxu1 %v4275_v50 }
 0x7fe   :  { %3446 = vmatprep.subr.bf16.mxu0 %v4279_v53  ;;  %3478 = vmatprep.subr.bf16.mxu1 %v4281_v54 }
 0x801   :  { %3448 = vmatpush1.bf16.msra.mxu0 %v4287_v5  ;;  %3480 = vmatpush1.bf16.msra.mxu1 %v4289_v6 }
 0x802   :  { %3450 = vmatprep.subr.bf16.mxu0 %v4293_v11  ;;  %3482 = vmatprep.subr.bf16.mxu1 %v4295_v12 }
 0x805   :  { %3452 = vmatpush1.bf16.msra.mxu0 %v4299_v21  ;;  %3484 = vmatpush1.bf16.msra.mxu1 %v4301_v24 }
 0x806   :  { %3454 = vmatprep.subr.bf16.mxu0 %v4305_v27  ;;  %3486 = vmatprep.subr.bf16.mxu1 %v4307_v28 }
 0x809   :  { %3456 = vmatpush1.bf16.msra.mxu0 %v4311_v37  ;;  %3488 = vmatpush1.bf16.msra.mxu1 %v4313_v19 }
 0x80a   :  { %3458 = vmatprep.subr.bf16.mxu0 %v4317_v39  ;;  %3490 = vmatprep.subr.bf16.mxu1 %v4319_v40 }
 0x80d   :  { %3460 = vmatpush1.bf16.msra.mxu0 %v4323_v51  ;;  %3492 = vmatpush1.bf16.msra.mxu1 %v4325_v52 }
 0x80e   :  { %3462 = vmatprep.subr.bf16.mxu0 %v4329_v58  ;;  %3494 = vmatprep.subr.bf16.mxu1 %v4331_v63 }
 0x811   :  { %3464 = vmatpush1.bf16.msra.mxu0 %v4335_v8  ;;  %3496 = vmatpush1.bf16.msra.mxu1 %v4337_v9 }
 0x812   :  { %3498 = vmatprep.subr.bf16.mxu0 %v4234_v56  ;;  %3530 = vmatprep.subr.bf16.mxu1 %v4236_v59 }
 0x8c7   :  { %v2082_v26 = vpop.f32.mrb[18].mxu0  ;;  %v2153_v34 = vpop.f32.mrb[26].mxu1 }
 0x8c8   :  { %v2162_v20 = vrot.slane %v2082_v26, 6  ;;  %v2084_v62 = vpop.f32.mrb[19].mxu0  ;;  %v2155_v22 = vpop.f32.mrb[27].mxu1  ;;  %v2164_v56 = vrot.slane %v2153_v34, 6 }
 0x8c9   :  { %v2163_v43 = vrot.slane %v2084_v62, 6  ;;  %v2165_v55 = vrot.slane %v2155_v22, 6 }
 0x8ca   :  { %v2170_v44 = vadd.f32 %v2162_v20, %v2012_v7  ;;  %v2172_v1 = vadd.f32 %v2164_v56, %v2014_v4  ;;  %v2590_v56 = vld [vmem:[#allocation12 + $0x18] sm:$0xff] }
 0x8cb   :  { %v2171_v45 = vadd.f32 %v2163_v43, %v2013_v10  ;;  %v2173_v3 = vadd.f32 %v2165_v55, %v2015_v2  ;;  %v3964_v2 = vmov 0.0|0.0  }
 0x8cc   :  { %v2767_v46 = vmul.f32 -1.442695, %v2170_v44 }
 0x8cd   :  { %v2768_v47 = vmul.f32 -1.442695, %v2171_v45  ;;  %v2769_v59 = vmul.f32 -1.442695, %v2173_v3  ;;  %v2589_v3 = vld [vmem:[#allocation12 + $0x10] sm:$0xff] }
 0x8ce   :  { %3691 = vpow2.f32 %v2767_v46  ;;  %v2587_v46 = vld [vmem:[#allocation12] sm:$0xff]  ;;  %v3565_v4 = vpack.c.bf16 %v2590_v56, %v2589_v3 }
 0x8cf   :  { %3693 = vpow2.f32 %v2768_v47  ;;  %v2588_v47 = vld [vmem:[#allocation12 + $0x8] sm:$0xff] }
 0x8d0   :  { %3695 = vpow2.f32 %v2769_v59  ;;  %v3562_v55 = vpack.c.bf16 %v2588_v47, %v2587_v46  ;;  %v2591_v59 = vld [vmem:[#allocation12 + $0x20] sm:$0xff] }
 0x8d1   :  { %3697 = vtanh.f32 %v2172_v1  ;;  %v2592_v1 = vld [vmem:[#allocation12 + $0x28] sm:$0xff] }
 0x8d8   :  { %v3692_v13 = vpop.eup %3691 }
 0x8d9   :  { %v3694_v15 = vpop.eup %3693  ;;  %v2177_v16 = vadd.f32 1.0, %v3692_v13  ;;  %v3568_v13 = vpack.c.bf16 %v2592_v1, %v2591_v59 }
 0x8da   :  { %v2183_v17 = vadd.f32 1.0, %v3694_v15  ;;  %v3696_v18 = vpop.eup %3695  ;;  %v2593_v15 = vld [vmem:[#allocation12 + $0x30] sm:$0xff] }
 0x8db   :  { %3699 = vrcp.f32 %v2177_v16  ;;  %v3698_v48 = vpop.eup %3697  ;;  %v2190_v14 = vadd.f32 1.0, %v3696_v18  ;;  %v2594_v16 = vld [vmem:[#allocation12 + $0x38] sm:$0xff]  ;;  %v2595_v18 = vld [vmem:[#allocation12 + $0x40] sm:$0xff] }
 0x8dc   :  { %3701 = vrcp.f32 %v2183_v17  ;;  %v3571_v17 = vpack.c.bf16 %v2594_v16, %v2593_v15 }
 0x8dd   :  { %3703 = vrcp.f32 %v2190_v14  ;;  %v2599_v14 = vld [vmem:[#allocation12 + $0x60] sm:$0xff] }
 0x8e5   :  { %v3700_v25 = vpop.eup %3699 }
 0x8e6   :  { %v3702_v30 = vpop.eup %3701  ;;  %v2197_v32 = vmul.f32 %v3700_v25, %v3698_v48  ;;  %v2596_v48 = vld [vmem:[#allocation12 + $0x48] sm:$0xff] }
 0x8e7   :  { %v2196_v33 = vmul.f32 %v3702_v30, %v2194_v29  ;;  %v3704_v34 = vpop.eup %3703  ;;  %v3574_v25 = vpack.c.bf16 %v2596_v48, %v2595_v18  ;;  %v2597_v29 = vld [vmem:[#allocation12 + $0x50] sm:$0xff]  ;;  %v2598_v30 = vld [vmem:[#allocation12 + $0x58] sm:$0xff] }
 0x8e9   :  { %v4582_v26 = vadd.f32 %v2197_v32, %v2196_v33  ;;  %v3577_v32 = vpack.c.bf16 %v2598_v30, %v2597_v29  ;;  %v2600_v33 = vld [vmem:[#allocation12 + $0x68] sm:$0xff] }
 0x8eb   :  { %3705 = vtanh.f32 %v4582_v26 }
 0x8f5   :  { %v3706_v20 = vpop.eup %3705 }
 0x8f6   :  { %v2200_v62 = vmul.f32 %v3706_v20, %v3704_v34  ;;  %v2601_v34 = vld [vmem:[#allocation12 + $0x70] sm:$0xff]  ;;  %v2602_v20 = vld [vmem:[#allocation12 + $0x78] sm:$0xff] }
 0x8f8   :  { %v2206_v22 = vrot.slane %v2200_v62, 2  ;;  %v3583_v62 = vpack.c.bf16 %v2602_v20, %v2601_v34 }
 0x8fa   :  { %2273 = vmatmul.mubr.f32.vlgmr.msra.gmra.mrb[20].mxu0 %v2206_v22  ;;  %2344 = vmatmul.mubr.f32.vlgmr.msra.gmra.mrb[28].mxu1 %v2206_v22 }
 0x8fb   :  { %3500 = vmatpush1.bf16.msra.mxu0 %v4249_v57  ;;  %3532 = vmatpush1.bf16.msra.mxu1 %v4251_v61 }
 0x8fc   :  { %3502 = vmatprep.subr.bf16.mxu0 %v4253_v35  ;;  %3534 = vmatprep.subr.bf16.mxu1 %v4255_v36 }
 0x8fd   :  { %2464 = vmatprep.mubr.f32.mxu0 %v3963_v0  ;;  %2535 = vmatprep.mubr.f32.mxu1 %v3963_v0 }
 0x8ff   :  { %3504 = vmatpush1.bf16.msra.mxu0 %v4259_v38  ;;  %3536 = vmatpush1.bf16.msra.mxu1 %v4261_v23  ;;  %v2201_v23 = vld [vmem:[#allocation2 + $0x20] sm:$0x30] }
 0x900   :  { %3506 = vmatprep.subr.bf16.mxu0 %v4265_v41  ;;  %3538 = vmatprep.subr.bf16.mxu1 %v4267_v42 }
 0x903   :  { %3508 = vmatpush1.bf16.msra.mxu0 %v4273_v49  ;;  %3540 = vmatpush1.bf16.msra.mxu1 %v4275_v50  ;;  %v2202_v49 = vld [vmem:[#allocation2 + $0x28] sm:$0x30] }
 0x904   :  { %3510 = vmatprep.subr.bf16.mxu0 %v4279_v53  ;;  %3542 = vmatprep.subr.bf16.mxu1 %v4281_v54 }
 0x907   :  { %3512 = vmatpush1.bf16.msra.mxu0 %v4287_v5  ;;  %3544 = vmatpush1.bf16.msra.mxu1 %v4289_v6  ;;  %v2204_v6 = vld [vmem:[#allocation2 + $0x38] sm:$0x30] }
 0x908   :  { %3514 = vmatprep.subr.bf16.mxu0 %v4293_v11  ;;  %3546 = vmatprep.subr.bf16.mxu1 %v4295_v12 }
 0x90b   :  { %3516 = vmatpush1.bf16.msra.mxu0 %v4299_v21  ;;  %3548 = vmatpush1.bf16.msra.mxu1 %v4301_v24  ;;  %v2203_v21 = vld [vmem:[#allocation2 + $0x30] sm:$0x30] }
 0x90c   :  { %3518 = vmatprep.subr.bf16.mxu0 %v4305_v27  ;;  %3550 = vmatprep.subr.bf16.mxu1 %v4307_v28 }
 0x90f   :  { %3520 = vmatpush1.bf16.msra.mxu0 %v4311_v37  ;;  %3552 = vmatpush1.bf16.msra.mxu1 %v4313_v19 }
 0x910   :  { %3522 = vmatprep.subr.bf16.mxu0 %v4317_v39  ;;  %3554 = vmatprep.subr.bf16.mxu1 %v4319_v40 }
 0x913   :  { %3524 = vmatpush1.bf16.msra.mxu0 %v4323_v51  ;;  %3556 = vmatpush1.bf16.msra.mxu1 %v4325_v52 }
 0x914   :  { %3526 = vmatprep.subr.bf16.mxu0 %v4329_v58  ;;  %3558 = vmatprep.subr.bf16.mxu1 %v4331_v63  ;;  %v2386_v58 = vrot.slane %v4582_v26, 6  ;;  %v3580_v26 = vpack.c.bf16 %v2600_v33, %v2599_v14 }
 0x917   :  { %3528 = vmatpush1.bf16.msra.mxu0 %v4335_v8  ;;  %3560 = vmatpush1.bf16.msra.mxu1 %v4337_v9 }
 0x918   :  { %3561 = vmatprep.subr.bf16.mxu0 %v3964_v2 }
 0x9cd   :  { %v2274_v57 = vpop.f32.mrb[20].mxu0  ;;  %v2345_v61 = vpop.f32.mrb[28].mxu1 }
 0x9ce   :  { %v2354_v35 = vrot.slane %v2274_v57, 4  ;;  %v2276_v36 = vpop.f32.mrb[21].mxu0  ;;  %v2347_v38 = vpop.f32.mrb[29].mxu1  ;;  %v2356_v12 = vrot.slane %v2345_v61, 4 }
 0x9cf   :  { %v2355_v41 = vrot.slane %v2276_v36, 4  ;;  %v2357_v5 = vrot.slane %v2347_v38, 4 }
 0x9d0   :  { %v2362_v42 = vadd.f32 %v2354_v35, %v2201_v23  ;;  %v2364_v27 = vadd.f32 %v2356_v12, %v2203_v21 }
 0x9d1   :  { %v2363_v50 = vadd.f32 %v2355_v41, %v2202_v49  ;;  %v2365_v11 = vadd.f32 %v2357_v5, %v2204_v6  ;;  %v2394_v41 = vld [vmem:[#allocation2 + $0x28] sm:$0xc0] }
 0x9d2   :  { %v2770_v53 = vmul.f32 -1.442695, %v2362_v42 }
 0x9d3   :  { %v2771_v54 = vmul.f32 -1.442695, %v2363_v50  ;;  %v2772_v24 = vmul.f32 -1.442695, %v2365_v11  ;;  %v2395_v11 = vld [vmem:[#allocation2 + $0x30] sm:$0xc0] }
 0x9d4   :  { %3707 = vpow2.f32 %v2770_v53 }
 0x9d5   :  { %3709 = vpow2.f32 %v2771_v54  ;;  %v2396_v54 = vld [vmem:[#allocation2 + $0x38] sm:$0xc0] }
 0x9d6   :  { %3711 = vpow2.f32 %v2772_v24 }
 0x9d7   :  { %3713 = vtanh.f32 %v2364_v27 }
 0x9de   :  { %v3708_v28 = vpop.eup %3707 }
 0x9df   :  { %v3710_v37 = vpop.eup %3709  ;;  %v2369_v19 = vadd.f32 1.0, %v3708_v28 }
 0x9e0   :  { %v2375_v39 = vadd.f32 1.0, %v3710_v37  ;;  %v3712_v40 = vpop.eup %3711 }
 0x9e1   :  { %3715 = vrcp.f32 %v2369_v19  ;;  %v3714_v51 = vpop.eup %3713  ;;  %v2382_v9 = vadd.f32 1.0, %v3712_v40 }
 0x9e2   :  { %3717 = vrcp.f32 %v2375_v39 }
 0x9e3   :  { %3719 = vrcp.f32 %v2382_v9 }
 0x9eb   :  { %v3716_v52 = vpop.eup %3715 }
 0x9ec   :  { %v3718_v63 = vpop.eup %3717  ;;  %v2389_v8 = vmul.f32 %v3716_v52, %v3714_v51 }
 0x9ed   :  { %v2388_v31 = vmul.f32 %v3718_v63, %v2386_v58  ;;  %v3720_v43 = vpop.eup %3719 }
 0x9ef   :  { %v4618_v7 = vadd.f32 %v2389_v8, %v2388_v31 }
 0x9f1   :  { %3721 = vtanh.f32 %v4618_v7  ;;  %v2578_v51 = vrot.slane %v4618_v7, 6  ;;  %v2776_v7 = vld [vmem:[%s4676_s13] ss:$0 sm:$0xff] }
 0x9fb   :  { %v3722_v44 = vpop.eup %3721 }
 0x9fc   :  { %v2392_v10 = vmul.f32 %v3722_v44, %v3720_v43 }
 0x9fe   :  { %v2398_v45 = vrot.slane %v2392_v10, 4 }
 0xa00   :  { %2465 = vmatmul.mubr.f32.vlgmr.msra.gmra.mrb[22].mxu0 %v2398_v45  ;;  %2536 = vmatmul.mubr.f32.vlgmr.msra.gmra.mrb[30].mxu1 %v2398_v45  ;;  %v2684_v45 = vand.u32 127, %v160_v60 }
 0xa01   :  { %3563 = vmatpush3.bf16.msra.mxu0 %v3562_v55  ;;  %2902 = vmatprep.mubr.msk.f32.mxu0 %vm3965_vm1, %v3963_v0  ;;  %v2393_v0 = vld [vmem:[#allocation2 + $0x20] sm:$0xc0] }
 0xa02   :  { %3564 = vmatprep.subr.bf16.mxu0 %v3964_v2  ;;  %vm2685_vm2 = vcmp.lt.s32.totalorder %v2684_v45, 10 }
 0xa05   :  { %3566 = vmatpush3.bf16.msra.mxu0 %v3565_v4 }
 0xa06   :  { %3567 = vmatprep.subr.bf16.mxu0 %v3964_v2 }
 0xa09   :  { %3569 = vmatpush3.bf16.msra.mxu0 %v3568_v13 }
 0xa0a   :  { %3570 = vmatprep.subr.bf16.mxu0 %v3964_v2 }
 0xa0d   :  { %3572 = vmatpush3.bf16.msra.mxu0 %v3571_v17 }
 0xa0e   :  { %3573 = vmatprep.subr.bf16.mxu0 %v3964_v2 }
 0xa11   :  { %3575 = vmatpush3.bf16.msra.mxu0 %v3574_v25 }
 0xa12   :  { %3576 = vmatprep.subr.bf16.mxu0 %v3964_v2 }
 0xa15   :  { %3578 = vmatpush3.bf16.msra.mxu0 %v3577_v32 }
 0xa16   :  { %3579 = vmatprep.subr.bf16.mxu0 %v3964_v2 }
 0xa19   :  { %3581 = vmatpush3.bf16.msra.mxu0 %v3580_v26 }
 0xa1a   :  { %3582 = vmatprep.subr.bf16.mxu0 %v3964_v2 }
 0xa1d   :  { %3584 = vmatpush3.bf16.msra.mxu0 %v3583_v62 }
 0xad3   :  { %v2466_v22 = vpop.f32.mrb[22].mxu0  ;;  %v2537_v57 = vpop.f32.mrb[30].mxu1 }
 0xad4   :  { %v2546_v61 = vrot.slane %v2466_v22, 2  ;;  %v2468_v35 = vpop.f32.mrb[23].mxu0  ;;  %v2539_v36 = vpop.f32.mrb[31].mxu1  ;;  %v2548_v6 = vrot.slane %v2537_v57, 2 }
 0xad5   :  { %v2547_v38 = vrot.slane %v2468_v35, 2  ;;  %v2549_v53 = vrot.slane %v2539_v36, 2 }
 0xad6   :  { %v2554_v23 = vadd.f32 %v2546_v61, %v2393_v0  ;;  %v2556_v21 = vadd.f32 %v2548_v6, %v2395_v11 }
 0xad7   :  { %v2555_v42 = vadd.f32 %v2547_v38, %v2394_v41  ;;  %v2557_v5 = vadd.f32 %v2549_v53, %v2396_v54 }
 0xad8   :  { %v2773_v49 = vmul.f32 -1.442695, %v2554_v23 }
 0xad9   :  { %v2774_v50 = vmul.f32 -1.442695, %v2555_v42  ;;  %v2775_v12 = vmul.f32 -1.442695, %v2557_v5 }
 0xada   :  { %3723 = vpow2.f32 %v2773_v49 }
 0xadb   :  { %3725 = vpow2.f32 %v2774_v50 }
 0xadc   :  { %3727 = vpow2.f32 %v2775_v12 }
 0xadd   :  { %3729 = vtanh.f32 %v2556_v21 }
 0xae4   :  { %v3724_v24 = vpop.eup %3723 }
 0xae5   :  { %v3726_v27 = vpop.eup %3725  ;;  %v2561_v28 = vadd.f32 1.0, %v3724_v24 }
 0xae6   :  { %v2567_v37 = vadd.f32 1.0, %v3726_v27  ;;  %v3728_v19 = vpop.eup %3727 }
 0xae7   :  { %3731 = vrcp.f32 %v2561_v28  ;;  %v3730_v39 = vpop.eup %3729  ;;  %v2574_v63 = vadd.f32 1.0, %v3728_v19 }
 0xae8   :  { %3733 = vrcp.f32 %v2567_v37 }
 0xae9   :  { %3735 = vrcp.f32 %v2574_v63 }
 0xaf1   :  { %v3732_v40 = vpop.eup %3731 }
 0xaf2   :  { %v3734_v52 = vpop.eup %3733  ;;  %v2581_v58 = vmul.f32 %v3732_v40, %v3730_v39 }
 0xaf3   :  { %v2580_v8 = vmul.f32 %v3734_v52, %v2578_v51  ;;  %v3736_v31 = vpop.eup %3735 }
 0xaf5   :  { %v2582_v9 = vadd.f32 %v2581_v58, %v2580_v8 }
 0xaf7   :  { %2586 = vst [vmem:[#allocation17 - $0x6] sm:$0xc0] %v2582_v9  ;;  %3737 = vtanh.f32 %v2582_v9 }
 0xb01   :  { %v3738_v43 = vpop.eup %3737 }
 0xb02   :  { %v2584_v44 = vmul.f32 %v3738_v43, %v3736_v31 }
 0xb04   :  { %v2611_v10 = vrot.slane %v2584_v44, 6  ;;  %2585 = vst [vmem:[#allocation15 - $0x6] sm:$0xc0] %v2584_v44 }
 0xb06   :  { %2903 = vmatmul.mubr.f32.vlgmr.msra.gmra.mrb[24].mxu0 %v2611_v10 }
 0xbd9   :  { %v2679_v46 = vpop.f32.mrb[24].mxu0 }
 0xbda   :  { %v2680_v47 = vadd.f32 %v2776_v7, %v2679_v46  ;;  %v2904_v55 = vpop.f32.mrb[25].mxu0 }
 0xbdc   :  { %v2686_v2 = vsel %vm2685_vm2, %v2680_v47, -3.4028235e+38 }
 0xbdd   :  { %v2688_v3 = vsel %vm2687_vm3, %v2686_v2, -inf }
 0xbde   :  { %2689 = vmax.xlane.f32.xlu0 %v2688_v3 }
 0xc6b   :  { %v2690_v56 = vpop.xlane.xlu0 %2689 }
 0xc6c   :  { %v2691_v4 = vsub.f32 %v2686_v2, %v2690_v56 }
 0xc6e   :  { %v2692_v59 = vmul.f32 1.442695, %v2691_v4 }
 0xc70   :  { %3739 = vpow2.f32 %v2692_v59 }
 0xc7a   :  { %v3740_v1 = vpop.eup %3739 }
 0xc7b   :  { %v2694_v13 = vsel %vm2687_vm3, %v3740_v1, 0.0 }
 0xc7c   :  { %2695 = vadd.xlane.f32.xlu0 %v2694_v13 }
 0xc7d   :  { %3886 = shalt.err (!%p3883_p10)
}
 0xc7e   :  { %s3887_s27 = scalar_lea.hbm %s4680_s17, 32 }
 0xc7f   :  { %p3888_p11 = scmp.ne.s32.totalorder %s4680_s17, %s3887_s27  ;;  %p3891_p12 = scmp.lt.u32.totalorder %s3887_s27, %s4680_s17 }
 0xc81   :  { %p3893_p13 = pnand %p3891_p12, %p3888_p11 }
 0xc83   :  { %3896 = shalt.err (!%p3893_p13)
}
 0xc84   :  { %2719 = dma.vmem_to_hbm [thread:$0]  %s2717_s23, 32, %s4680_s17, [#allocation16]  }
 0xc85   :  { %s3967_s16 = smov [#allocation17]  }
 0xc86   :  { %s2726_s1 = sshll.u32 %s3967_s16, 4  ;;  %s2727_s1 = int_to_ptr.vmem [resolvable:$true] %s2726_s1 }
 0xc87   :  { %s3897_s20 = scalar_lea.vmem %s2727_s1, 32  ;;  %p3902_p1 = scmp.lt.s32.totalorder %s2727_s1, %s2727_s1 }
 0xc88   :  { %p3898_p0 = scmp.ne.s32.totalorder %s2727_s1, %s3897_s20  ;;  %p3903_p2 = scmp.lt.s32.totalorder %s3897_s20, %s3897_s20 }
 0xc8a   :  { %p3904_p3 = por %p3903_p2, %p3902_p1 }
 0xc8c   :  { %p3905_p4 = pnand %p3904_p3, %p3898_p0 }
 0xc8e   :  { %3908 = shalt.err (!%p3905_p4)
}
 0xc8f   :  { %s4696_s4 = sld [smem:[#allocation28_spill]] }
 0xc95   :  { %s3909_s6 = scalar_lea.hbm %s4696_s4, 32 }
 0xc96   :  { %p3910_p5 = scmp.ne.s32.totalorder %s4696_s4, %s3909_s6  ;;  %p3913_p6 = scmp.lt.u32.totalorder %s3909_s6, %s4696_s4 }
 0xc98   :  { %p3915_p7 = pnand %p3913_p6, %p3910_p5 }
 0xc9a   :  { %3918 = shalt.err (!%p3915_p7)
}
 0xc9b   :  { %2729 = dma.vmem_to_hbm [thread:$0]  %s2727_s1, 32, %s4696_s4, [#allocation16]  }
 0xc9c   :  { %s3968_s14 = smov [#allocation14]  }
 0xc9d   :  { %s2706_s19 = sshll.u32 %s3968_s14, 4  ;;  %s2707_s19 = int_to_ptr.vmem [resolvable:$true] %s2706_s19 }
 0xc9e   :  { %s3919_s11 = scalar_lea.vmem %s2707_s19, 32  ;;  %p3924_p9 = scmp.lt.s32.totalorder %s2707_s19, %s2707_s19 }
 0xc9f   :  { %p3920_p8 = scmp.ne.s32.totalorder %s2707_s19, %s3919_s11  ;;  %p3925_p10 = scmp.lt.s32.totalorder %s3919_s11, %s3919_s11 }
 0xca1   :  { %p3926_p11 = por %p3925_p10, %p3924_p9 }
 0xca3   :  { %p3927_p12 = pnand %p3926_p11, %p3920_p8 }
 0xd09   :  { %v2696_v60 = vpop.xlane.xlu0 %2695 }
 0xd0a   :  { %3741 = vrcp.f32 %v2696_v60 }
 0xd14   :  { %v3742_v15 = vpop.eup %3741 }
 0xd15   :  { %v2698_v16 = vmul.f32 %v3742_v15, %v3740_v1 }
 0xd17   :  { %2699 = vst [vmem:[#allocation14] sm:$0x3] %v2698_v16 }
 0xd18   :  { %3930 = shalt.err (!%p3927_p12)
}
 0xd19   :  { %s4697_s2 = sld [smem:[#allocation27_spill]] }
 0xd1f   :  { %s3931_s28 = scalar_lea.hbm %s4697_s2, 32 }
 0xd20   :  { %p3932_p13 = scmp.ne.s32.totalorder %s4697_s2, %s3931_s28  ;;  %p3935_p0 = scmp.lt.u32.totalorder %s3931_s28, %s4697_s2 }
 0xd22   :  { %p3937_p1 = pnand %p3935_p0, %p3932_p13 }
 0xd24   :  { %3940 = shalt.err (!%p3937_p1)
}
 0xd25   :  { %2709 = dma.vmem_to_hbm [thread:$0]  %s2707_s19, 32, %s4697_s2, [#allocation5]  }
 0xd26   :  { %3949 = dma.done.wait [#allocation5], 32  }
 0xd27   :  { %3950 = vsyncadd [#allocation5], 4294967264 }
 0xd28   :  { %3951 = dma.done.wait [#allocation16], 64  }
 0xd29   :  { %3952 = vsyncadd [#allocation16], 4294967232 }
 0xd2a   :  { %2739 = vsyncpa [#allocation4], 1 }
 0xd2b   :  { %2740 = vsyncpa [#allocation7], 1 }
 0xd2c   :  { %2741 = vsyncpa [#allocation10], 1 }
 0xd2d   :  { %2742 = vsyncpa [#allocation13], 1 }
 0xd2e   :  { %2743 = vsyncpa [#allocation5], 1 }
 0xd2f   :  { %2744 = vsyncpa [#allocation16], 1 }

</bundles_post_ra>
